<compile_context>
chip_gen: v6e
topology: v6e:2x2x1
jax: 0.10.0
libtpu: 0.0.40
codegen_flags: <defaults>
</compile_context>

<pallas_src>
import functools
import numpy as np
import jax
import jax.numpy as jnp
from jax import lax
from jax.experimental import pallas as pl
from jax.experimental.pallas import tpu as pltpu


def _round_up(x, m):
    return ((x + m - 1) // m) * m


def _channel_tiling(cout):
    # <=128 channels: pad only to a sublane multiple (8) -> minimal writeback.
    # >128: lane-dense 128-wide tiles.
    if cout <= 128:
        cp = _round_up(cout, 8)
        return cp, cp
    cp = _round_up(cout, 128)
    return cp, 128


def _vmem_limit_bytes(estimate_bytes):
    # Budget-derived scoped-VMEM request with headroom, clamped to ~75% of the
    # physical VMEM (96 MiB on v5e/v6e, 48 MiB on v7x).
    try:
        cap = int(pltpu.get_tpu_info().vmem_capacity_bytes)
    except Exception:  # pragma: no cover - conservative fallback
        cap = 64 << 20
    hi = max(32 << 20, int(0.75 * cap))
    return int(max(32 << 20, min(hi, 2 * int(estimate_bytes) + (4 << 20))))


# ----------------------------------------------------------------------------
# Pallas kernels
# ----------------------------------------------------------------------------
def _conv_accumulate(x_ref, w_ref, *, kh, kw, stride, ho, wo, ct):
    """Fused im2col: sum of kh*kw shifted-slab matmuls.  Returns (ho*wo, ct) f32."""
    cin = x_ref.shape[-1]
    hw = ho * wo
    acc = jnp.zeros((hw, ct), jnp.float32)
    for i in range(kh):
        for j in range(kw):
            if stride == 1:
                xs = x_ref[0, i:i + ho, j:j + wo, :]
            else:
                xs = x_ref[0, pl.ds(i, ho, stride), pl.ds(j, wo, stride), :]
            acc = acc + jnp.dot(xs.reshape(hw, cin), w_ref[i * kw + j],
                                preferred_element_type=jnp.float32)
    return acc


def _conv_relu_kernel(x_ref, w_ref, b_ref, o_ref, *, apply_relu, kh, kw,
                      stride, ho, wo):
    # x_ref: (1, Hp, Wp, Cin)  w_ref: (kh*kw, Cin, Ct)  b_ref: (1, Ct)
    # o_ref: (1, Ct, Ho*Wo)  -- NCHW-flattened block.
    ct = o_ref.shape[1]
    y = _conv_accumulate(x_ref, w_ref, kh=kh, kw=kw, stride=stride,
                         ho=ho, wo=wo, ct=ct)
    y = y + b_ref[...]
    if apply_relu:
        y = jnp.maximum(y, 0.0)
    # One in-kernel 2-D transpose instead of a separate full-tensor XLA
    # slice + NCHW-permute pass over the output.
    o_ref[0] = y.T


def _conv_relu_up_kernel(x_ref, w_ref, b_ref, rw_ref, o_ref, *, apply_relu,
                         kh, kw, stride, ho_c, wo_c, ho_u, wo_u, h_taps):
    # x_ref: (1, Hp, Wp, Cin)  w_ref: (kh*kw, Cin, Ct)  b_ref: (1, Ct)
    # rw_ref: (Wo_u, Wo_c)     o_ref: (1, Ho_u, Wo_u, Ct)
    ct = o_ref.shape[-1]
    y = _conv_accumulate(x_ref, w_ref, kh=kh, kw=kw, stride=stride,
                         ho=ho_c, wo=wo_c, ct=ct)
    y = y + b_ref[...]
    if apply_relu:
        y = jnp.maximum(y, 0.0)                          # (Ho_c*Wo_c, Ct)
    y3 = y.reshape(ho_c, wo_c, ct)

    # Separable bilinear, H axis: each upsampled row is a 2-tap blend of two
    # statically-known conv rows -> whole-slab (Wo_c, Ct) VPU FMAs along the
    # outer dim (no masked single-sublane traffic, no VMEM scratch).
    rows = [(a0 * y3[i0] + a1 * y3[i1])[None] for (i0, i1, a0, a1) in h_taps]
    th = jnp.concatenate(rows, axis=0)                   # (Ho_u, Wo_c, Ct)

    # Separable bilinear, W axis: one batched 2-tap blend matmul on the MXU.
    rwb = jnp.broadcast_to(rw_ref[...][None], (ho_u, wo_u, wo_c))
    out = jnp.einsum('uvw,uwc->uvc', rwb, th,
                     preferred_element_type=jnp.float32)  # (Ho_u, Wo_u, Ct)
    o_ref[0] = out                                        # single block store


# ----------------------------------------------------------------------------
# Bilinear (align_corners=False) helpers and parameter init
# ----------------------------------------------------------------------------
def _bilinear_src(in_size, out_size):
    o = np.arange(out_size, dtype=np.float64)
    src = (o + 0.5) * (in_size / out_size) - 0.5
    src = np.maximum(src, 0.0)
    i0 = np.minimum(np.floor(src).astype(np.int64), in_size - 1)
    i1 = np.minimum(i0 + 1, in_size - 1)
    w1 = src - i0
    w0 = 1.0 - w1
    return i0, i1, w0, w1


def _bilinear_taps(in_size, out_size):
    i0, i1, w0, w1 = _bilinear_src(in_size, out_size)
    return tuple((int(a), int(b), float(np.float32(c)), float(np.float32(d)))
                 for a, b, c, d in zip(i0, i1, w0, w1))


def _bilinear_matrix(in_size, out_size):
    i0, i1, w0, w1 = _bilinear_src(in_size, out_size)
    r = np.zeros((out_size, in_size), dtype=np.float32)
    np.add.at(r, (np.arange(out_size), i0), w0)
    np.add.at(r, (np.arange(out_size), i1), w1)
    return r


def init_basic_conv_params(key, in_planes, out_planes, kernel_size):
    kw_key, kb_key = jax.random.split(key)
    fan_in = in_planes * kernel_size * kernel_size
    bound = 1.0 / np.sqrt(fan_in)
    w = jax.random.uniform(kw_key, (out_planes, in_planes, kernel_size, kernel_size),
                           jnp.float32, -bound, bound)
    b = jax.random.uniform(kb_key, (out_planes,), jnp.float32, -bound, bound)
    return w, b


# ----------------------------------------------------------------------------
# Wrapper: BasicConvWithUpSample forward
# ----------------------------------------------------------------------------
def basic_conv_with_upsample(x, w, b, *, stride=1, padding=0, dilation=1,
                             groups=1, relu=True, bn=False, up_size=None,
                             matmul_dtype=jnp.float32):
    """x: (N, Cin, H, W) f32 NCHW; w: (Cout, Cin, KH, KW); b: (Cout,).
    Returns NCHW f32 (optionally bilinearly upsampled to up_size)."""
    if bn:
        # TODO(synk): BatchNorm2d branch (bn=True) is not implemented.
        raise NotImplementedError("bn=True is not supported")
    if dilation != 1 or groups != 1:
        # TODO(synk): dilation!=1 / groups!=1 are not supported (module defaults are 1).
        raise NotImplementedError("dilation/groups != 1 are not supported")

    n, cin, h, w_in = x.shape
    cout, _, kh, kw = w.shape
    ho = (h + 2 * padding - kh) // stride + 1
    wo = (w_in + 2 * padding - kw) // stride + 1
    hw = ho * wo
    hp, wp = h + 2 * padding, w_in + 2 * padding

    # Padded NHWC activations: the kernels consume them directly and build the
    # im2col contraction on the fly (no patch tensor in HBM).
    x_p = jnp.transpose(x, (0, 2, 3, 1))
    if padding:
        x_p = jnp.pad(x_p, ((0, 0), (padding, padding), (padding, padding), (0, 0)))
    x_p = x_p.astype(matmul_dtype)

    cp, ct = _channel_tiling(cout)
    wmat = jnp.transpose(w, (2, 3, 1, 0)).reshape(kh * kw, cin, cout)
    wmat = jnp.pad(wmat, ((0, 0), (0, 0), (0, cp - cout))).astype(matmul_dtype)
    bmat = jnp.pad(b, (0, cp - cout)).reshape(1, cp).astype(jnp.float32)

    itemsize = jnp.dtype(matmul_dtype).itemsize
    xw_bytes = hp * wp * cin * itemsize + kh * kw * cin * ct * itemsize

    if up_size is None:
        est = 2 * (xw_bytes + ct * hw * 4) + 2 * hw * ct * 4
        out = pl.pallas_call(
            functools.partial(_conv_relu_kernel, apply_relu=relu, kh=kh, kw=kw,
                              stride=stride, ho=ho, wo=wo),
            out_shape=jax.ShapeDtypeStruct((n, cp, hw), jnp.float32),
            grid_spec=pltpu.PrefetchScalarGridSpec(
                num_scalar_prefetch=0,
                grid=(n, cp // ct),
                in_specs=[
                    pl.BlockSpec((1, hp, wp, cin), lambda i, j: (i, 0, 0, 0)),
                    pl.BlockSpec((kh * kw, cin, ct), lambda i, j: (0, 0, j)),
                    pl.BlockSpec((1, ct), lambda i, j: (0, j)),
                ],
                out_specs=pl.BlockSpec((1, ct, hw), lambda i, j: (i, j, 0)),
            ),
            compiler_params=pltpu.CompilerParams(
                dimension_semantics=("parallel", "parallel"),
                vmem_limit_bytes=_vmem_limit_bytes(est)),
        )(x_p, wmat, bmat)
        y = out.reshape(n, cp, ho, wo)                      # free metadata reshape
        return y if cp == cout else y[:, :cout]

    ho_u, wo_u = up_size
    h_taps = _bilinear_taps(ho, ho_u)
    rw = jnp.asarray(_bilinear_matrix(wo, wo_u))            # (Wo_u, Wo_c) f32
    est = (2 * (xw_bytes + ho_u * wo_u * ct * 4)
           + hw * ct * 4 + ho_u * wo * ct * 4 + ho_u * wo_u * wo * 4)
    out = pl.pallas_call(
        functools.partial(_conv_relu_up_kernel, apply_relu=relu, kh=kh, kw=kw,
                          stride=stride, ho_c=ho, wo_c=wo, ho_u=ho_u,
                          wo_u=wo_u, h_taps=h_taps),
        out_shape=jax.ShapeDtypeStruct((n, ho_u, wo_u, cp), jnp.float32),
        grid_spec=pltpu.PrefetchScalarGridSpec(
            num_scalar_prefetch=0,
            grid=(n, cp // ct),
            in_specs=[
                pl.BlockSpec((1, hp, wp, cin), lambda i, j: (i, 0, 0, 0)),
                pl.BlockSpec((kh * kw, cin, ct), lambda i, j: (0, 0, j)),
                pl.BlockSpec((1, ct), lambda i, j: (0, j)),
                pl.BlockSpec((wo_u, wo), lambda i, j: (0, 0)),
            ],
            out_specs=pl.BlockSpec((1, ho_u, wo_u, ct), lambda i, j: (i, 0, 0, j)),
        ),
        compiler_params=pltpu.CompilerParams(
            dimension_semantics=("parallel", "parallel"),
            vmem_limit_bytes=_vmem_limit_bytes(est)),
    )(x_p, wmat, bmat, rw)
    y = out if cp == cout else out[..., :cout]
    return jnp.transpose(y, (0, 3, 1, 2))                   # NHWC -> NCHW


# ----------------------------------------------------------------------------
# Reference (pure JAX) for verification
# ----------------------------------------------------------------------------
def _reference(x, w, b, *, stride, padding, relu, up_size):
    y = lax.conv_general_dilated(
        x, w, window_strides=(stride, stride),
        padding=((padding, padding), (padding, padding)),
        dimension_numbers=("NCHW", "OIHW", "NCHW"))
    y = y + b[None, :, None, None]
    if relu:
        y = jnp.maximum(y, 0.0)
    if up_size is not None:
        n, c, h, wdt = y.shape
        ho, wo = up_size
        r = jnp.asarray(np.kron(_bilinear_matrix(h, ho), _bilinear_matrix(wdt, wo)))
        y = jnp.einsum("ncs,os->nco", y.reshape(n, c, h * wdt), r).reshape(n, c, ho, wo)
    return y


# ----------------------------------------------------------------------------
if __name__ == "__main__":
    key = jax.random.PRNGKey(0)
    kx, kp = jax.random.split(key)

    # Small shapes consistent with the module: N=2, Cin=4, H=W=16.
    N, Cin, H, W = 2, 4, 16, 16
    Cout, K, stride, padding = 8, 3, 1, 1
    up_size = (32, 32)

    x = jax.random.normal(kx, (N, Cin, H, W), jnp.float32)
    w, b = init_basic_conv_params(kp, Cin, Cout, K)

    # f32 path with upsample.
    out = basic_conv_with_upsample(x, w, b, stride=stride, padding=padding,
                                   relu=True, up_size=up_size)
    out = jax.block_until_ready(out)
    ref = jax.block_until_ready(
        _reference(x, w, b, stride=stride, padding=padding, relu=True,
                   up_size=up_size))
    assert out.shape == (N, Cout, up_size[0], up_size[1]), out.shape
    assert out.dtype == jnp.float32
    np.testing.assert_allclose(np.asarray(out), np.asarray(ref),
                               rtol=1e-4, atol=1e-4)

    # Conv-only (no upsample) path.
    out2 = jax.block_until_ready(
        basic_conv_with_upsample(x, w, b, stride=stride, padding=padding,
                                 relu=True, up_size=None))
    ref2 = jax.block_until_ready(
        _reference(x, w, b, stride=stride, padding=padding, relu=True,
                   up_size=None))
    assert out2.shape == (N, Cout, H, W), out2.shape
    np.testing.assert_allclose(np.asarray(out2), np.asarray(ref2),
                               rtol=1e-4, atol=1e-4)

    # bf16 MXU inputs (works on v5e/v6e/v7x): compare against a reference fed
    # the same bf16-rounded operands (f32 accumulation inside the kernel).
    out3 = jax.block_until_ready(
        basic_conv_with_upsample(x, w, b, stride=stride, padding=padding,
                                 relu=True, up_size=up_size,
                                 matmul_dtype=jnp.bfloat16))
    x_bf = x.astype(jnp.bfloat16).astype(jnp.float32)
    w_bf = w.astype(jnp.bfloat16).astype(jnp.float32)
    ref3 = jax.block_until_ready(
        _reference(x_bf, w_bf, b, stride=stride, padding=padding, relu=True,
                   up_size=up_size))
    np.testing.assert_allclose(np.asarray(out3), np.asarray(ref3),
                               rtol=5e-3, atol=5e-3)

    print("KERNEL_OK")
</pallas_src>

<mosaic_0001>
module attributes {stable_mosaic.version = 11 : i64} {
  func.func @_conv_relu_up_kernel(%arg0: i32, %arg1: i32, %arg2: memref<1x18x18x4xf32, #tpu.memory_space<vmem>>, %arg3: memref<9x4x8xf32, #tpu.memory_space<vmem>>, %arg4: memref<1x8xf32, #tpu.memory_space<vmem>>, %arg5: memref<32x16xf32, #tpu.memory_space<vmem>>, %arg6: memref<1x32x32x8xf32, #tpu.memory_space<vmem>>) attributes {dimension_semantics = [#tpu.dimension_semantics<parallel>, #tpu.dimension_semantics<parallel>], iteration_bounds = array<i64: 2, 1>, scalar_prefetch = 0 : i64, scratch_operands = 0 : i64, tpu.core_type = #tpu.core_type<tc>, window_params = [{transform_indices = @transform_0, window_bounds = array<i64: 1, 18, 18, 4>}, {transform_indices = @transform_1, window_bounds = array<i64: 9, 4, 8>}, {transform_indices = @transform_2, window_bounds = array<i64: 1, 8>}, {pipeline_mode = #tpu.pipeline_mode<synchronous>, transform_indices = @transform_3, window_bounds = array<i64: 32, 16>}, {transform_indices = @transform_4, window_bounds = array<i64: 1, 32, 32, 8>}]} {
    %cst = arith.constant 0.000000e+00 : f32
    %0 = vector.broadcast %cst : f32 to vector<256x8xf32>
    %c0 = arith.constant 0 : index
    %c0_0 = arith.constant 0 : index
    %c0_1 = arith.constant 0 : index
    %c0_2 = arith.constant 0 : index
    %1 = vector.load %arg2[%c0, %c0_0, %c0_1, %c0_2] : memref<1x18x18x4xf32, #tpu.memory_space<vmem>>, vector<1x16x16x4xf32>
    %2 = vector.shape_cast %1 : vector<1x16x16x4xf32> to vector<16x16x4xf32>
    %3 = vector.shape_cast %2 : vector<16x16x4xf32> to vector<256x4xf32>
    %c0_3 = arith.constant 0 : index
    %c0_4 = arith.constant 0 : index
    %c0_5 = arith.constant 0 : index
    %4 = vector.load %arg3[%c0_3, %c0_4, %c0_5] : memref<9x4x8xf32, #tpu.memory_space<vmem>>, vector<1x4x8xf32>
    %5 = vector.shape_cast %4 : vector<1x4x8xf32> to vector<4x8xf32>
    %cst_6 = arith.constant dense<0.000000e+00> : vector<256x8xf32>
    %6 = tpu.matmul %3, %5, %cst_6 {dimension_numbers = #tpu.dot_dimension_numbers<[1], [0], [0], [1], [0, 0, 1, 1], [], []>} : vector<256x4xf32>, vector<4x8xf32>, vector<256x8xf32> -> vector<256x8xf32>
    %7 = arith.addf %0, %6 : vector<256x8xf32>
    %c0_7 = arith.constant 0 : index
    %c0_8 = arith.constant 0 : index
    %c1 = arith.constant 1 : index
    %c0_9 = arith.constant 0 : index
    %8 = vector.load %arg2[%c0_7, %c0_8, %c1, %c0_9] : memref<1x18x18x4xf32, #tpu.memory_space<vmem>>, vector<1x16x16x4xf32>
    %9 = vector.shape_cast %8 : vector<1x16x16x4xf32> to vector<16x16x4xf32>
    %10 = vector.shape_cast %9 : vector<16x16x4xf32> to vector<256x4xf32>
    %c1_10 = arith.constant 1 : index
    %c0_11 = arith.constant 0 : index
    %c0_12 = arith.constant 0 : index
    %11 = vector.load %arg3[%c1_10, %c0_11, %c0_12] : memref<9x4x8xf32, #tpu.memory_space<vmem>>, vector<1x4x8xf32>
    %12 = vector.shape_cast %11 : vector<1x4x8xf32> to vector<4x8xf32>
    %cst_13 = arith.constant dense<0.000000e+00> : vector<256x8xf32>
    %13 = tpu.matmul %10, %12, %cst_13 {dimension_numbers = #tpu.dot_dimension_numbers<[1], [0], [0], [1], [0, 0, 1, 1], [], []>} : vector<256x4xf32>, vector<4x8xf32>, vector<256x8xf32> -> vector<256x8xf32>
    %14 = arith.addf %7, %13 : vector<256x8xf32>
    %c0_14 = arith.constant 0 : index
    %c0_15 = arith.constant 0 : index
    %c2 = arith.constant 2 : index
    %c0_16 = arith.constant 0 : index
    %15 = vector.load %arg2[%c0_14, %c0_15, %c2, %c0_16] : memref<1x18x18x4xf32, #tpu.memory_space<vmem>>, vector<1x16x16x4xf32>
    %16 = vector.shape_cast %15 : vector<1x16x16x4xf32> to vector<16x16x4xf32>
    %17 = vector.shape_cast %16 : vector<16x16x4xf32> to vector<256x4xf32>
    %c2_17 = arith.constant 2 : index
    %c0_18 = arith.constant 0 : index
    %c0_19 = arith.constant 0 : index
    %18 = vector.load %arg3[%c2_17, %c0_18, %c0_19] : memref<9x4x8xf32, #tpu.memory_space<vmem>>, vector<1x4x8xf32>
    %19 = vector.shape_cast %18 : vector<1x4x8xf32> to vector<4x8xf32>
    %cst_20 = arith.constant dense<0.000000e+00> : vector<256x8xf32>
    %20 = tpu.matmul %17, %19, %cst_20 {dimension_numbers = #tpu.dot_dimension_numbers<[1], [0], [0], [1], [0, 0, 1, 1], [], []>} : vector<256x4xf32>, vector<4x8xf32>, vector<256x8xf32> -> vector<256x8xf32>
    %21 = arith.addf %14, %20 : vector<256x8xf32>
    %c0_21 = arith.constant 0 : index
    %c1_22 = arith.constant 1 : index
    %c0_23 = arith.constant 0 : index
    %c0_24 = arith.constant 0 : index
    %22 = vector.load %arg2[%c0_21, %c1_22, %c0_23, %c0_24] : memref<1x18x18x4xf32, #tpu.memory_space<vmem>>, vector<1x16x16x4xf32>
    %23 = vector.shape_cast %22 : vector<1x16x16x4xf32> to vector<16x16x4xf32>
    %24 = vector.shape_cast %23 : vector<16x16x4xf32> to vector<256x4xf32>
    %c3 = arith.constant 3 : index
    %c0_25 = arith.constant 0 : index
    %c0_26 = arith.constant 0 : index
    %25 = vector.load %arg3[%c3, %c0_25, %c0_26] : memref<9x4x8xf32, #tpu.memory_space<vmem>>, vector<1x4x8xf32>
    %26 = vector.shape_cast %25 : vector<1x4x8xf32> to vector<4x8xf32>
    %cst_27 = arith.constant dense<0.000000e+00> : vector<256x8xf32>
    %27 = tpu.matmul %24, %26, %cst_27 {dimension_numbers = #tpu.dot_dimension_numbers<[1], [0], [0], [1], [0, 0, 1, 1], [], []>} : vector<256x4xf32>, vector<4x8xf32>, vector<256x8xf32> -> vector<256x8xf32>
    %28 = arith.addf %21, %27 : vector<256x8xf32>
    %c0_28 = arith.constant 0 : index
    %c1_29 = arith.constant 1 : index
    %c1_30 = arith.constant 1 : index
    %c0_31 = arith.constant 0 : index
    %29 = vector.load %arg2[%c0_28, %c1_29, %c1_30, %c0_31] : memref<1x18x18x4xf32, #tpu.memory_space<vmem>>, vector<1x16x16x4xf32>
    %30 = vector.shape_cast %29 : vector<1x16x16x4xf32> to vector<16x16x4xf32>
    %31 = vector.shape_cast %30 : vector<16x16x4xf32> to vector<256x4xf32>
    %c4 = arith.constant 4 : index
    %c0_32 = arith.constant 0 : index
    %c0_33 = arith.constant 0 : index
    %32 = vector.load %arg3[%c4, %c0_32, %c0_33] : memref<9x4x8xf32, #tpu.memory_space<vmem>>, vector<1x4x8xf32>
    %33 = vector.shape_cast %32 : vector<1x4x8xf32> to vector<4x8xf32>
    %cst_34 = arith.constant dense<0.000000e+00> : vector<256x8xf32>
    %34 = tpu.matmul %31, %33, %cst_34 {dimension_numbers = #tpu.dot_dimension_numbers<[1], [0], [0], [1], [0, 0, 1, 1], [], []>} : vector<256x4xf32>, vector<4x8xf32>, vector<256x8xf32> -> vector<256x8xf32>
    %35 = arith.addf %28, %34 : vector<256x8xf32>
    %c0_35 = arith.constant 0 : index
    %c1_36 = arith.constant 1 : index
    %c2_37 = arith.constant 2 : index
    %c0_38 = arith.constant 0 : index
    %36 = vector.load %arg2[%c0_35, %c1_36, %c2_37, %c0_38] : memref<1x18x18x4xf32, #tpu.memory_space<vmem>>, vector<1x16x16x4xf32>
    %37 = vector.shape_cast %36 : vector<1x16x16x4xf32> to vector<16x16x4xf32>
    %38 = vector.shape_cast %37 : vector<16x16x4xf32> to vector<256x4xf32>
    %c5 = arith.constant 5 : index
    %c0_39 = arith.constant 0 : index
    %c0_40 = arith.constant 0 : index
    %39 = vector.load %arg3[%c5, %c0_39, %c0_40] : memref<9x4x8xf32, #tpu.memory_space<vmem>>, vector<1x4x8xf32>
    %40 = vector.shape_cast %39 : vector<1x4x8xf32> to vector<4x8xf32>
    %cst_41 = arith.constant dense<0.000000e+00> : vector<256x8xf32>
    %41 = tpu.matmul %38, %40, %cst_41 {dimension_numbers = #tpu.dot_dimension_numbers<[1], [0], [0], [1], [0, 0, 1, 1], [], []>} : vector<256x4xf32>, vector<4x8xf32>, vector<256x8xf32> -> vector<256x8xf32>
    %42 = arith.addf %35, %41 : vector<256x8xf32>
    %c0_42 = arith.constant 0 : index
    %c2_43 = arith.constant 2 : index
    %c0_44 = arith.constant 0 : index
    %c0_45 = arith.constant 0 : index
    %43 = vector.load %arg2[%c0_42, %c2_43, %c0_44, %c0_45] : memref<1x18x18x4xf32, #tpu.memory_space<vmem>>, vector<1x16x16x4xf32>
    %44 = vector.shape_cast %43 : vector<1x16x16x4xf32> to vector<16x16x4xf32>
    %45 = vector.shape_cast %44 : vector<16x16x4xf32> to vector<256x4xf32>
    %c6 = arith.constant 6 : index
    %c0_46 = arith.constant 0 : index
    %c0_47 = arith.constant 0 : index
    %46 = vector.load %arg3[%c6, %c0_46, %c0_47] : memref<9x4x8xf32, #tpu.memory_space<vmem>>, vector<1x4x8xf32>
    %47 = vector.shape_cast %46 : vector<1x4x8xf32> to vector<4x8xf32>
    %cst_48 = arith.constant dense<0.000000e+00> : vector<256x8xf32>
    %48 = tpu.matmul %45, %47, %cst_48 {dimension_numbers = #tpu.dot_dimension_numbers<[1], [0], [0], [1], [0, 0, 1, 1], [], []>} : vector<256x4xf32>, vector<4x8xf32>, vector<256x8xf32> -> vector<256x8xf32>
    %49 = arith.addf %42, %48 : vector<256x8xf32>
    %c0_49 = arith.constant 0 : index
    %c2_50 = arith.constant 2 : index
    %c1_51 = arith.constant 1 : index
    %c0_52 = arith.constant 0 : index
    %50 = vector.load %arg2[%c0_49, %c2_50, %c1_51, %c0_52] : memref<1x18x18x4xf32, #tpu.memory_space<vmem>>, vector<1x16x16x4xf32>
    %51 = vector.shape_cast %50 : vector<1x16x16x4xf32> to vector<16x16x4xf32>
    %52 = vector.shape_cast %51 : vector<16x16x4xf32> to vector<256x4xf32>
    %c7 = arith.constant 7 : index
    %c0_53 = arith.constant 0 : index
    %c0_54 = arith.constant 0 : index
    %53 = vector.load %arg3[%c7, %c0_53, %c0_54] : memref<9x4x8xf32, #tpu.memory_space<vmem>>, vector<1x4x8xf32>
    %54 = vector.shape_cast %53 : vector<1x4x8xf32> to vector<4x8xf32>
    %cst_55 = arith.constant dense<0.000000e+00> : vector<256x8xf32>
    %55 = tpu.matmul %52, %54, %cst_55 {dimension_numbers = #tpu.dot_dimension_numbers<[1], [0], [0], [1], [0, 0, 1, 1], [], []>} : vector<256x4xf32>, vector<4x8xf32>, vector<256x8xf32> -> vector<256x8xf32>
    %56 = arith.addf %49, %55 : vector<256x8xf32>
    %c0_56 = arith.constant 0 : index
    %c2_57 = arith.constant 2 : index
    %c2_58 = arith.constant 2 : index
    %c0_59 = arith.constant 0 : index
    %57 = vector.load %arg2[%c0_56, %c2_57, %c2_58, %c0_59] : memref<1x18x18x4xf32, #tpu.memory_space<vmem>>, vector<1x16x16x4xf32>
    %58 = vector.shape_cast %57 : vector<1x16x16x4xf32> to vector<16x16x4xf32>
    %59 = vector.shape_cast %58 : vector<16x16x4xf32> to vector<256x4xf32>
    %c8 = arith.constant 8 : index
    %c0_60 = arith.constant 0 : index
    %c0_61 = arith.constant 0 : index
    %60 = vector.load %arg3[%c8, %c0_60, %c0_61] : memref<9x4x8xf32, #tpu.memory_space<vmem>>, vector<1x4x8xf32>
    %61 = vector.shape_cast %60 : vector<1x4x8xf32> to vector<4x8xf32>
    %cst_62 = arith.constant dense<0.000000e+00> : vector<256x8xf32>
    %62 = tpu.matmul %59, %61, %cst_62 {dimension_numbers = #tpu.dot_dimension_numbers<[1], [0], [0], [1], [0, 0, 1, 1], [], []>} : vector<256x4xf32>, vector<4x8xf32>, vector<256x8xf32> -> vector<256x8xf32>
    %63 = arith.addf %56, %62 : vector<256x8xf32>
    %c0_63 = arith.constant 0 : index
    %c0_64 = arith.constant 0 : index
    %64 = vector.load %arg4[%c0_63, %c0_64] : memref<1x8xf32, #tpu.memory_space<vmem>>, vector<1x8xf32>
    %65 = vector.broadcast %64 : vector<1x8xf32> to vector<256x8xf32>
    %66 = arith.addf %63, %65 : vector<256x8xf32>
    %cst_65 = arith.constant 0.000000e+00 : f32
    %67 = vector.broadcast %cst_65 : f32 to vector<256x8xf32>
    %68 = arith.maximumf %66, %67 : vector<256x8xf32>
    %69 = vector.shape_cast %68 : vector<256x8xf32> to vector<16x16x8xf32>
    %70 = vector.extract_strided_slice %69 {offsets = [0, 0, 0], sizes = [1, 16, 8], strides = [1, 1, 1]} : vector<16x16x8xf32> to vector<1x16x8xf32>
    %71 = vector.shape_cast %70 : vector<1x16x8xf32> to vector<16x8xf32>
    %cst_66 = arith.constant 1.000000e+00 : f32
    %72 = vector.broadcast %cst_66 : f32 to vector<16x8xf32>
    %73 = arith.mulf %72, %71 : vector<16x8xf32>
    %74 = vector.extract_strided_slice %69 {offsets = [1, 0, 0], sizes = [1, 16, 8], strides = [1, 1, 1]} : vector<16x16x8xf32> to vector<1x16x8xf32>
    %75 = vector.shape_cast %74 : vector<1x16x8xf32> to vector<16x8xf32>
    %cst_67 = arith.constant 0.000000e+00 : f32
    %76 = vector.broadcast %cst_67 : f32 to vector<16x8xf32>
    %77 = arith.mulf %76, %75 : vector<16x8xf32>
    %78 = arith.addf %73, %77 : vector<16x8xf32>
    %79 = vector.shape_cast %78 : vector<16x8xf32> to vector<1x16x8xf32>
    %80 = vector.extract_strided_slice %69 {offsets = [0, 0, 0], sizes = [1, 16, 8], strides = [1, 1, 1]} : vector<16x16x8xf32> to vector<1x16x8xf32>
    %81 = vector.shape_cast %80 : vector<1x16x8xf32> to vector<16x8xf32>
    %cst_68 = arith.constant 7.500000e-01 : f32
    %82 = vector.broadcast %cst_68 : f32 to vector<16x8xf32>
    %83 = arith.mulf %82, %81 : vector<16x8xf32>
    %84 = vector.extract_strided_slice %69 {offsets = [1, 0, 0], sizes = [1, 16, 8], strides = [1, 1, 1]} : vector<16x16x8xf32> to vector<1x16x8xf32>
    %85 = vector.shape_cast %84 : vector<1x16x8xf32> to vector<16x8xf32>
    %cst_69 = arith.constant 2.500000e-01 : f32
    %86 = vector.broadcast %cst_69 : f32 to vector<16x8xf32>
    %87 = arith.mulf %86, %85 : vector<16x8xf32>
    %88 = arith.addf %83, %87 : vector<16x8xf32>
    %89 = vector.shape_cast %88 : vector<16x8xf32> to vector<1x16x8xf32>
    %90 = vector.extract_strided_slice %69 {offsets = [0, 0, 0], sizes = [1, 16, 8], strides = [1, 1, 1]} : vector<16x16x8xf32> to vector<1x16x8xf32>
    %91 = vector.shape_cast %90 : vector<1x16x8xf32> to vector<16x8xf32>
    %cst_70 = arith.constant 2.500000e-01 : f32
    %92 = vector.broadcast %cst_70 : f32 to vector<16x8xf32>
    %93 = arith.mulf %92, %91 : vector<16x8xf32>
    %94 = vector.extract_strided_slice %69 {offsets = [1, 0, 0], sizes = [1, 16, 8], strides = [1, 1, 1]} : vector<16x16x8xf32> to vector<1x16x8xf32>
    %95 = vector.shape_cast %94 : vector<1x16x8xf32> to vector<16x8xf32>
    %cst_71 = arith.constant 7.500000e-01 : f32
    %96 = vector.broadcast %cst_71 : f32 to vector<16x8xf32>
    %97 = arith.mulf %96, %95 : vector<16x8xf32>
    %98 = arith.addf %93, %97 : vector<16x8xf32>
    %99 = vector.shape_cast %98 : vector<16x8xf32> to vector<1x16x8xf32>
    %100 = vector.extract_strided_slice %69 {offsets = [1, 0, 0], sizes = [1, 16, 8], strides = [1, 1, 1]} : vector<16x16x8xf32> to vector<1x16x8xf32>
    %101 = vector.shape_cast %100 : vector<1x16x8xf32> to vector<16x8xf32>
    %cst_72 = arith.constant 7.500000e-01 : f32
    %102 = vector.broadcast %cst_72 : f32 to vector<16x8xf32>
    %103 = arith.mulf %102, %101 : vector<16x8xf32>
    %104 = vector.extract_strided_slice %69 {offsets = [2, 0, 0], sizes = [1, 16, 8], strides = [1, 1, 1]} : vector<16x16x8xf32> to vector<1x16x8xf32>
    %105 = vector.shape_cast %104 : vector<1x16x8xf32> to vector<16x8xf32>
    %cst_73 = arith.constant 2.500000e-01 : f32
    %106 = vector.broadcast %cst_73 : f32 to vector<16x8xf32>
    %107 = arith.mulf %106, %105 : vector<16x8xf32>
    %108 = arith.addf %103, %107 : vector<16x8xf32>
    %109 = vector.shape_cast %108 : vector<16x8xf32> to vector<1x16x8xf32>
    %110 = vector.extract_strided_slice %69 {offsets = [1, 0, 0], sizes = [1, 16, 8], strides = [1, 1, 1]} : vector<16x16x8xf32> to vector<1x16x8xf32>
    %111 = vector.shape_cast %110 : vector<1x16x8xf32> to vector<16x8xf32>
    %cst_74 = arith.constant 2.500000e-01 : f32
    %112 = vector.broadcast %cst_74 : f32 to vector<16x8xf32>
    %113 = arith.mulf %112, %111 : vector<16x8xf32>
    %114 = vector.extract_strided_slice %69 {offsets = [2, 0, 0], sizes = [1, 16, 8], strides = [1, 1, 1]} : vector<16x16x8xf32> to vector<1x16x8xf32>
    %115 = vector.shape_cast %114 : vector<1x16x8xf32> to vector<16x8xf32>
    %cst_75 = arith.constant 7.500000e-01 : f32
    %116 = vector.broadcast %cst_75 : f32 to vector<16x8xf32>
    %117 = arith.mulf %116, %115 : vector<16x8xf32>
    %118 = arith.addf %113, %117 : vector<16x8xf32>
    %119 = vector.shape_cast %118 : vector<16x8xf32> to vector<1x16x8xf32>
    %120 = vector.extract_strided_slice %69 {offsets = [2, 0, 0], sizes = [1, 16, 8], strides = [1, 1, 1]} : vector<16x16x8xf32> to vector<1x16x8xf32>
    %121 = vector.shape_cast %120 : vector<1x16x8xf32> to vector<16x8xf32>
    %cst_76 = arith.constant 7.500000e-01 : f32
    %122 = vector.broadcast %cst_76 : f32 to vector<16x8xf32>
    %123 = arith.mulf %122, %121 : vector<16x8xf32>
    %124 = vector.extract_strided_slice %69 {offsets = [3, 0, 0], sizes = [1, 16, 8], strides = [1, 1, 1]} : vector<16x16x8xf32> to vector<1x16x8xf32>
    %125 = vector.shape_cast %124 : vector<1x16x8xf32> to vector<16x8xf32>
    %cst_77 = arith.constant 2.500000e-01 : f32
    %126 = vector.broadcast %cst_77 : f32 to vector<16x8xf32>
    %127 = arith.mulf %126, %125 : vector<16x8xf32>
    %128 = arith.addf %123, %127 : vector<16x8xf32>
    %129 = vector.shape_cast %128 : vector<16x8xf32> to vector<1x16x8xf32>
    %130 = vector.extract_strided_slice %69 {offsets = [2, 0, 0], sizes = [1, 16, 8], strides = [1, 1, 1]} : vector<16x16x8xf32> to vector<1x16x8xf32>
    %131 = vector.shape_cast %130 : vector<1x16x8xf32> to vector<16x8xf32>
    %cst_78 = arith.constant 2.500000e-01 : f32
    %132 = vector.broadcast %cst_78 : f32 to vector<16x8xf32>
    %133 = arith.mulf %132, %131 : vector<16x8xf32>
    %134 = vector.extract_strided_slice %69 {offsets = [3, 0, 0], sizes = [1, 16, 8], strides = [1, 1, 1]} : vector<16x16x8xf32> to vector<1x16x8xf32>
    %135 = vector.shape_cast %134 : vector<1x16x8xf32> to vector<16x8xf32>
    %cst_79 = arith.constant 7.500000e-01 : f32
    %136 = vector.broadcast %cst_79 : f32 to vector<16x8xf32>
    %137 = arith.mulf %136, %135 : vector<16x8xf32>
    %138 = arith.addf %133, %137 : vector<16x8xf32>
    %139 = vector.shape_cast %138 : vector<16x8xf32> to vector<1x16x8xf32>
    %140 = vector.extract_strided_slice %69 {offsets = [3, 0, 0], sizes = [1, 16, 8], strides = [1, 1, 1]} : vector<16x16x8xf32> to vector<1x16x8xf32>
    %141 = vector.shape_cast %140 : vector<1x16x8xf32> to vector<16x8xf32>
    %cst_80 = arith.constant 7.500000e-01 : f32
    %142 = vector.broadcast %cst_80 : f32 to vector<16x8xf32>
    %143 = arith.mulf %142, %141 : vector<16x8xf32>
    %144 = vector.extract_strided_slice %69 {offsets = [4, 0, 0], sizes = [1, 16, 8], strides = [1, 1, 1]} : vector<16x16x8xf32> to vector<1x16x8xf32>
    %145 = vector.shape_cast %144 : vector<1x16x8xf32> to vector<16x8xf32>
    %cst_81 = arith.constant 2.500000e-01 : f32
    %146 = vector.broadcast %cst_81 : f32 to vector<16x8xf32>
    %147 = arith.mulf %146, %145 : vector<16x8xf32>
    %148 = arith.addf %143, %147 : vector<16x8xf32>
    %149 = vector.shape_cast %148 : vector<16x8xf32> to vector<1x16x8xf32>
    %150 = vector.extract_strided_slice %69 {offsets = [3, 0, 0], sizes = [1, 16, 8], strides = [1, 1, 1]} : vector<16x16x8xf32> to vector<1x16x8xf32>
    %151 = vector.shape_cast %150 : vector<1x16x8xf32> to vector<16x8xf32>
    %cst_82 = arith.constant 2.500000e-01 : f32
    %152 = vector.broadcast %cst_82 : f32 to vector<16x8xf32>
    %153 = arith.mulf %152, %151 : vector<16x8xf32>
    %154 = vector.extract_strided_slice %69 {offsets = [4, 0, 0], sizes = [1, 16, 8], strides = [1, 1, 1]} : vector<16x16x8xf32> to vector<1x16x8xf32>
    %155 = vector.shape_cast %154 : vector<1x16x8xf32> to vector<16x8xf32>
    %cst_83 = arith.constant 7.500000e-01 : f32
    %156 = vector.broadcast %cst_83 : f32 to vector<16x8xf32>
    %157 = arith.mulf %156, %155 : vector<16x8xf32>
    %158 = arith.addf %153, %157 : vector<16x8xf32>
    %159 = vector.shape_cast %158 : vector<16x8xf32> to vector<1x16x8xf32>
    %160 = vector.extract_strided_slice %69 {offsets = [4, 0, 0], sizes = [1, 16, 8], strides = [1, 1, 1]} : vector<16x16x8xf32> to vector<1x16x8xf32>
    %161 = vector.shape_cast %160 : vector<1x16x8xf32> to vector<16x8xf32>
    %cst_84 = arith.constant 7.500000e-01 : f32
    %162 = vector.broadcast %cst_84 : f32 to vector<16x8xf32>
    %163 = arith.mulf %162, %161 : vector<16x8xf32>
    %164 = vector.extract_strided_slice %69 {offsets = [5, 0, 0], sizes = [1, 16, 8], strides = [1, 1, 1]} : vector<16x16x8xf32> to vector<1x16x8xf32>
    %165 = vector.shape_cast %164 : vector<1x16x8xf32> to vector<16x8xf32>
    %cst_85 = arith.constant 2.500000e-01 : f32
    %166 = vector.broadcast %cst_85 : f32 to vector<16x8xf32>
    %167 = arith.mulf %166, %165 : vector<16x8xf32>
    %168 = arith.addf %163, %167 : vector<16x8xf32>
    %169 = vector.shape_cast %168 : vector<16x8xf32> to vector<1x16x8xf32>
    %170 = vector.extract_strided_slice %69 {offsets = [4, 0, 0], sizes = [1, 16, 8], strides = [1, 1, 1]} : vector<16x16x8xf32> to vector<1x16x8xf32>
    %171 = vector.shape_cast %170 : vector<1x16x8xf32> to vector<16x8xf32>
    %cst_86 = arith.constant 2.500000e-01 : f32
    %172 = vector.broadcast %cst_86 : f32 to vector<16x8xf32>
    %173 = arith.mulf %172, %171 : vector<16x8xf32>
    %174 = vector.extract_strided_slice %69 {offsets = [5, 0, 0], sizes = [1, 16, 8], strides = [1, 1, 1]} : vector<16x16x8xf32> to vector<1x16x8xf32>
    %175 = vector.shape_cast %174 : vector<1x16x8xf32> to vector<16x8xf32>
    %cst_87 = arith.constant 7.500000e-01 : f32
    %176 = vector.broadcast %cst_87 : f32 to vector<16x8xf32>
    %177 = arith.mulf %176, %175 : vector<16x8xf32>
    %178 = arith.addf %173, %177 : vector<16x8xf32>
    %179 = vector.shape_cast %178 : vector<16x8xf32> to vector<1x16x8xf32>
    %180 = vector.extract_strided_slice %69 {offsets = [5, 0, 0], sizes = [1, 16, 8], strides = [1, 1, 1]} : vector<16x16x8xf32> to vector<1x16x8xf32>
    %181 = vector.shape_cast %180 : vector<1x16x8xf32> to vector<16x8xf32>
    %cst_88 = arith.constant 7.500000e-01 : f32
    %182 = vector.broadcast %cst_88 : f32 to vector<16x8xf32>
    %183 = arith.mulf %182, %181 : vector<16x8xf32>
    %184 = vector.extract_strided_slice %69 {offsets = [6, 0, 0], sizes = [1, 16, 8], strides = [1, 1, 1]} : vector<16x16x8xf32> to vector<1x16x8xf32>
    %185 = vector.shape_cast %184 : vector<1x16x8xf32> to vector<16x8xf32>
    %cst_89 = arith.constant 2.500000e-01 : f32
    %186 = vector.broadcast %cst_89 : f32 to vector<16x8xf32>
    %187 = arith.mulf %186, %185 : vector<16x8xf32>
    %188 = arith.addf %183, %187 : vector<16x8xf32>
    %189 = vector.shape_cast %188 : vector<16x8xf32> to vector<1x16x8xf32>
    %190 = vector.extract_strided_slice %69 {offsets = [5, 0, 0], sizes = [1, 16, 8], strides = [1, 1, 1]} : vector<16x16x8xf32> to vector<1x16x8xf32>
    %191 = vector.shape_cast %190 : vector<1x16x8xf32> to vector<16x8xf32>
    %cst_90 = arith.constant 2.500000e-01 : f32
    %192 = vector.broadcast %cst_90 : f32 to vector<16x8xf32>
    %193 = arith.mulf %192, %191 : vector<16x8xf32>
    %194 = vector.extract_strided_slice %69 {offsets = [6, 0, 0], sizes = [1, 16, 8], strides = [1, 1, 1]} : vector<16x16x8xf32> to vector<1x16x8xf32>
    %195 = vector.shape_cast %194 : vector<1x16x8xf32> to vector<16x8xf32>
    %cst_91 = arith.constant 7.500000e-01 : f32
    %196 = vector.broadcast %cst_91 : f32 to vector<16x8xf32>
    %197 = arith.mulf %196, %195 : vector<16x8xf32>
    %198 = arith.addf %193, %197 : vector<16x8xf32>
    %199 = vector.shape_cast %198 : vector<16x8xf32> to vector<1x16x8xf32>
    %200 = vector.extract_strided_slice %69 {offsets = [6, 0, 0], sizes = [1, 16, 8], strides = [1, 1, 1]} : vector<16x16x8xf32> to vector<1x16x8xf32>
    %201 = vector.shape_cast %200 : vector<1x16x8xf32> to vector<16x8xf32>
    %cst_92 = arith.constant 7.500000e-01 : f32
    %202 = vector.broadcast %cst_92 : f32 to vector<16x8xf32>
    %203 = arith.mulf %202, %201 : vector<16x8xf32>
    %204 = vector.extract_strided_slice %69 {offsets = [7, 0, 0], sizes = [1, 16, 8], strides = [1, 1, 1]} : vector<16x16x8xf32> to vector<1x16x8xf32>
    %205 = vector.shape_cast %204 : vector<1x16x8xf32> to vector<16x8xf32>
    %cst_93 = arith.constant 2.500000e-01 : f32
    %206 = vector.broadcast %cst_93 : f32 to vector<16x8xf32>
    %207 = arith.mulf %206, %205 : vector<16x8xf32>
    %208 = arith.addf %203, %207 : vector<16x8xf32>
    %209 = vector.shape_cast %208 : vector<16x8xf32> to vector<1x16x8xf32>
    %210 = vector.extract_strided_slice %69 {offsets = [6, 0, 0], sizes = [1, 16, 8], strides = [1, 1, 1]} : vector<16x16x8xf32> to vector<1x16x8xf32>
    %211 = vector.shape_cast %210 : vector<1x16x8xf32> to vector<16x8xf32>
    %cst_94 = arith.constant 2.500000e-01 : f32
    %212 = vector.broadcast %cst_94 : f32 to vector<16x8xf32>
    %213 = arith.mulf %212, %211 : vector<16x8xf32>
    %214 = vector.extract_strided_slice %69 {offsets = [7, 0, 0], sizes = [1, 16, 8], strides = [1, 1, 1]} : vector<16x16x8xf32> to vector<1x16x8xf32>
    %215 = vector.shape_cast %214 : vector<1x16x8xf32> to vector<16x8xf32>
    %cst_95 = arith.constant 7.500000e-01 : f32
    %216 = vector.broadcast %cst_95 : f32 to vector<16x8xf32>
    %217 = arith.mulf %216, %215 : vector<16x8xf32>
    %218 = arith.addf %213, %217 : vector<16x8xf32>
    %219 = vector.shape_cast %218 : vector<16x8xf32> to vector<1x16x8xf32>
    %220 = vector.extract_strided_slice %69 {offsets = [7, 0, 0], sizes = [1, 16, 8], strides = [1, 1, 1]} : vector<16x16x8xf32> to vector<1x16x8xf32>
    %221 = vector.shape_cast %220 : vector<1x16x8xf32> to vector<16x8xf32>
    %cst_96 = arith.constant 7.500000e-01 : f32
    %222 = vector.broadcast %cst_96 : f32 to vector<16x8xf32>
    %223 = arith.mulf %222, %221 : vector<16x8xf32>
    %224 = vector.extract_strided_slice %69 {offsets = [8, 0, 0], sizes = [1, 16, 8], strides = [1, 1, 1]} : vector<16x16x8xf32> to vector<1x16x8xf32>
    %225 = vector.shape_cast %224 : vector<1x16x8xf32> to vector<16x8xf32>
    %cst_97 = arith.constant 2.500000e-01 : f32
    %226 = vector.broadcast %cst_97 : f32 to vector<16x8xf32>
    %227 = arith.mulf %226, %225 : vector<16x8xf32>
    %228 = arith.addf %223, %227 : vector<16x8xf32>
    %229 = vector.shape_cast %228 : vector<16x8xf32> to vector<1x16x8xf32>
    %230 = vector.extract_strided_slice %69 {offsets = [7, 0, 0], sizes = [1, 16, 8], strides = [1, 1, 1]} : vector<16x16x8xf32> to vector<1x16x8xf32>
    %231 = vector.shape_cast %230 : vector<1x16x8xf32> to vector<16x8xf32>
    %cst_98 = arith.constant 2.500000e-01 : f32
    %232 = vector.broadcast %cst_98 : f32 to vector<16x8xf32>
    %233 = arith.mulf %232, %231 : vector<16x8xf32>
    %234 = vector.extract_strided_slice %69 {offsets = [8, 0, 0], sizes = [1, 16, 8], strides = [1, 1, 1]} : vector<16x16x8xf32> to vector<1x16x8xf32>
    %235 = vector.shape_cast %234 : vector<1x16x8xf32> to vector<16x8xf32>
    %cst_99 = arith.constant 7.500000e-01 : f32
    %236 = vector.broadcast %cst_99 : f32 to vector<16x8xf32>
    %237 = arith.mulf %236, %235 : vector<16x8xf32>
    %238 = arith.addf %233, %237 : vector<16x8xf32>
    %239 = vector.shape_cast %238 : vector<16x8xf32> to vector<1x16x8xf32>
    %240 = vector.extract_strided_slice %69 {offsets = [8, 0, 0], sizes = [1, 16, 8], strides = [1, 1, 1]} : vector<16x16x8xf32> to vector<1x16x8xf32>
    %241 = vector.shape_cast %240 : vector<1x16x8xf32> to vector<16x8xf32>
    %cst_100 = arith.constant 7.500000e-01 : f32
    %242 = vector.broadcast %cst_100 : f32 to vector<16x8xf32>
    %243 = arith.mulf %242, %241 : vector<16x8xf32>
    %244 = vector.extract_strided_slice %69 {offsets = [9, 0, 0], sizes = [1, 16, 8], strides = [1, 1, 1]} : vector<16x16x8xf32> to vector<1x16x8xf32>
    %245 = vector.shape_cast %244 : vector<1x16x8xf32> to vector<16x8xf32>
    %cst_101 = arith.constant 2.500000e-01 : f32
    %246 = vector.broadcast %cst_101 : f32 to vector<16x8xf32>
    %247 = arith.mulf %246, %245 : vector<16x8xf32>
    %248 = arith.addf %243, %247 : vector<16x8xf32>
    %249 = vector.shape_cast %248 : vector<16x8xf32> to vector<1x16x8xf32>
    %250 = vector.extract_strided_slice %69 {offsets = [8, 0, 0], sizes = [1, 16, 8], strides = [1, 1, 1]} : vector<16x16x8xf32> to vector<1x16x8xf32>
    %251 = vector.shape_cast %250 : vector<1x16x8xf32> to vector<16x8xf32>
    %cst_102 = arith.constant 2.500000e-01 : f32
    %252 = vector.broadcast %cst_102 : f32 to vector<16x8xf32>
    %253 = arith.mulf %252, %251 : vector<16x8xf32>
    %254 = vector.extract_strided_slice %69 {offsets = [9, 0, 0], sizes = [1, 16, 8], strides = [1, 1, 1]} : vector<16x16x8xf32> to vector<1x16x8xf32>
    %255 = vector.shape_cast %254 : vector<1x16x8xf32> to vector<16x8xf32>
    %cst_103 = arith.constant 7.500000e-01 : f32
    %256 = vector.broadcast %cst_103 : f32 to vector<16x8xf32>
    %257 = arith.mulf %256, %255 : vector<16x8xf32>
    %258 = arith.addf %253, %257 : vector<16x8xf32>
    %259 = vector.shape_cast %258 : vector<16x8xf32> to vector<1x16x8xf32>
    %260 = vector.extract_strided_slice %69 {offsets = [9, 0, 0], sizes = [1, 16, 8], strides = [1, 1, 1]} : vector<16x16x8xf32> to vector<1x16x8xf32>
    %261 = vector.shape_cast %260 : vector<1x16x8xf32> to vector<16x8xf32>
    %cst_104 = arith.constant 7.500000e-01 : f32
    %262 = vector.broadcast %cst_104 : f32 to vector<16x8xf32>
    %263 = arith.mulf %262, %261 : vector<16x8xf32>
    %264 = vector.extract_strided_slice %69 {offsets = [10, 0, 0], sizes = [1, 16, 8], strides = [1, 1, 1]} : vector<16x16x8xf32> to vector<1x16x8xf32>
    %265 = vector.shape_cast %264 : vector<1x16x8xf32> to vector<16x8xf32>
    %cst_105 = arith.constant 2.500000e-01 : f32
    %266 = vector.broadcast %cst_105 : f32 to vector<16x8xf32>
    %267 = arith.mulf %266, %265 : vector<16x8xf32>
    %268 = arith.addf %263, %267 : vector<16x8xf32>
    %269 = vector.shape_cast %268 : vector<16x8xf32> to vector<1x16x8xf32>
    %270 = vector.extract_strided_slice %69 {offsets = [9, 0, 0], sizes = [1, 16, 8], strides = [1, 1, 1]} : vector<16x16x8xf32> to vector<1x16x8xf32>
    %271 = vector.shape_cast %270 : vector<1x16x8xf32> to vector<16x8xf32>
    %cst_106 = arith.constant 2.500000e-01 : f32
    %272 = vector.broadcast %cst_106 : f32 to vector<16x8xf32>
    %273 = arith.mulf %272, %271 : vector<16x8xf32>
    %274 = vector.extract_strided_slice %69 {offsets = [10, 0, 0], sizes = [1, 16, 8], strides = [1, 1, 1]} : vector<16x16x8xf32> to vector<1x16x8xf32>
    %275 = vector.shape_cast %274 : vector<1x16x8xf32> to vector<16x8xf32>
    %cst_107 = arith.constant 7.500000e-01 : f32
    %276 = vector.broadcast %cst_107 : f32 to vector<16x8xf32>
    %277 = arith.mulf %276, %275 : vector<16x8xf32>
    %278 = arith.addf %273, %277 : vector<16x8xf32>
    %279 = vector.shape_cast %278 : vector<16x8xf32> to vector<1x16x8xf32>
    %280 = vector.extract_strided_slice %69 {offsets = [10, 0, 0], sizes = [1, 16, 8], strides = [1, 1, 1]} : vector<16x16x8xf32> to vector<1x16x8xf32>
    %281 = vector.shape_cast %280 : vector<1x16x8xf32> to vector<16x8xf32>
    %cst_108 = arith.constant 7.500000e-01 : f32
    %282 = vector.broadcast %cst_108 : f32 to vector<16x8xf32>
    %283 = arith.mulf %282, %281 : vector<16x8xf32>
    %284 = vector.extract_strided_slice %69 {offsets = [11, 0, 0], sizes = [1, 16, 8], strides = [1, 1, 1]} : vector<16x16x8xf32> to vector<1x16x8xf32>
    %285 = vector.shape_cast %284 : vector<1x16x8xf32> to vector<16x8xf32>
    %cst_109 = arith.constant 2.500000e-01 : f32
    %286 = vector.broadcast %cst_109 : f32 to vector<16x8xf32>
    %287 = arith.mulf %286, %285 : vector<16x8xf32>
    %288 = arith.addf %283, %287 : vector<16x8xf32>
    %289 = vector.shape_cast %288 : vector<16x8xf32> to vector<1x16x8xf32>
    %290 = vector.extract_strided_slice %69 {offsets = [10, 0, 0], sizes = [1, 16, 8], strides = [1, 1, 1]} : vector<16x16x8xf32> to vector<1x16x8xf32>
    %291 = vector.shape_cast %290 : vector<1x16x8xf32> to vector<16x8xf32>
    %cst_110 = arith.constant 2.500000e-01 : f32
    %292 = vector.broadcast %cst_110 : f32 to vector<16x8xf32>
    %293 = arith.mulf %292, %291 : vector<16x8xf32>
    %294 = vector.extract_strided_slice %69 {offsets = [11, 0, 0], sizes = [1, 16, 8], strides = [1, 1, 1]} : vector<16x16x8xf32> to vector<1x16x8xf32>
    %295 = vector.shape_cast %294 : vector<1x16x8xf32> to vector<16x8xf32>
    %cst_111 = arith.constant 7.500000e-01 : f32
    %296 = vector.broadcast %cst_111 : f32 to vector<16x8xf32>
    %297 = arith.mulf %296, %295 : vector<16x8xf32>
    %298 = arith.addf %293, %297 : vector<16x8xf32>
    %299 = vector.shape_cast %298 : vector<16x8xf32> to vector<1x16x8xf32>
    %300 = vector.extract_strided_slice %69 {offsets = [11, 0, 0], sizes = [1, 16, 8], strides = [1, 1, 1]} : vector<16x16x8xf32> to vector<1x16x8xf32>
    %301 = vector.shape_cast %300 : vector<1x16x8xf32> to vector<16x8xf32>
    %cst_112 = arith.constant 7.500000e-01 : f32
    %302 = vector.broadcast %cst_112 : f32 to vector<16x8xf32>
    %303 = arith.mulf %302, %301 : vector<16x8xf32>
    %304 = vector.extract_strided_slice %69 {offsets = [12, 0, 0], sizes = [1, 16, 8], strides = [1, 1, 1]} : vector<16x16x8xf32> to vector<1x16x8xf32>
    %305 = vector.shape_cast %304 : vector<1x16x8xf32> to vector<16x8xf32>
    %cst_113 = arith.constant 2.500000e-01 : f32
    %306 = vector.broadcast %cst_113 : f32 to vector<16x8xf32>
    %307 = arith.mulf %306, %305 : vector<16x8xf32>
    %308 = arith.addf %303, %307 : vector<16x8xf32>
    %309 = vector.shape_cast %308 : vector<16x8xf32> to vector<1x16x8xf32>
    %310 = vector.extract_strided_slice %69 {offsets = [11, 0, 0], sizes = [1, 16, 8], strides = [1, 1, 1]} : vector<16x16x8xf32> to vector<1x16x8xf32>
    %311 = vector.shape_cast %310 : vector<1x16x8xf32> to vector<16x8xf32>
    %cst_114 = arith.constant 2.500000e-01 : f32
    %312 = vector.broadcast %cst_114 : f32 to vector<16x8xf32>
    %313 = arith.mulf %312, %311 : vector<16x8xf32>
    %314 = vector.extract_strided_slice %69 {offsets = [12, 0, 0], sizes = [1, 16, 8], strides = [1, 1, 1]} : vector<16x16x8xf32> to vector<1x16x8xf32>
    %315 = vector.shape_cast %314 : vector<1x16x8xf32> to vector<16x8xf32>
    %cst_115 = arith.constant 7.500000e-01 : f32
    %316 = vector.broadcast %cst_115 : f32 to vector<16x8xf32>
    %317 = arith.mulf %316, %315 : vector<16x8xf32>
    %318 = arith.addf %313, %317 : vector<16x8xf32>
    %319 = vector.shape_cast %318 : vector<16x8xf32> to vector<1x16x8xf32>
    %320 = vector.extract_strided_slice %69 {offsets = [12, 0, 0], sizes = [1, 16, 8], strides = [1, 1, 1]} : vector<16x16x8xf32> to vector<1x16x8xf32>
    %321 = vector.shape_cast %320 : vector<1x16x8xf32> to vector<16x8xf32>
    %cst_116 = arith.constant 7.500000e-01 : f32
    %322 = vector.broadcast %cst_116 : f32 to vector<16x8xf32>
    %323 = arith.mulf %322, %321 : vector<16x8xf32>
    %324 = vector.extract_strided_slice %69 {offsets = [13, 0, 0], sizes = [1, 16, 8], strides = [1, 1, 1]} : vector<16x16x8xf32> to vector<1x16x8xf32>
    %325 = vector.shape_cast %324 : vector<1x16x8xf32> to vector<16x8xf32>
    %cst_117 = arith.constant 2.500000e-01 : f32
    %326 = vector.broadcast %cst_117 : f32 to vector<16x8xf32>
    %327 = arith.mulf %326, %325 : vector<16x8xf32>
    %328 = arith.addf %323, %327 : vector<16x8xf32>
    %329 = vector.shape_cast %328 : vector<16x8xf32> to vector<1x16x8xf32>
    %330 = vector.extract_strided_slice %69 {offsets = [12, 0, 0], sizes = [1, 16, 8], strides = [1, 1, 1]} : vector<16x16x8xf32> to vector<1x16x8xf32>
    %331 = vector.shape_cast %330 : vector<1x16x8xf32> to vector<16x8xf32>
    %cst_118 = arith.constant 2.500000e-01 : f32
    %332 = vector.broadcast %cst_118 : f32 to vector<16x8xf32>
    %333 = arith.mulf %332, %331 : vector<16x8xf32>
    %334 = vector.extract_strided_slice %69 {offsets = [13, 0, 0], sizes = [1, 16, 8], strides = [1, 1, 1]} : vector<16x16x8xf32> to vector<1x16x8xf32>
    %335 = vector.shape_cast %334 : vector<1x16x8xf32> to vector<16x8xf32>
    %cst_119 = arith.constant 7.500000e-01 : f32
    %336 = vector.broadcast %cst_119 : f32 to vector<16x8xf32>
    %337 = arith.mulf %336, %335 : vector<16x8xf32>
    %338 = arith.addf %333, %337 : vector<16x8xf32>
    %339 = vector.shape_cast %338 : vector<16x8xf32> to vector<1x16x8xf32>
    %340 = vector.extract_strided_slice %69 {offsets = [13, 0, 0], sizes = [1, 16, 8], strides = [1, 1, 1]} : vector<16x16x8xf32> to vector<1x16x8xf32>
    %341 = vector.shape_cast %340 : vector<1x16x8xf32> to vector<16x8xf32>
    %cst_120 = arith.constant 7.500000e-01 : f32
    %342 = vector.broadcast %cst_120 : f32 to vector<16x8xf32>
    %343 = arith.mulf %342, %341 : vector<16x8xf32>
    %344 = vector.extract_strided_slice %69 {offsets = [14, 0, 0], sizes = [1, 16, 8], strides = [1, 1, 1]} : vector<16x16x8xf32> to vector<1x16x8xf32>
    %345 = vector.shape_cast %344 : vector<1x16x8xf32> to vector<16x8xf32>
    %cst_121 = arith.constant 2.500000e-01 : f32
    %346 = vector.broadcast %cst_121 : f32 to vector<16x8xf32>
    %347 = arith.mulf %346, %345 : vector<16x8xf32>
    %348 = arith.addf %343, %347 : vector<16x8xf32>
    %349 = vector.shape_cast %348 : vector<16x8xf32> to vector<1x16x8xf32>
    %350 = vector.extract_strided_slice %69 {offsets = [13, 0, 0], sizes = [1, 16, 8], strides = [1, 1, 1]} : vector<16x16x8xf32> to vector<1x16x8xf32>
    %351 = vector.shape_cast %350 : vector<1x16x8xf32> to vector<16x8xf32>
    %cst_122 = arith.constant 2.500000e-01 : f32
    %352 = vector.broadcast %cst_122 : f32 to vector<16x8xf32>
    %353 = arith.mulf %352, %351 : vector<16x8xf32>
    %354 = vector.extract_strided_slice %69 {offsets = [14, 0, 0], sizes = [1, 16, 8], strides = [1, 1, 1]} : vector<16x16x8xf32> to vector<1x16x8xf32>
    %355 = vector.shape_cast %354 : vector<1x16x8xf32> to vector<16x8xf32>
    %cst_123 = arith.constant 7.500000e-01 : f32
    %356 = vector.broadcast %cst_123 : f32 to vector<16x8xf32>
    %357 = arith.mulf %356, %355 : vector<16x8xf32>
    %358 = arith.addf %353, %357 : vector<16x8xf32>
    %359 = vector.shape_cast %358 : vector<16x8xf32> to vector<1x16x8xf32>
    %360 = vector.extract_strided_slice %69 {offsets = [14, 0, 0], sizes = [1, 16, 8], strides = [1, 1, 1]} : vector<16x16x8xf32> to vector<1x16x8xf32>
    %361 = vector.shape_cast %360 : vector<1x16x8xf32> to vector<16x8xf32>
    %cst_124 = arith.constant 7.500000e-01 : f32
    %362 = vector.broadcast %cst_124 : f32 to vector<16x8xf32>
    %363 = arith.mulf %362, %361 : vector<16x8xf32>
    %364 = vector.extract_strided_slice %69 {offsets = [15, 0, 0], sizes = [1, 16, 8], strides = [1, 1, 1]} : vector<16x16x8xf32> to vector<1x16x8xf32>
    %365 = vector.shape_cast %364 : vector<1x16x8xf32> to vector<16x8xf32>
    %cst_125 = arith.constant 2.500000e-01 : f32
    %366 = vector.broadcast %cst_125 : f32 to vector<16x8xf32>
    %367 = arith.mulf %366, %365 : vector<16x8xf32>
    %368 = arith.addf %363, %367 : vector<16x8xf32>
    %369 = vector.shape_cast %368 : vector<16x8xf32> to vector<1x16x8xf32>
    %370 = vector.extract_strided_slice %69 {offsets = [14, 0, 0], sizes = [1, 16, 8], strides = [1, 1, 1]} : vector<16x16x8xf32> to vector<1x16x8xf32>
    %371 = vector.shape_cast %370 : vector<1x16x8xf32> to vector<16x8xf32>
    %cst_126 = arith.constant 2.500000e-01 : f32
    %372 = vector.broadcast %cst_126 : f32 to vector<16x8xf32>
    %373 = arith.mulf %372, %371 : vector<16x8xf32>
    %374 = vector.extract_strided_slice %69 {offsets = [15, 0, 0], sizes = [1, 16, 8], strides = [1, 1, 1]} : vector<16x16x8xf32> to vector<1x16x8xf32>
    %375 = vector.shape_cast %374 : vector<1x16x8xf32> to vector<16x8xf32>
    %cst_127 = arith.constant 7.500000e-01 : f32
    %376 = vector.broadcast %cst_127 : f32 to vector<16x8xf32>
    %377 = arith.mulf %376, %375 : vector<16x8xf32>
    %378 = arith.addf %373, %377 : vector<16x8xf32>
    %379 = vector.shape_cast %378 : vector<16x8xf32> to vector<1x16x8xf32>
    %380 = vector.extract_strided_slice %69 {offsets = [15, 0, 0], sizes = [1, 16, 8], strides = [1, 1, 1]} : vector<16x16x8xf32> to vector<1x16x8xf32>
    %381 = vector.shape_cast %380 : vector<1x16x8xf32> to vector<16x8xf32>
    %cst_128 = arith.constant 7.500000e-01 : f32
    %382 = vector.broadcast %cst_128 : f32 to vector<16x8xf32>
    %383 = arith.mulf %382, %381 : vector<16x8xf32>
    %384 = vector.extract_strided_slice %69 {offsets = [15, 0, 0], sizes = [1, 16, 8], strides = [1, 1, 1]} : vector<16x16x8xf32> to vector<1x16x8xf32>
    %385 = vector.shape_cast %384 : vector<1x16x8xf32> to vector<16x8xf32>
    %cst_129 = arith.constant 2.500000e-01 : f32
    %386 = vector.broadcast %cst_129 : f32 to vector<16x8xf32>
    %387 = arith.mulf %386, %385 : vector<16x8xf32>
    %388 = arith.addf %383, %387 : vector<16x8xf32>
    %389 = vector.shape_cast %388 : vector<16x8xf32> to vector<1x16x8xf32>
    %390 = tpu.concatenate %79, %89, %99, %109, %119, %129, %139, %149, %159, %169, %179, %189, %199, %209, %219, %229 in 0 : vector<1x16x8xf32>, vector<1x16x8xf32>, vector<1x16x8xf32>, vector<1x16x8xf32>, vector<1x16x8xf32>, vector<1x16x8xf32>, vector<1x16x8xf32>, vector<1x16x8xf32>, vector<1x16x8xf32>, vector<1x16x8xf32>, vector<1x16x8xf32>, vector<1x16x8xf32>, vector<1x16x8xf32>, vector<1x16x8xf32>, vector<1x16x8xf32>, vector<1x16x8xf32> -> vector<16x16x8xf32>
    %391 = tpu.concatenate %239, %249, %259, %269, %279, %289, %299, %309, %319, %329, %339, %349, %359, %369, %379, %389 in 0 : vector<1x16x8xf32>, vector<1x16x8xf32>, vector<1x16x8xf32>, vector<1x16x8xf32>, vector<1x16x8xf32>, vector<1x16x8xf32>, vector<1x16x8xf32>, vector<1x16x8xf32>, vector<1x16x8xf32>, vector<1x16x8xf32>, vector<1x16x8xf32>, vector<1x16x8xf32>, vector<1x16x8xf32>, vector<1x16x8xf32>, vector<1x16x8xf32>, vector<1x16x8xf32> -> vector<16x16x8xf32>
    %392 = tpu.concatenate %390, %391 in 0 : vector<16x16x8xf32>, vector<16x16x8xf32> -> vector<32x16x8xf32>
    %c0_130 = arith.constant 0 : index
    %c0_131 = arith.constant 0 : index
    %393 = vector.load %arg5[%c0_130, %c0_131] : memref<32x16xf32, #tpu.memory_space<vmem>>, vector<32x16xf32>
    %394 = vector.shape_cast %393 : vector<32x16xf32> to vector<1x32x16xf32>
    %395 = vector.shape_cast %394 : vector<1x32x16xf32> to vector<1x32x16xf32>
    %396 = vector.broadcast %395 : vector<1x32x16xf32> to vector<32x32x16xf32>
    "tpu.trace_start"() <{level = 10 : i32, message = "uvw,uwc->uvc"}> : () -> ()
    %cst_132 = arith.constant dense<0.000000e+00> : vector<32x32x8xf32>
    %397 = tpu.matmul %396, %392, %cst_132 {dimension_numbers = #tpu.dot_dimension_numbers<[2], [1], [1], [2], [0, 0, 0, 1, 1, 2], [0], [0]>} : vector<32x32x16xf32>, vector<32x16x8xf32>, vector<32x32x8xf32> -> vector<32x32x8xf32>
    "tpu.trace_stop"() : () -> ()
    %c0_133 = arith.constant 0 : index
    %c0_134 = arith.constant 0 : index
    %c0_135 = arith.constant 0 : index
    %c0_136 = arith.constant 0 : index
    %398 = vector.load %arg6[%c0_133, %c0_134, %c0_135, %c0_136] : memref<1x32x32x8xf32, #tpu.memory_space<vmem>>, vector<1x32x32x8xf32>
    %399 = vector.shape_cast %398 : vector<1x32x32x8xf32> to vector<32x32x8xf32>
    %400 = vector.shape_cast %397 : vector<32x32x8xf32> to vector<1x32x32x8xf32>
    tpu.vector_store %arg6[%c0_133, %c0_134, %c0_135, %c0_136], %400 {strides = array<i32>} : memref<1x32x32x8xf32, #tpu.memory_space<vmem>>, vector<1x32x32x8xf32>,
    return
  }
  func.func @transform_0(%arg0: i32, %arg1: i32) -> (i32, i32, i32, i32) {
    %c0_i32 = arith.constant 0 : i32
    %c0_i32_0 = arith.constant 0 : i32
    %c0_i32_1 = arith.constant 0 : i32
    %c0_i32_2 = arith.constant 0 : i32
    return %arg0, %c0_i32, %c0_i32_0, %c0_i32_1 : i32, i32, i32, i32
  }
  func.func @transform_1(%arg0: i32, %arg1: i32) -> (i32, i32, i32) {
    %c0_i32 = arith.constant 0 : i32
    %c0_i32_0 = arith.constant 0 : i32
    %c0_i32_1 = arith.constant 0 : i32
    return %c0_i32, %c0_i32_0, %arg1 : i32, i32, i32
  }
  func.func @transform_2(%arg0: i32, %arg1: i32) -> (i32, i32) {
    %c0_i32 = arith.constant 0 : i32
    %c0_i32_0 = arith.constant 0 : i32
    return %c0_i32, %arg1 : i32, i32
  }
  func.func @transform_3(%arg0: i32, %arg1: i32) -> (i32, i32) {
    %c0_i32 = arith.constant 0 : i32
    %c0_i32_0 = arith.constant 0 : i32
    %c0_i32_1 = arith.constant 0 : i32
    return %c0_i32, %c0_i32_0 : i32, i32
  }
  func.func @transform_4(%arg0: i32, %arg1: i32) -> (i32, i32, i32, i32) {
    %c0_i32 = arith.constant 0 : i32
    %c0_i32_0 = arith.constant 0 : i32
    %c0_i32_1 = arith.constant 0 : i32
    return %arg0, %c0_i32, %c0_i32_0, %arg1 : i32, i32, i32, i32
  }
}

</mosaic_0001>

<bundles_post_ra>
// kernel: tpu_custom_call.1
= control target key start
LH: loop header
LB: loop body
LE: loop exit
PB: predicated region body
PF: predicated region fallthrough
CT: control target
= control target key end

     0   :  { %s8843_s15 = smov 0   ;;  %s8845_s16 = smov 0   ;;  %s11232_s0 = inlined_call_operand.vmem [shape: f32[2,18,18,4], index: 0, kind: input, shape index: {}]   ;;  %s11233_s1 = inlined_call_operand.vmem [shape: f32[9,4,8], index: 1, kind: input, shape index: {}]   ;;  %s11234_s2 = inlined_call_operand.vmem [shape: f32[1,8], index: 2, kind: input, shape index: {}]   ;;  %s11235_s3 = inlined_call_operand.vmem [shape: f32[32,16], index: 3, kind: input, shape index: {}]   ;;  %s11236_s4 = inlined_call_operand.vmem [shape: f32[2,32,32,8], index: 4, kind: output, shape index: {}]  }
   0x1   :  { %s8847_s17 = smov 0  }
   0x2 LB: > { %s26_s18 = sadd.s32 1, %s8812_s16  ;;  %p6876_p0 = scmp.ge.s32.totalorder %s8816_s17, 1  ;;  %s8816_s17 = sphi %s8847_s17, %s14_s17   ;;  %s8812_s16 = sphi %s8845_s16, %s11435_s16   ;;  %s8808_s15 = sphi %s8843_s15, %s11434_s15  }
   0x3   : > { %p28_p1 = scmp.ge.s32.totalorder %s26_s18, 2  ;;  %p193_p2 = scmp.lt.s32.totalorder %s8816_s17, 3 }
   0x5   : > { %s11437_s18 = smov (%p28_p1, %s26_s18), 0  ;;  %p194_p3 = pnand %p6876_p0, %p193_p2 }
   0x7   : > { %197 = sbr.rel (%p194_p3) target bundleno = 850 (0x352), region = 36 }
   0xc   : > { %v6880_v0 = vld [vmem:[%s11233_s1 + $0x4] sm:$0xf]  ;;  %vm413_vm0 = vcmask 1043456   ;;  %v281_v1 = vld [vmem:[%s11233_s1] sm:$0xf]  ;;  %p229_p4 = scmp.lt.s32.totalorder %s8808_s15, 1 }
   0xd   : > { %7998 = vmatprep.subr.msk.mxu0 %vm413_vm0, %v6880_v0  ;;  %8048 = vmatprep.subr.msk.mxu1 %vm413_vm0, %v281_v1  ;;  %v6947_v2 = vld [vmem:[%s11233_s1 + $0x8] sm:$0xf]  ;;  %v7013_v3 = vld [vmem:[%s11233_s1 + $0xc] sm:$0xf]  ;;  %vm316_vm1 = vcmask 31744   ;;  %vm3903_vm2 = vcmask 130048  }
   0xe   : > { %7999 = vmatpush3.msk.msra.mxu0 %vm413_vm0, %v6880_v0  ;;  %s11439_s15 = smov (!%p229_p4, %s8808_s15), 1  ;;  %8049 = vmatpush3.msk.msra.mxu1 %vm413_vm0, %v281_v1  ;;  %v8904_v10 = vld [vmem:[%s11233_s1 + $0x10] sm:$0xf]  ;;  %v9069_v43 = vld [vmem:[%s11233_s1 + $0x14] sm:$0xf]  ;;  %vm6636_vm3 = vcmask 64512  }
   0xf   : > { %8098 = vmatprep.subr.msk.mxu0 %vm413_vm0, %v6947_v2  ;;  %8148 = vmatprep.subr.msk.mxu1 %vm413_vm0, %v7013_v3  ;;  %s8768_s27 = smul.u32 432, %s11439_s15  ;;  %s7508_s5 = sshll.u32 %s11439_s15, 10 }
  0x10   : > { %s10965_s8 = scalar_lea.vmem %s11236_s4, %s7508_s5 }
  0x11   : > { %s8885_s30 = scalar_lea.vmem %s11232_s0, %s8768_s27 }
  0x12   : > { %v282_v4 = vld [vmem:[%s8885_s30 + $0x1] sm:$0xff]  ;;  %v283_v6 = vld [vmem:[%s8885_s30 + $0x9] sm:$0xff]  ;;  %v8894_v8 = vld [vmem:[%s8885_s30 + $0x19] sm:$0xff] }
  0x13   : > { %v249_v5 = vld [vmem:[%s8885_s30] sm:$0xff]  ;;  %8000 = vmatprep.mubr.msk.f32.mxu0 %vm316_vm1, %v282_v4  ;;  %v250_v7 = vld [vmem:[%s8885_s30 + $0x8] sm:$0xff]  ;;  %v8897_v9 = vld [vmem:[%s8885_s30 + $0x18] sm:$0xff] }
  0x14   : > { %8050 = vmatprep.mubr.msk.f32.mxu1 %vm316_vm1, %v249_v5  ;;  %8001 = vmatmul.mubr.msk.f32.vlgmr.msra.gmra.mxu0 %vm316_vm1, %v283_v6  ;;  %v8911_v11 = vld [vmem:[%s8885_s30 + $0x21] sm:$0xff]  ;;  %v8917_v13 = vld [vmem:[%s8885_s30 + $0x31] sm:$0xff]  ;;  %v8935_v15 = vld [vmem:[%s8885_s30 + $0x39] sm:$0xff] }
  0x15   : > { %8051 = vmatmul.mubr.msk.f32.vlgmr.msra.gmra.mxu1 %vm316_vm1, %v250_v7  ;;  %8003 = vmatprep.mubr.msk.f32.mxu0 %vm316_vm1, %v8894_v8  ;;  %v8914_v12 = vld [vmem:[%s8885_s30 + $0x20] sm:$0xff]  ;;  %v8920_v14 = vld [vmem:[%s8885_s30 + $0x30] sm:$0xff]  ;;  %v8938_v16 = vld [vmem:[%s8885_s30 + $0x38] sm:$0xff] }
  0x16   : > { %8053 = vmatprep.mubr.msk.f32.mxu1 %vm316_vm1, %v8897_v9  ;;  %11270 = vst [vmem:[#allocation2_spill] sm:$0xff] %v8920_v14  ;;  %8099 = vmatpush3.msk.msra.mxu0 %vm413_vm0, %v6947_v2  ;;  %11271 = vst [vmem:[#allocation3_spill] sm:$0xff] %v8938_v16  ;;  %v8941_v17 = vld [vmem:[%s8885_s30 + $0x49] sm:$0xff]  ;;  %v8955_v19 = vld [vmem:[%s8885_s30 + $0x51] sm:$0xff] }
  0x17   : > { %8149 = vmatpush3.msk.msra.mxu1 %vm413_vm0, %v7013_v3  ;;  %8198 = vmatprep.subr.msk.mxu0 %vm413_vm0, %v8904_v10  ;;  %v8944_v18 = vld [vmem:[%s8885_s30 + $0x48] sm:$0xff]  ;;  %v8958_v20 = vld [vmem:[%s8885_s30 + $0x50] sm:$0xff]  ;;  %v8964_v22 = vld [vmem:[%s8885_s30 + $0x60] sm:$0xff] }
  0x18   : > { %8004 = vmatmul.mubr.msk.f32.gmra.mxu0 %vm316_vm1, %v8911_v11  ;;  %11272 = vst [vmem:[#allocation4_spill] sm:$0xff] %v8944_v18  ;;  %11273 = vst [vmem:[#allocation5_spill] sm:$0xff] %v8958_v20  ;;  %v8961_v21 = vld [vmem:[%s8885_s30 + $0x61] sm:$0xff]  ;;  %v8975_v23 = vld [vmem:[%s8885_s30 + $0x69] sm:$0xff]  ;;  %8248 = vmatprep.subr.msk.mxu1 %vm413_vm0, %v9069_v43 }
  0x19   : > { %8054 = vmatmul.mubr.msk.f32.gmra.mxu1 %vm316_vm1, %v8914_v12  ;;  %8006 = vmatprep.mubr.msk.f32.mxu0 %vm316_vm1, %v8917_v13  ;;  %11274 = vst [vmem:[#allocation6_spill] sm:$0xff] %v8964_v22  ;;  %v8978_v24 = vld [vmem:[%s8885_s30 + $0x68] sm:$0xff]  ;;  %v8981_v25 = vld [vmem:[%s8885_s30 + $0x79] sm:$0xff]  ;;  %v9001_v29 = vld [vmem:[%s8885_s30 + $0x91] sm:$0xff] }
  0x1a   : > { %8056 = vmatprep.mubr.msk.f32.mxu1 %vm316_vm1, %v8920_v14  ;;  %11275 = vst [vmem:[#allocation7_spill] sm:$0xff] %v8978_v24  ;;  %v8984_v26 = vld [vmem:[%s8885_s30 + $0x78] sm:$0xff]  ;;  %v8995_v27 = vld [vmem:[%s8885_s30 + $0x81] sm:$0xff]  ;;  %v9004_v30 = vld [vmem:[%s8885_s30 + $0x90] sm:$0xff] }
  0x1b   : > { %11276 = vst [vmem:[#allocation8_spill] sm:$0xff] %v8984_v26  ;;  %v8998_v28 = vld [vmem:[%s8885_s30 + $0x80] sm:$0xff]  ;;  %11278 = vst [vmem:[#allocation10_spill] sm:$0xff] %v9004_v30  ;;  %v9018_v32 = vld [vmem:[%s8885_s30 + $0x98] sm:$0xff] }
  0x1c   : > { %8007 = vmatmul.mubr.msk.f32.gmra.mxu0 %vm316_vm1, %v8935_v15  ;;  %11277 = vst [vmem:[#allocation9_spill] sm:$0xff] %v8998_v28  ;;  %v9015_v31 = vld [vmem:[%s8885_s30 + $0x99] sm:$0xff]  ;;  %11279 = vst [vmem:[#allocation11_spill] sm:$0xff] %v9018_v32  ;;  %v9021_v33 = vld [vmem:[%s8885_s30 + $0xa9] sm:$0xff] }
  0x1d   : > { %8057 = vmatmul.mubr.msk.f32.gmra.mxu1 %vm316_vm1, %v8938_v16  ;;  %8009 = vmatprep.mubr.msk.f32.mxu0 %vm316_vm1, %v8941_v17  ;;  %v9024_v34 = vld [vmem:[%s8885_s30 + $0xa8] sm:$0xff]  ;;  %v9035_v35 = vld [vmem:[%s8885_s30 + $0xb1] sm:$0xff]  ;;  %v9044_v38 = vld [vmem:[%s8885_s30 + $0xc0] sm:$0xff] }
  0x1e   : > { %8059 = vmatprep.mubr.msk.f32.mxu1 %vm316_vm1, %v8944_v18  ;;  %11280 = vst [vmem:[#allocation12_spill] sm:$0xff] %v9024_v34  ;;  %v9038_v36 = vld [vmem:[%s8885_s30 + $0xb0] sm:$0xff]  ;;  %v9041_v37 = vld [vmem:[%s8885_s30 + $0xc1] sm:$0xff]  ;;  %11282 = vst [vmem:[#allocation14_spill] sm:$0xff] %v9044_v38 }
  0x1f   : > { %11281 = vst [vmem:[#allocation13_spill] sm:$0xff] %v9038_v36  ;;  %v9055_v39 = vld [vmem:[%s8885_s30 + $0xc9] sm:$0xff]  ;;  %v9061_v41 = vld [vmem:[%s8885_s30 + $0xd9] sm:$0xff]  ;;  %v9082_v44 = vld [vmem:[%s8885_s30 + $0xe1] sm:$0xff] }
  0x20   : > { %8010 = vmatmul.mubr.msk.f32.gmra.mxu0 %vm316_vm1, %v8955_v19  ;;  %v9058_v40 = vld [vmem:[%s8885_s30 + $0xc8] sm:$0xff]  ;;  %v9064_v42 = vld [vmem:[%s8885_s30 + $0xd8] sm:$0xff]  ;;  %v9085_v45 = vld [vmem:[%s8885_s30 + $0xe0] sm:$0xff] }
  0x21   : > { %8060 = vmatmul.mubr.msk.f32.gmra.mxu1 %vm316_vm1, %v8958_v20  ;;  %8012 = vmatprep.mubr.msk.f32.mxu0 %vm316_vm1, %v8961_v21  ;;  %11283 = vst [vmem:[#allocation15_spill] sm:$0xff] %v9058_v40  ;;  %11284 = vst [vmem:[#allocation16_spill] sm:$0xff] %v9064_v42  ;;  %v9088_v46 = vld [vmem:[%s8885_s30 + $0xf1] sm:$0xff]  ;;  %v9102_v48 = vld [vmem:[%s8885_s30 + $0xf9] sm:$0xff] }
  0x22   : > { %8062 = vmatprep.mubr.msk.f32.mxu1 %vm316_vm1, %v8964_v22  ;;  %11285 = vst [vmem:[#allocation17_spill] sm:$0xff] %v9085_v45  ;;  %v9091_v47 = vld [vmem:[%s8885_s30 + $0xf0] sm:$0xff]  ;;  %v9105_v49 = vld [vmem:[%s8885_s30 + $0xf8] sm:$0xff]  ;;  %v9111_v51 = vld [vmem:[%s8885_s30 + $0x108] sm:$0xff] }
  0x23   : > { %11286 = vst [vmem:[#allocation18_spill] sm:$0xff] %v9091_v47  ;;  %11287 = vst [vmem:[#allocation19_spill] sm:$0xff] %v9105_v49  ;;  %v9108_v50 = vld [vmem:[%s8885_s30 + $0x109] sm:$0xff]  ;;  %v9122_v52 = vld [vmem:[%s8885_s30 + $0x111] sm:$0xff] }
  0x24   : > { %8013 = vmatmul.mubr.msk.f32.gmra.mxu0 %vm316_vm1, %v8975_v23  ;;  %11288 = vst [vmem:[#allocation20_spill] sm:$0xff] %v9111_v51  ;;  %v9125_v53 = vld [vmem:[%s8885_s30 + $0x110] sm:$0xff]  ;;  %v9128_v54 = vld [vmem:[%s8885_s30 + $0x121] sm:$0xff]  ;;  %v9148_v58 = vld [vmem:[%s8885_s30 + $0x139] sm:$0xff] }
  0x25   : > { %8063 = vmatmul.mubr.msk.f32.gmra.mxu1 %vm316_vm1, %v8978_v24  ;;  %8015 = vmatprep.mubr.msk.f32.mxu0 %vm316_vm1, %v8981_v25  ;;  %11289 = vst [vmem:[#allocation21_spill] sm:$0xff] %v9125_v53  ;;  %v9131_v55 = vld [vmem:[%s8885_s30 + $0x120] sm:$0xff]  ;;  %v9142_v56 = vld [vmem:[%s8885_s30 + $0x129] sm:$0xff]  ;;  %v9151_v59 = vld [vmem:[%s8885_s30 + $0x138] sm:$0xff] }
  0x26   : > { %8065 = vmatprep.mubr.msk.f32.mxu1 %vm316_vm1, %v8984_v26  ;;  %11290 = vst [vmem:[#allocation22_spill] sm:$0xff] %v9131_v55  ;;  %v9145_v57 = vld [vmem:[%s8885_s30 + $0x128] sm:$0xff]  ;;  %11292 = vst [vmem:[#allocation24_spill] sm:$0xff] %v9151_v59  ;;  %v9165_v61 = vld [vmem:[%s8885_s30 + $0x140] sm:$0xff] }
  0x27   : > { %11291 = vst [vmem:[#allocation23_spill] sm:$0xff] %v9145_v57  ;;  %v9162_v60 = vld [vmem:[%s8885_s30 + $0x141] sm:$0xff]  ;;  %11293 = vst [vmem:[#allocation25_spill] sm:$0xff] %v9165_v61  ;;  %v9168_v62 = vld [vmem:[%s8885_s30 + $0x151] sm:$0xff] }
  0x28   : > { %8016 = vmatmul.mubr.msk.f32.gmra.mxu0 %vm316_vm1, %v8995_v27  ;;  %v9171_v63 = vld [vmem:[%s8885_s30 + $0x150] sm:$0xff]  ;;  %v9182_v0 = vld [vmem:[%s8885_s30 + $0x159] sm:$0xff]  ;;  %v9191_v3 = vld [vmem:[%s8885_s30 + $0x168] sm:$0xff] }
  0x29   : > { %8066 = vmatmul.mubr.msk.f32.gmra.mxu1 %vm316_vm1, %v8998_v28  ;;  %8018 = vmatprep.mubr.msk.f32.mxu0 %vm316_vm1, %v9001_v29  ;;  %11294 = vst [vmem:[#allocation26_spill] sm:$0xff] %v9171_v63  ;;  %v9185_v1 = vld [vmem:[%s8885_s30 + $0x158] sm:$0xff]  ;;  %v9188_v2 = vld [vmem:[%s8885_s30 + $0x169] sm:$0xff] }
  0x2a   : > { %8068 = vmatprep.mubr.msk.f32.mxu1 %vm316_vm1, %v9004_v30  ;;  %11295 = vst [vmem:[#allocation27_spill] sm:$0xff] %v9185_v1  ;;  %11296 = vst [vmem:[#allocation28_spill] sm:$0xff] %v9188_v2  ;;  %v9202_v4 = vld [vmem:[%s8885_s30 + $0x171] sm:$0xff]  ;;  %v966_v6 = vld [vmem:[%s8885_s30 + $0x2] sm:$0xff] }
  0x2b   : > { %11297 = vst [vmem:[#allocation29_spill] sm:$0xff] %v9202_v4  ;;  %v9205_v5 = vld [vmem:[%s8885_s30 + $0x170] sm:$0xff] }
  0x2c   : > { %8019 = vmatmul.mubr.msk.f32.gmra.mxu0 %vm316_vm1, %v9015_v31  ;;  %v967_v7 = vld [vmem:[%s8885_s30 + $0xa] sm:$0xff] }
  0x2d   : > { %8069 = vmatmul.mubr.msk.f32.gmra.mxu1 %vm316_vm1, %v9018_v32  ;;  %8021 = vmatprep.mubr.msk.f32.mxu0 %vm316_vm1, %v9021_v33 }
  0x2e   : > { %8071 = vmatprep.mubr.msk.f32.mxu1 %vm316_vm1, %v9024_v34 }
  0x30   : > { %8022 = vmatmul.mubr.msk.f32.gmra.mxu0 %vm316_vm1, %v9035_v35 }
  0x31   : > { %8072 = vmatmul.mubr.msk.f32.gmra.mxu1 %vm316_vm1, %v9038_v36  ;;  %8024 = vmatprep.mubr.msk.f32.mxu0 %vm316_vm1, %v9041_v37 }
  0x32   : > { %8074 = vmatprep.mubr.msk.f32.mxu1 %vm316_vm1, %v9044_v38 }
  0x34   : > { %8025 = vmatmul.mubr.msk.f32.gmra.mxu0 %vm316_vm1, %v9055_v39 }
  0x35   : > { %8075 = vmatmul.mubr.msk.f32.gmra.mxu1 %vm316_vm1, %v9058_v40  ;;  %8027 = vmatprep.mubr.msk.f32.mxu0 %vm316_vm1, %v9061_v41 }
  0x36   : > { %8077 = vmatprep.mubr.msk.f32.mxu1 %vm316_vm1, %v9064_v42 }
  0x38   : > { %8028 = vmatmul.mubr.msk.f32.gmra.mxu0 %vm316_vm1, %v9082_v44 }
  0x39   : > { %8078 = vmatmul.mubr.msk.f32.gmra.mxu1 %vm316_vm1, %v9085_v45  ;;  %8030 = vmatprep.mubr.msk.f32.mxu0 %vm316_vm1, %v9088_v46 }
  0x3a   : > { %8080 = vmatprep.mubr.msk.f32.mxu1 %vm316_vm1, %v9091_v47 }
  0x3c   : > { %8031 = vmatmul.mubr.msk.f32.gmra.mxu0 %vm316_vm1, %v9102_v48 }
  0x3d   : > { %8081 = vmatmul.mubr.msk.f32.gmra.mxu1 %vm316_vm1, %v9105_v49  ;;  %8033 = vmatprep.mubr.msk.f32.mxu0 %vm316_vm1, %v9108_v50 }
  0x3e   : > { %8083 = vmatprep.mubr.msk.f32.mxu1 %vm316_vm1, %v9111_v51 }
  0x40   : > { %8034 = vmatmul.mubr.msk.f32.gmra.mxu0 %vm316_vm1, %v9122_v52 }
  0x41   : > { %8084 = vmatmul.mubr.msk.f32.gmra.mxu1 %vm316_vm1, %v9125_v53  ;;  %8036 = vmatprep.mubr.msk.f32.mxu0 %vm316_vm1, %v9128_v54 }
  0x42   : > { %8086 = vmatprep.mubr.msk.f32.mxu1 %vm316_vm1, %v9131_v55 }
  0x44   : > { %8037 = vmatmul.mubr.msk.f32.gmra.mxu0 %vm316_vm1, %v9142_v56 }
  0x45   : > { %8087 = vmatmul.mubr.msk.f32.gmra.mxu1 %vm316_vm1, %v9145_v57  ;;  %8039 = vmatprep.mubr.msk.f32.mxu0 %vm316_vm1, %v9148_v58 }
  0x46   : > { %8089 = vmatprep.mubr.msk.f32.mxu1 %vm316_vm1, %v9151_v59 }
  0x48   : > { %8040 = vmatmul.mubr.msk.f32.gmra.mxu0 %vm316_vm1, %v9162_v60 }
  0x49   : > { %8090 = vmatmul.mubr.msk.f32.gmra.mxu1 %vm316_vm1, %v9165_v61  ;;  %8042 = vmatprep.mubr.msk.f32.mxu0 %vm316_vm1, %v9168_v62 }
  0x4a   : > { %8092 = vmatprep.mubr.msk.f32.mxu1 %vm316_vm1, %v9171_v63 }
  0x4c   : > { %8043 = vmatmul.mubr.msk.f32.gmra.mxu0 %vm316_vm1, %v9182_v0 }
  0x4d   : > { %8093 = vmatmul.mubr.msk.f32.gmra.mxu1 %vm316_vm1, %v9185_v1  ;;  %8045 = vmatprep.mubr.msk.f32.mxu0 %vm316_vm1, %v9188_v2  ;;  %v9217_v2 = vld [vmem:[%s8885_s30 + $0x1a] sm:$0xff] }
  0x4e   : > { %8095 = vmatprep.mubr.msk.f32.mxu1 %vm316_vm1, %v9191_v3 }
  0x50   : > { %8046 = vmatmul.mubr.msk.f32.gmra.mxu0 %vm316_vm1, %v9202_v4  ;;  %v9225_v4 = vld [vmem:[%s11233_s1 + $0x18] sm:$0xf] }
  0x51   : > { %8096 = vmatmul.mubr.msk.f32.gmra.mxu1 %vm316_vm1, %v9205_v5  ;;  %8100 = vmatprep.mubr.msk.f32.mxu0 %vm316_vm1, %v966_v6  ;;  %v9230_v6 = vld [vmem:[%s11233_s1 + $0x1c] sm:$0xf] }
  0x52   : > { %8150 = vmatprep.mubr.msk.f32.mxu1 %vm316_vm1, %v8897_v9  ;;  %v9235_v9 = vld [vmem:[%s8885_s30 + $0x22] sm:$0xff] }
  0x54   : > { %8101 = vmatmul.mubr.msk.f32.vlgmr.msra.gmra.mxu0 %vm316_vm1, %v967_v7  ;;  %v9271_v7 = vld [vmem:[%s8885_s30 + $0x52] sm:$0xff] }
  0x55   : > { %8151 = vmatmul.mubr.msk.f32.vlgmr.msra.gmra.mxu1 %vm316_vm1, %v8914_v12  ;;  %8103 = vmatprep.mubr.msk.f32.mxu0 %vm316_vm1, %v9217_v2  ;;  %v9240_v12 = vld [vmem:[%s8885_s30 + $0x32] sm:$0xff] }
  0x56   : > { %8153 = vmatprep.mubr.msk.f32.mxu1 %vm316_vm1, %v8920_v14  ;;  %8199 = vmatpush3.msk.msra.mxu0 %vm413_vm0, %v8904_v10  ;;  %v9257_v10 = vld [vmem:[%s8885_s30 + $0x3a] sm:$0xff] }
  0x57   : > { %8249 = vmatpush3.msk.msra.mxu1 %vm413_vm0, %v9069_v43  ;;  %8298 = vmatprep.subr.msk.mxu0 %vm413_vm0, %v9225_v4  ;;  %v9262_v43 = vld [vmem:[%s8885_s30 + $0x4a] sm:$0xff]  ;;  %v9433_v14 = vld [vmem:[%s8885_s30 + $0x180] sm:$0xff] }
  0x58   : > { %8348 = vmatprep.subr.msk.mxu1 %vm413_vm0, %v9230_v6  ;;  %8104 = vmatmul.mubr.msk.f32.gmra.mxu0 %vm316_vm1, %v9235_v9  ;;  %11298 = vst [vmem:[#allocation30_spill] sm:$0xff] %v9433_v14 }
  0x59   : > { %8154 = vmatmul.mubr.msk.f32.gmra.mxu1 %vm316_vm1, %v8938_v16  ;;  %8106 = vmatprep.mubr.msk.f32.mxu0 %vm316_vm1, %v9240_v12  ;;  %v9276_v16 = vld [vmem:[%s8885_s30 + $0x62] sm:$0xff] }
  0x5a   : > { %8156 = vmatprep.mubr.msk.f32.mxu1 %vm316_vm1, %v8944_v18  ;;  %v9290_v18 = vld [vmem:[%s8885_s30 + $0x7a] sm:$0xff] }
  0x5c   : > { %8107 = vmatmul.mubr.msk.f32.gmra.mxu0 %vm316_vm1, %v9257_v10 }
  0x5d   : > { %8157 = vmatmul.mubr.msk.f32.gmra.mxu1 %vm316_vm1, %v8958_v20  ;;  %8109 = vmatprep.mubr.msk.f32.mxu0 %vm316_vm1, %v9262_v43  ;;  %v9285_v20 = vld [vmem:[%s8885_s30 + $0x6a] sm:$0xff] }
  0x5e   : > { %8159 = vmatprep.mubr.msk.f32.mxu1 %vm316_vm1, %v8964_v22  ;;  %v9304_v22 = vld [vmem:[%s8885_s30 + $0x92] sm:$0xff] }
  0x60   : > { %8110 = vmatmul.mubr.msk.f32.gmra.mxu0 %vm316_vm1, %v9271_v7 }
  0x61   : > { %8160 = vmatmul.mubr.msk.f32.gmra.mxu1 %vm316_vm1, %v8978_v24  ;;  %8112 = vmatprep.mubr.msk.f32.mxu0 %vm316_vm1, %v9276_v16  ;;  %v9299_v24 = vld [vmem:[%s8885_s30 + $0x82] sm:$0xff] }
  0x62   : > { %8162 = vmatprep.mubr.msk.f32.mxu1 %vm316_vm1, %v8984_v26  ;;  %v9318_v26 = vld [vmem:[%s8885_s30 + $0xaa] sm:$0xff] }
  0x64   : > { %8113 = vmatmul.mubr.msk.f32.gmra.mxu0 %vm316_vm1, %v9285_v20 }
  0x65   : > { %8163 = vmatmul.mubr.msk.f32.gmra.mxu1 %vm316_vm1, %v8998_v28  ;;  %8115 = vmatprep.mubr.msk.f32.mxu0 %vm316_vm1, %v9290_v18  ;;  %v9313_v28 = vld [vmem:[%s8885_s30 + $0x9a] sm:$0xff] }
  0x66   : > { %8165 = vmatprep.mubr.msk.f32.mxu1 %vm316_vm1, %v9004_v30  ;;  %v9332_v30 = vld [vmem:[%s8885_s30 + $0xc2] sm:$0xff] }
  0x68   : > { %8116 = vmatmul.mubr.msk.f32.gmra.mxu0 %vm316_vm1, %v9299_v24 }
  0x69   : > { %8166 = vmatmul.mubr.msk.f32.gmra.mxu1 %vm316_vm1, %v9018_v32  ;;  %8118 = vmatprep.mubr.msk.f32.mxu0 %vm316_vm1, %v9304_v22  ;;  %v9327_v32 = vld [vmem:[%s8885_s30 + $0xb2] sm:$0xff] }
  0x6a   : > { %8168 = vmatprep.mubr.msk.f32.mxu1 %vm316_vm1, %v9024_v34  ;;  %v9346_v34 = vld [vmem:[%s8885_s30 + $0xda] sm:$0xff] }
  0x6c   : > { %8119 = vmatmul.mubr.msk.f32.gmra.mxu0 %vm316_vm1, %v9313_v28 }
  0x6d   : > { %8169 = vmatmul.mubr.msk.f32.gmra.mxu1 %vm316_vm1, %v9038_v36  ;;  %8121 = vmatprep.mubr.msk.f32.mxu0 %vm316_vm1, %v9318_v26  ;;  %v9341_v36 = vld [vmem:[%s8885_s30 + $0xca] sm:$0xff] }
  0x6e   : > { %8171 = vmatprep.mubr.msk.f32.mxu1 %vm316_vm1, %v9044_v38  ;;  %v9360_v38 = vld [vmem:[%s8885_s30 + $0xf2] sm:$0xff] }
  0x70   : > { %8122 = vmatmul.mubr.msk.f32.gmra.mxu0 %vm316_vm1, %v9327_v32 }
  0x71   : > { %8172 = vmatmul.mubr.msk.f32.gmra.mxu1 %vm316_vm1, %v9058_v40  ;;  %8124 = vmatprep.mubr.msk.f32.mxu0 %vm316_vm1, %v9332_v30  ;;  %v9355_v40 = vld [vmem:[%s8885_s30 + $0xe2] sm:$0xff] }
  0x72   : > { %8174 = vmatprep.mubr.msk.f32.mxu1 %vm316_vm1, %v9064_v42  ;;  %v9374_v42 = vld [vmem:[%s8885_s30 + $0x10a] sm:$0xff] }
  0x74   : > { %8125 = vmatmul.mubr.msk.f32.gmra.mxu0 %vm316_vm1, %v9341_v36 }
  0x75   : > { %8175 = vmatmul.mubr.msk.f32.gmra.mxu1 %vm316_vm1, %v9085_v45  ;;  %8127 = vmatprep.mubr.msk.f32.mxu0 %vm316_vm1, %v9346_v34  ;;  %v9369_v45 = vld [vmem:[%s8885_s30 + $0xfa] sm:$0xff] }
  0x76   : > { %8177 = vmatprep.mubr.msk.f32.mxu1 %vm316_vm1, %v9091_v47  ;;  %v9388_v47 = vld [vmem:[%s8885_s30 + $0x122] sm:$0xff] }
  0x78   : > { %8128 = vmatmul.mubr.msk.f32.gmra.mxu0 %vm316_vm1, %v9355_v40 }
  0x79   : > { %8178 = vmatmul.mubr.msk.f32.gmra.mxu1 %vm316_vm1, %v9105_v49  ;;  %8130 = vmatprep.mubr.msk.f32.mxu0 %vm316_vm1, %v9360_v38  ;;  %v9383_v49 = vld [vmem:[%s8885_s30 + $0x112] sm:$0xff] }
  0x7a   : > { %8180 = vmatprep.mubr.msk.f32.mxu1 %vm316_vm1, %v9111_v51  ;;  %v9416_v51 = vld [vmem:[%s8885_s30 + $0x152] sm:$0xff] }
  0x7c   : > { %8131 = vmatmul.mubr.msk.f32.gmra.mxu0 %vm316_vm1, %v9369_v45 }
  0x7d   : > { %8181 = vmatmul.mubr.msk.f32.gmra.mxu1 %vm316_vm1, %v9125_v53  ;;  %8133 = vmatprep.mubr.msk.f32.mxu0 %vm316_vm1, %v9374_v42  ;;  %v9397_v53 = vld [vmem:[%s8885_s30 + $0x12a] sm:$0xff] }
  0x7e   : > { %8183 = vmatprep.mubr.msk.f32.mxu1 %vm316_vm1, %v9131_v55  ;;  %v9402_v55 = vld [vmem:[%s8885_s30 + $0x13a] sm:$0xff] }
  0x80   : > { %8134 = vmatmul.mubr.msk.f32.gmra.mxu0 %vm316_vm1, %v9383_v49 }
  0x81   : > { %8184 = vmatmul.mubr.msk.f32.gmra.mxu1 %vm316_vm1, %v9145_v57  ;;  %8136 = vmatprep.mubr.msk.f32.mxu0 %vm316_vm1, %v9388_v47  ;;  %v9411_v57 = vld [vmem:[%s8885_s30 + $0x142] sm:$0xff] }
  0x82   : > { %8186 = vmatprep.mubr.msk.f32.mxu1 %vm316_vm1, %v9151_v59  ;;  %v9430_v59 = vld [vmem:[%s8885_s30 + $0x16a] sm:$0xff] }
  0x84   : > { %8137 = vmatmul.mubr.msk.f32.gmra.mxu0 %vm316_vm1, %v9397_v53 }
  0x85   : > { %8187 = vmatmul.mubr.msk.f32.gmra.mxu1 %vm316_vm1, %v9165_v61  ;;  %8139 = vmatprep.mubr.msk.f32.mxu0 %vm316_vm1, %v9402_v55  ;;  %v9425_v61 = vld [vmem:[%s8885_s30 + $0x15a] sm:$0xff] }
  0x86   : > { %8189 = vmatprep.mubr.msk.f32.mxu1 %vm316_vm1, %v9171_v63  ;;  %v9447_v63 = vld [vmem:[%s8885_s30 + $0x188] sm:$0xff] }
  0x88   : > { %8140 = vmatmul.mubr.msk.f32.gmra.mxu0 %vm316_vm1, %v9411_v57 }
  0x89   : > { %8190 = vmatmul.mubr.msk.f32.gmra.mxu1 %vm316_vm1, %v9185_v1  ;;  %8142 = vmatprep.mubr.msk.f32.mxu0 %vm316_vm1, %v9416_v51  ;;  %v9442_v1 = vld [vmem:[%s8885_s30 + $0x172] sm:$0xff] }
  0x8a   : > { %8192 = vmatprep.mubr.msk.f32.mxu1 %vm316_vm1, %v9191_v3 }
  0x8c   : > { %8143 = vmatmul.mubr.msk.f32.gmra.mxu0 %vm316_vm1, %v9425_v61 }
  0x8d   : > { %8193 = vmatmul.mubr.msk.f32.gmra.mxu1 %vm316_vm1, %v9205_v5  ;;  %8145 = vmatprep.mubr.msk.f32.mxu0 %vm316_vm1, %v9430_v59 }
  0x8e   : > { %8195 = vmatprep.mubr.msk.f32.mxu1 %vm316_vm1, %v9433_v14  ;;  %v9464_v14 = vld [vmem:[%s11233_s1 + $0x20] sm:$0xf] }
  0x90   : > { %8146 = vmatmul.mubr.msk.f32.gmra.mxu0 %vm316_vm1, %v9442_v1 }
  0x91   : > { %8196 = vmatmul.mubr.msk.f32.gmra.mxu1 %vm316_vm1, %v9447_v63  ;;  %8200 = vmatprep.mubr.msk.f32.mxu0 %vm316_vm1, %v8894_v8  ;;  %v11299_v8 = vld [vmem:[#allocation28_spill] sm:$0xff] }
  0x92   : > { %8250 = vmatprep.mubr.msk.f32.mxu1 %vm316_vm1, %v9217_v2 }
  0x94   : > { %8201 = vmatmul.mubr.msk.f32.vlgmr.msra.gmra.mxu0 %vm316_vm1, %v8911_v11  ;;  %v9581_v11 = vld [vmem:[%s8885_s30 + $0x181] sm:$0xff] }
  0x95   : > { %8251 = vmatmul.mubr.msk.f32.vlgmr.msra.gmra.mxu1 %vm316_vm1, %v9235_v9  ;;  %8203 = vmatprep.mubr.msk.f32.mxu0 %vm316_vm1, %v8917_v13  ;;  %v11304_v9 = vld [vmem:[#allocation5_spill] sm:$0xff] }
  0x96   : > { %8253 = vmatprep.mubr.msk.f32.mxu1 %vm316_vm1, %v9240_v12  ;;  %8299 = vmatpush3.msk.msra.mxu0 %vm413_vm0, %v9225_v4 }
  0x97   : > { %8349 = vmatpush3.msk.msra.mxu1 %vm413_vm0, %v9230_v6  ;;  %8398 = vmatprep.subr.msk.mxu0 %vm413_vm0, %v9464_v14 }
  0x98   : > { %8204 = vmatmul.mubr.msk.f32.gmra.mxu0 %vm316_vm1, %v8935_v15 }
  0x99   : > { %8254 = vmatmul.mubr.msk.f32.gmra.mxu1 %vm316_vm1, %v9257_v10  ;;  %8206 = vmatprep.mubr.msk.f32.mxu0 %vm316_vm1, %v8941_v17 }
  0x9a   : > { %8256 = vmatprep.mubr.msk.f32.mxu1 %vm316_vm1, %v9262_v43 }
  0x9c   : > { %8207 = vmatmul.mubr.msk.f32.gmra.mxu0 %vm316_vm1, %v8955_v19 }
  0x9d   : > { %8257 = vmatmul.mubr.msk.f32.gmra.mxu1 %vm316_vm1, %v9271_v7  ;;  %8209 = vmatprep.mubr.msk.f32.mxu0 %vm316_vm1, %v8961_v21 }
  0x9e   : > { %8259 = vmatprep.mubr.msk.f32.mxu1 %vm316_vm1, %v9276_v16 }
  0xa0   : > { %8210 = vmatmul.mubr.msk.f32.gmra.mxu0 %vm316_vm1, %v8975_v23 }
  0xa1   : > { %8260 = vmatmul.mubr.msk.f32.gmra.mxu1 %vm316_vm1, %v9285_v20  ;;  %8212 = vmatprep.mubr.msk.f32.mxu0 %vm316_vm1, %v8981_v25 }
  0xa2   : > { %8262 = vmatprep.mubr.msk.f32.mxu1 %vm316_vm1, %v9290_v18 }
  0xa4   : > { %8213 = vmatmul.mubr.msk.f32.gmra.mxu0 %vm316_vm1, %v8995_v27 }
  0xa5   : > { %8263 = vmatmul.mubr.msk.f32.gmra.mxu1 %vm316_vm1, %v9299_v24  ;;  %8215 = vmatprep.mubr.msk.f32.mxu0 %vm316_vm1, %v9001_v29 }
  0xa6   : > { %8265 = vmatprep.mubr.msk.f32.mxu1 %vm316_vm1, %v9304_v22 }
  0xa8   : > { %8216 = vmatmul.mubr.msk.f32.gmra.mxu0 %vm316_vm1, %v9015_v31 }
  0xa9   : > { %8266 = vmatmul.mubr.msk.f32.gmra.mxu1 %vm316_vm1, %v9313_v28  ;;  %8218 = vmatprep.mubr.msk.f32.mxu0 %vm316_vm1, %v9021_v33 }
  0xaa   : > { %8268 = vmatprep.mubr.msk.f32.mxu1 %vm316_vm1, %v9318_v26 }
  0xac   : > { %8219 = vmatmul.mubr.msk.f32.gmra.mxu0 %vm316_vm1, %v9035_v35 }
  0xad   : > { %8269 = vmatmul.mubr.msk.f32.gmra.mxu1 %vm316_vm1, %v9327_v32  ;;  %8221 = vmatprep.mubr.msk.f32.mxu0 %vm316_vm1, %v9041_v37 }
  0xae   : > { %8271 = vmatprep.mubr.msk.f32.mxu1 %vm316_vm1, %v9332_v30 }
  0xb0   : > { %8222 = vmatmul.mubr.msk.f32.gmra.mxu0 %vm316_vm1, %v9055_v39 }
  0xb1   : > { %8272 = vmatmul.mubr.msk.f32.gmra.mxu1 %vm316_vm1, %v9341_v36  ;;  %8224 = vmatprep.mubr.msk.f32.mxu0 %vm316_vm1, %v9061_v41 }
  0xb2   : > { %8274 = vmatprep.mubr.msk.f32.mxu1 %vm316_vm1, %v9346_v34 }
  0xb4   : > { %8225 = vmatmul.mubr.msk.f32.gmra.mxu0 %vm316_vm1, %v9082_v44 }
  0xb5   : > { %8275 = vmatmul.mubr.msk.f32.gmra.mxu1 %vm316_vm1, %v9355_v40  ;;  %8227 = vmatprep.mubr.msk.f32.mxu0 %vm316_vm1, %v9088_v46 }
  0xb6   : > { %8277 = vmatprep.mubr.msk.f32.mxu1 %vm316_vm1, %v9360_v38 }
  0xb8   : > { %8228 = vmatmul.mubr.msk.f32.gmra.mxu0 %vm316_vm1, %v9102_v48 }
  0xb9   : > { %8278 = vmatmul.mubr.msk.f32.gmra.mxu1 %vm316_vm1, %v9369_v45  ;;  %8230 = vmatprep.mubr.msk.f32.mxu0 %vm316_vm1, %v9108_v50  ;;  %v11300_v45 = vld [vmem:[#allocation29_spill] sm:$0xff] }
  0xba   : > { %8280 = vmatprep.mubr.msk.f32.mxu1 %vm316_vm1, %v9374_v42  ;;  %v9584_v42 = vld [vmem:[%s8885_s30 + $0x182] sm:$0xff] }
  0xbc   : > { %8231 = vmatmul.mubr.msk.f32.gmra.mxu0 %vm316_vm1, %v9122_v52 }
  0xbd   : > { %8281 = vmatmul.mubr.msk.f32.gmra.mxu1 %vm316_vm1, %v9383_v49  ;;  %8233 = vmatprep.mubr.msk.f32.mxu0 %vm316_vm1, %v9128_v54  ;;  %v9598_v49 = vld [vmem:[%s8885_s30 + $0x18a] sm:$0xff] }
  0xbe   : > { %8283 = vmatprep.mubr.msk.f32.mxu1 %vm316_vm1, %v9388_v47  ;;  %v9593_v47 = vld [vmem:[%s8885_s30 + $0x189] sm:$0xff] }
  0xc0   : > { %8234 = vmatmul.mubr.msk.f32.gmra.mxu0 %vm316_vm1, %v9142_v56 }
  0xc1   : > { %8284 = vmatmul.mubr.msk.f32.gmra.mxu1 %vm316_vm1, %v9397_v53  ;;  %8236 = vmatprep.mubr.msk.f32.mxu0 %vm316_vm1, %v9148_v58 }
  0xc2   : > { %8286 = vmatprep.mubr.msk.f32.mxu1 %vm316_vm1, %v9402_v55 }
  0xc4   : > { %8237 = vmatmul.mubr.msk.f32.gmra.mxu0 %vm316_vm1, %v9162_v60 }
  0xc5   : > { %8287 = vmatmul.mubr.msk.f32.gmra.mxu1 %vm316_vm1, %v9411_v57  ;;  %8239 = vmatprep.mubr.msk.f32.mxu0 %vm316_vm1, %v9168_v62  ;;  %v11302_v57 = vld [vmem:[#allocation3_spill] sm:$0xff] }
  0xc6   : > { %8289 = vmatprep.mubr.msk.f32.mxu1 %vm316_vm1, %v9416_v51  ;;  %v11301_v51 = vld [vmem:[#allocation2_spill] sm:$0xff] }
  0xc8   : > { %8240 = vmatmul.mubr.msk.f32.gmra.mxu0 %vm316_vm1, %v9182_v0 }
  0xc9   : > { %8290 = vmatmul.mubr.msk.f32.gmra.mxu1 %vm316_vm1, %v9425_v61  ;;  %8242 = vmatprep.mubr.msk.f32.mxu0 %vm316_vm1, %v11299_v8  ;;  %v11303_v61 = vld [vmem:[#allocation4_spill] sm:$0xff] }
  0xca   : > { %8292 = vmatprep.mubr.msk.f32.mxu1 %vm316_vm1, %v9430_v59 }
  0xcc   : > { %8243 = vmatmul.mubr.msk.f32.gmra.mxu0 %vm316_vm1, %v11300_v45 }
  0xcd   : > { %8293 = vmatmul.mubr.msk.f32.gmra.mxu1 %vm316_vm1, %v9442_v1  ;;  %8245 = vmatprep.mubr.msk.f32.mxu0 %vm316_vm1, %v9581_v11 }
  0xce   : > { %8295 = vmatprep.mubr.msk.f32.mxu1 %vm316_vm1, %v9584_v42 }
  0xd0   : > { %8246 = vmatmul.mubr.msk.f32.gmra.mxu0 %vm316_vm1, %v9593_v47 }
  0xd1   : > { %8296 = vmatmul.mubr.msk.f32.gmra.mxu1 %vm316_vm1, %v9598_v49  ;;  %8300 = vmatprep.mubr.msk.f32.mxu0 %vm316_vm1, %v11301_v51  ;;  %v11305_v51 = vld [vmem:[#allocation6_spill] sm:$0xff] }
  0xd2   : > { %8350 = vmatprep.mubr.msk.f32.mxu1 %vm316_vm1, %v8917_v13 }
  0xd4   : > { %v8002_v53 = vpop.f32.mrf.mxu0  ;;  %8301 = vmatmul.mubr.msk.f32.vlgmr.msra.gmra.mxu0 %vm316_vm1, %v11302_v57 }
  0xd5   : > { %v8052_v55 = vpop.f32.mrf.mxu1  ;;  %8351 = vmatmul.mubr.msk.f32.vlgmr.msra.gmra.mxu1 %vm316_vm1, %v8935_v15  ;;  %8303 = vmatprep.mubr.msk.f32.mxu0 %vm316_vm1, %v11303_v61  ;;  %v11306_v61 = vld [vmem:[#allocation7_spill] sm:$0xff] }
  0xd6   : > { %v9612_v59 = vadd.f32 %v8052_v55, %v8002_v53  ;;  %8353 = vmatprep.mubr.msk.f32.mxu1 %vm316_vm1, %v8941_v17  ;;  %v483_v1 = vpop.f32.mrf.mxu0  ;;  %8399 = vmatpush3.msk.msra.mxu0 %vm413_vm0, %v9464_v14 }
  0xd7   : > { %v807_v2 = vpop.f32.mrf.mxu1 }
  0xd8   : > { %v9620_v13 = vadd.f32 %v807_v2, %v483_v1  ;;  %v8005_v4 = vpop.f32.mrf.mxu0  ;;  %8304 = vmatmul.mubr.msk.f32.gmra.mxu0 %vm316_vm1, %v11304_v9  ;;  %v11307_v1 = vld [vmem:[#allocation8_spill] sm:$0xff] }
  0xd9   : > { %v8055_v6 = vpop.f32.mrf.mxu1  ;;  %8354 = vmatmul.mubr.msk.f32.gmra.mxu1 %vm316_vm1, %v8955_v19  ;;  %8306 = vmatprep.mubr.msk.f32.mxu0 %vm316_vm1, %v11305_v51  ;;  %v11308_v51 = vld [vmem:[#allocation9_spill] sm:$0xff] }
  0xda   : > { %v9626_v15 = vadd.f32 %v8055_v6, %v8005_v4  ;;  %8356 = vmatprep.mubr.msk.f32.mxu1 %vm316_vm1, %v8961_v21  ;;  %v493_v17 = vpop.f32.mrf.mxu0 }
  0xdb   : > { %v817_v14 = vpop.f32.mrf.mxu1 }
  0xdc   : > { %v9632_v53 = vadd.f32 %v817_v14, %v493_v17  ;;  %v8008_v55 = vpop.f32.mrf.mxu0  ;;  %8307 = vmatmul.mubr.msk.f32.gmra.mxu0 %vm316_vm1, %v11306_v61  ;;  %v11309_v17 = vld [vmem:[#allocation10_spill] sm:$0xff] }
  0xdd   : > { %v8058_v57 = vpop.f32.mrf.mxu1  ;;  %8357 = vmatmul.mubr.msk.f32.gmra.mxu1 %vm316_vm1, %v8975_v23  ;;  %8309 = vmatprep.mubr.msk.f32.mxu0 %vm316_vm1, %v11307_v1  ;;  %v11310_v1 = vld [vmem:[#allocation11_spill] sm:$0xff] }
  0xde   : > { %v9638_v19 = vadd.f32 %v8058_v57, %v8008_v55  ;;  %8359 = vmatprep.mubr.msk.f32.mxu1 %vm316_vm1, %v8981_v25  ;;  %v503_v21 = vpop.f32.mrf.mxu0 }
  0xdf   : > { %v827_v2 = vpop.f32.mrf.mxu1 }
  0xe0   : > { %v9644_v4 = vadd.f32 %v827_v2, %v503_v21  ;;  %v8011_v6 = vpop.f32.mrf.mxu0  ;;  %8310 = vmatmul.mubr.msk.f32.gmra.mxu0 %vm316_vm1, %v11308_v51  ;;  %v11311_v21 = vld [vmem:[#allocation12_spill] sm:$0xff] }
  0xe1   : > { %v8061_v9 = vpop.f32.mrf.mxu1  ;;  %8360 = vmatmul.mubr.msk.f32.gmra.mxu1 %vm316_vm1, %v8995_v27  ;;  %8312 = vmatprep.mubr.msk.f32.mxu0 %vm316_vm1, %v11309_v17  ;;  %v11312_v17 = vld [vmem:[#allocation13_spill] sm:$0xff] }
  0xe2   : > { %v9650_v23 = vadd.f32 %v8061_v9, %v8011_v6  ;;  %8362 = vmatprep.mubr.msk.f32.mxu1 %vm316_vm1, %v9001_v29  ;;  %v513_v25 = vpop.f32.mrf.mxu0 }
  0xe3   : > { %v837_v14 = vpop.f32.mrf.mxu1 }
  0xe4   : > { %v9656_v55 = vadd.f32 %v837_v14, %v513_v25  ;;  %v8014_v57 = vpop.f32.mrf.mxu0  ;;  %8313 = vmatmul.mubr.msk.f32.gmra.mxu0 %vm316_vm1, %v11310_v1  ;;  %v11313_v25 = vld [vmem:[#allocation14_spill] sm:$0xff] }
  0xe5   : > { %v8064_v61 = vpop.f32.mrf.mxu1  ;;  %8363 = vmatmul.mubr.msk.f32.gmra.mxu1 %vm316_vm1, %v9015_v31  ;;  %8315 = vmatprep.mubr.msk.f32.mxu0 %vm316_vm1, %v11311_v21  ;;  %v11314_v21 = vld [vmem:[#allocation15_spill] sm:$0xff] }
  0xe6   : > { %v9662_v27 = vadd.f32 %v8064_v61, %v8014_v57  ;;  %8365 = vmatprep.mubr.msk.f32.mxu1 %vm316_vm1, %v9021_v33  ;;  %v523_v29 = vpop.f32.mrf.mxu0 }
  0xe7   : > { %v847_v2 = vpop.f32.mrf.mxu1 }
  0xe8   : > { %v9668_v6 = vadd.f32 %v847_v2, %v523_v29  ;;  %v8017_v9 = vpop.f32.mrf.mxu0  ;;  %8316 = vmatmul.mubr.msk.f32.gmra.mxu0 %vm316_vm1, %v11312_v17  ;;  %v11315_v29 = vld [vmem:[#allocation16_spill] sm:$0xff] }
  0xe9   : > { %v8067_v51 = vpop.f32.mrf.mxu1  ;;  %8366 = vmatmul.mubr.msk.f32.gmra.mxu1 %vm316_vm1, %v9035_v35  ;;  %8318 = vmatprep.mubr.msk.f32.mxu0 %vm316_vm1, %v11313_v25  ;;  %v11316_v25 = vld [vmem:[#allocation17_spill] sm:$0xff] }
  0xea   : > { %v9674_v31 = vadd.f32 %v8067_v51, %v8017_v9  ;;  %8368 = vmatprep.mubr.msk.f32.mxu1 %vm316_vm1, %v9041_v37  ;;  %v533_v33 = vpop.f32.mrf.mxu0 }
  0xeb   : > { %v857_v14 = vpop.f32.mrf.mxu1 }
  0xec   : > { %v9680_v57 = vadd.f32 %v857_v14, %v533_v33  ;;  %v8020_v61 = vpop.f32.mrf.mxu0  ;;  %8319 = vmatmul.mubr.msk.f32.gmra.mxu0 %vm316_vm1, %v11314_v21  ;;  %v11317_v33 = vld [vmem:[#allocation18_spill] sm:$0xff] }
  0xed   : > { %v8070_v1 = vpop.f32.mrf.mxu1  ;;  %8369 = vmatmul.mubr.msk.f32.gmra.mxu1 %vm316_vm1, %v9055_v39  ;;  %8321 = vmatprep.mubr.msk.f32.mxu0 %vm316_vm1, %v11315_v29  ;;  %v11318_v29 = vld [vmem:[#allocation19_spill] sm:$0xff] }
  0xee   : > { %v9686_v35 = vadd.f32 %v8070_v1, %v8020_v61  ;;  %8371 = vmatprep.mubr.msk.f32.mxu1 %vm316_vm1, %v9061_v41  ;;  %v543_v37 = vpop.f32.mrf.mxu0 }
  0xef   : > { %v867_v2 = vpop.f32.mrf.mxu1 }
  0xf0   : > { %v9692_v9 = vadd.f32 %v867_v2, %v543_v37  ;;  %v8023_v51 = vpop.f32.mrf.mxu0  ;;  %8322 = vmatmul.mubr.msk.f32.gmra.mxu0 %vm316_vm1, %v11316_v25  ;;  %v11319_v37 = vld [vmem:[#allocation20_spill] sm:$0xff]  ;;  %v11320_v25 = vld [vmem:[#allocation21_spill] sm:$0xff] }
  0xf1   : > { %v8073_v17 = vpop.f32.mrf.mxu1  ;;  %8372 = vmatmul.mubr.msk.f32.gmra.mxu1 %vm316_vm1, %v9082_v44  ;;  %8324 = vmatprep.mubr.msk.f32.mxu0 %vm316_vm1, %v11317_v33  ;;  %v11321_v33 = vld [vmem:[#allocation22_spill] sm:$0xff] }
  0xf2   : > { %v9698_v39 = vadd.f32 %v8073_v17, %v8023_v51  ;;  %8374 = vmatprep.mubr.msk.f32.mxu1 %vm316_vm1, %v9088_v46  ;;  %v553_v41 = vpop.f32.mrf.mxu0 }
  0xf3   : > { %v877_v14 = vpop.f32.mrf.mxu1 }
  0xf4   : > { %v9704_v61 = vadd.f32 %v877_v14, %v553_v41  ;;  %v8026_v1 = vpop.f32.mrf.mxu0  ;;  %8325 = vmatmul.mubr.msk.f32.gmra.mxu0 %vm316_vm1, %v11318_v29  ;;  %v11323_v29 = vld [vmem:[#allocation24_spill] sm:$0xff] }
  0xf5   : > { %v8076_v21 = vpop.f32.mrf.mxu1  ;;  %8375 = vmatmul.mubr.msk.f32.gmra.mxu1 %vm316_vm1, %v9102_v48  ;;  %8327 = vmatprep.mubr.msk.f32.mxu0 %vm316_vm1, %v11319_v37 }
  0xf6   : > { %v9710_v44 = vadd.f32 %v8076_v21, %v8026_v1  ;;  %8377 = vmatprep.mubr.msk.f32.mxu1 %vm316_vm1, %v9108_v50  ;;  %v9716_v46 = vpop.f32.mrf.mxu0  ;;  %v11322_v21 = vld [vmem:[#allocation23_spill] sm:$0xff] }
  0xf7   : > { %v9718_v2 = vpop.f32.mrf.mxu1 }
  0xf8   : > { %v8029_v51 = vpop.f32.mrf.mxu0  ;;  %8328 = vmatmul.mubr.msk.f32.gmra.mxu0 %vm316_vm1, %v11320_v25  ;;  %v11324_v25 = vld [vmem:[#allocation25_spill] sm:$0xff] }
  0xf9   : > { %v8079_v17 = vpop.f32.mrf.mxu1  ;;  %8378 = vmatmul.mubr.msk.f32.gmra.mxu1 %vm316_vm1, %v9122_v52  ;;  %8330 = vmatprep.mubr.msk.f32.mxu0 %vm316_vm1, %v11321_v33  ;;  %v11325_v33 = vld [vmem:[#allocation26_spill] sm:$0xff] }
  0xfa   : > { %v9724_v48 = vadd.f32 %v8079_v17, %v8029_v51  ;;  %8380 = vmatprep.mubr.msk.f32.mxu1 %vm316_vm1, %v9128_v54  ;;  %v9730_v50 = vpop.f32.mrf.mxu0 }
  0xfb   : > { %v9732_v41 = vpop.f32.mrf.mxu1 }
  0xfc   : > { %v8032_v14 = vpop.f32.mrf.mxu0  ;;  %8331 = vmatmul.mubr.msk.f32.gmra.mxu0 %vm316_vm1, %v11322_v21 }
  0xfd   : > { %v8082_v1 = vpop.f32.mrf.mxu1  ;;  %8381 = vmatmul.mubr.msk.f32.gmra.mxu1 %vm316_vm1, %v9142_v56  ;;  %8333 = vmatprep.mubr.msk.f32.mxu0 %vm316_vm1, %v11323_v29  ;;  %v11326_v29 = vld [vmem:[#allocation27_spill] sm:$0xff] }
  0xfe   : > { %v9738_v52 = vadd.f32 %v8082_v1, %v8032_v14  ;;  %8383 = vmatprep.mubr.msk.f32.mxu1 %vm316_vm1, %v9148_v58  ;;  %v9744_v54 = vpop.f32.mrf.mxu0 }
  0xff   : > { %v9746_v37 = vpop.f32.mrf.mxu1 }
 0x100   : > { %v8035_v51 = vpop.f32.mrf.mxu0  ;;  %8334 = vmatmul.mubr.msk.f32.gmra.mxu0 %vm316_vm1, %v11324_v25 }
 0x101   : > { %v8085_v17 = vpop.f32.mrf.mxu1  ;;  %8384 = vmatmul.mubr.msk.f32.gmra.mxu1 %vm316_vm1, %v9162_v60  ;;  %8336 = vmatprep.mubr.msk.f32.mxu0 %vm316_vm1, %v11325_v33 }
 0x102   : > { %v9752_v56 = vadd.f32 %v8085_v17, %v8035_v51  ;;  %8386 = vmatprep.mubr.msk.f32.mxu1 %vm316_vm1, %v9168_v62  ;;  %v9758_v58 = vpop.f32.mrf.mxu0 }
 0x103   : > { %v9760_v14 = vpop.f32.mrf.mxu1 }
 0x104   : > { %v8038_v1 = vpop.f32.mrf.mxu0  ;;  %8337 = vmatmul.mubr.msk.f32.gmra.mxu0 %vm316_vm1, %v11326_v29 }
 0x105   : > { %v8088_v21 = vpop.f32.mrf.mxu1  ;;  %8387 = vmatmul.mubr.msk.f32.gmra.mxu1 %vm316_vm1, %v9182_v0  ;;  %8339 = vmatprep.mubr.msk.f32.mxu0 %vm316_vm1, %v9191_v3  ;;  %v11329_v3 = vld [vmem:[#allocation30_spill] sm:$0xff] }
 0x106   : > { %v9766_v60 = vadd.f32 %v8088_v21, %v8038_v1  ;;  %8389 = vmatprep.mubr.msk.f32.mxu1 %vm316_vm1, %v11299_v8  ;;  %v9772_v62 = vpop.f32.mrf.mxu0  ;;  %v7209_v1 = vld [vmem:[%s8885_s30 + $0x198] sm:$0xff] }
 0x107   : > { %11327 = vst [vmem:[#allocation28_spill] sm:$0xff] %v9772_v62  ;;  %v9774_v51 = vpop.f32.mrf.mxu1  ;;  %v7275_v21 = vld [vmem:[%s8885_s30 + $0x199] sm:$0xff] }
 0x108   : > { %11328 = vst [vmem:[#allocation29_spill] sm:$0xff] %v9774_v51  ;;  %v8041_v17 = vpop.f32.mrf.mxu0  ;;  %8340 = vmatmul.mubr.msk.f32.gmra.mxu0 %vm316_vm1, %v9205_v5 }
 0x109   : > { %v8091_v25 = vpop.f32.mrf.mxu1  ;;  %8390 = vmatmul.mubr.msk.f32.gmra.mxu1 %vm316_vm1, %v11300_v45  ;;  %8342 = vmatprep.mubr.msk.f32.mxu0 %vm316_vm1, %v11329_v3 }
 0x10a   : > { %v9780_v0 = vadd.f32 %v8091_v25, %v8041_v17  ;;  %8392 = vmatprep.mubr.msk.f32.mxu1 %vm316_vm1, %v9581_v11  ;;  %v9786_v8 = vpop.f32.mrf.mxu0  ;;  %v7210_v17 = vld [vmem:[%s8885_s30 + $0x1a0] sm:$0xff] }
 0x10b   : > { %11330 = vst [vmem:[#allocation2_spill] sm:$0xff] %v9786_v8  ;;  %v9788_v33 = vpop.f32.mrf.mxu1  ;;  %v7276_v11 = vld [vmem:[%s8885_s30 + $0x1a1] sm:$0xff] }
 0x10c   : > { %11331 = vst [vmem:[#allocation3_spill] sm:$0xff] %v9788_v33  ;;  %v8044_v29 = vpop.f32.mrf.mxu0  ;;  %8343 = vmatmul.mubr.msk.f32.gmra.mxu0 %vm316_vm1, %v9447_v63 }
 0x10d   : > { %v8094_v5 = vpop.f32.mrf.mxu1  ;;  %8393 = vmatmul.mubr.msk.f32.gmra.mxu1 %vm316_vm1, %v9593_v47  ;;  %8345 = vmatprep.mubr.msk.f32.mxu0 %vm316_vm1, %v7209_v1 }
 0x10e   : > { %v9796_v45 = vadd.f32 %v8094_v5, %v8044_v29  ;;  %8395 = vmatprep.mubr.msk.f32.mxu1 %vm316_vm1, %v7275_v21  ;;  %v9802_v25 = vpop.f32.mrf.mxu0 }
 0x10f   : > { %11332 = vst [vmem:[#allocation4_spill] sm:$0xff] %v9802_v25  ;;  %v9804_v3 = vpop.f32.mrf.mxu1 }
 0x110   : > { %11333 = vst [vmem:[#allocation5_spill] sm:$0xff] %v9804_v3  ;;  %v8047_v33 = vpop.f32.mrf.mxu0  ;;  %8346 = vmatmul.mubr.msk.f32.gmra.mxu0 %vm316_vm1, %v7210_v17 }
 0x111   : > { %v8097_v8 = vpop.f32.mrf.mxu1  ;;  %8396 = vmatmul.mubr.msk.f32.gmra.mxu1 %vm316_vm1, %v7276_v11  ;;  %8400 = vmatprep.mubr.msk.f32.mxu0 %vm316_vm1, %v9240_v12 }
 0x112   : > { %v9808_v63 = vadd.f32 %v8097_v8, %v8047_v33  ;;  %v9812_v47 = vpop.f32.mrf.mxu0 }
 0x113   : > { %11334 = vst [vmem:[#allocation6_spill] sm:$0xff] %v9812_v47  ;;  %v9814_v1 = vpop.f32.mrf.mxu1 }
 0x114   : > { %11335 = vst [vmem:[#allocation7_spill] sm:$0xff] %v9814_v1  ;;  %v8102_v21 = vpop.f32.mrf.mxu0  ;;  %8401 = vmatmul.mubr.msk.f32.vlgmr.msra.gmra.mxu0 %vm316_vm1, %v9257_v10 }
 0x115   : > { %v8152_v29 = vpop.f32.mrf.mxu1  ;;  %v1325_v5 = vadd.f32 %v8102_v21, %v9612_v59  ;;  %8403 = vmatprep.mubr.msk.f32.mxu0 %vm316_vm1, %v9262_v43 }
 0x116   : > { %v1165_v17 = vpop.f32.mrf.mxu0 }
 0x117   : > { %v9821_v8 = vpop.f32.mrf.mxu1  ;;  %v9824_v33 = vadd.f32 %v1165_v17, %v9620_v13  ;;  %v9826_v12 = vadd.f32 %v8152_v29, %v1325_v5 }
 0x118   : > { %v8105_v11 = vpop.f32.mrf.mxu0  ;;  %8404 = vmatmul.mubr.msk.f32.gmra.mxu0 %vm316_vm1, %v9271_v7 }
 0x119   : > { %v8155_v1 = vpop.f32.mrf.mxu1  ;;  %v1327_v10 = vadd.f32 %v8105_v11, %v9626_v15  ;;  %8406 = vmatprep.mubr.msk.f32.mxu0 %vm316_vm1, %v9276_v16 }
 0x11a   : > { %v1175_v59 = vpop.f32.mrf.mxu0 }
 0x11b   : > { %v9833_v43 = vpop.f32.mrf.mxu1  ;;  %v9836_v21 = vadd.f32 %v1175_v59, %v9632_v53  ;;  %v9838_v13 = vadd.f32 %v8155_v1, %v1327_v10 }
 0x11c   : > { %11336 = vst [vmem:[#allocation8_spill] sm:$0xff] %v9833_v43  ;;  %v8108_v29 = vpop.f32.mrf.mxu0  ;;  %8407 = vmatmul.mubr.msk.f32.gmra.mxu0 %vm316_vm1, %v9285_v20 }
 0x11d   : > { %11337 = vst [vmem:[#allocation9_spill] sm:$0xff] %v9836_v21  ;;  %v8158_v5 = vpop.f32.mrf.mxu1  ;;  %v1329_v7 = vadd.f32 %v8108_v29, %v9638_v19  ;;  %8409 = vmatprep.mubr.msk.f32.mxu0 %vm316_vm1, %v9290_v18 }
 0x11e   : > { %v1185_v15 = vpop.f32.mrf.mxu0 }
 0x11f   : > { %v9845_v16 = vpop.f32.mrf.mxu1  ;;  %v9848_v17 = vadd.f32 %v1185_v15, %v9644_v4  ;;  %v9850_v53 = vadd.f32 %v8158_v5, %v1329_v7 }
 0x120   : > { %v8111_v1 = vpop.f32.mrf.mxu0  ;;  %8410 = vmatmul.mubr.msk.f32.gmra.mxu0 %vm316_vm1, %v9299_v24 }
 0x121   : > { %v8161_v11 = vpop.f32.mrf.mxu1  ;;  %v1331_v20 = vadd.f32 %v8111_v1, %v9650_v23  ;;  %8412 = vmatprep.mubr.msk.f32.mxu0 %vm316_vm1, %v9304_v22 }
 0x122   : > { %v1195_v19 = vpop.f32.mrf.mxu0 }
 0x123   : > { %v9857_v18 = vpop.f32.mrf.mxu1  ;;  %v9860_v10 = vadd.f32 %v1195_v19, %v9656_v55  ;;  %v9862_v4 = vadd.f32 %v8161_v11, %v1331_v20 }
 0x124   : > { %v8114_v59 = vpop.f32.mrf.mxu0  ;;  %8413 = vmatmul.mubr.msk.f32.gmra.mxu0 %vm316_vm1, %v9313_v28 }
 0x125   : > { %v8164_v29 = vpop.f32.mrf.mxu1  ;;  %v1333_v24 = vadd.f32 %v8114_v59, %v9662_v27  ;;  %8415 = vmatprep.mubr.msk.f32.mxu0 %vm316_vm1, %v9318_v26 }
 0x126   : > { %v1205_v23 = vpop.f32.mrf.mxu0 }
 0x127   : > { %v9869_v22 = vpop.f32.mrf.mxu1  ;;  %v9872_v5 = vadd.f32 %v1205_v23, %v9668_v6  ;;  %v9874_v55 = vadd.f32 %v8164_v29, %v1333_v24 }
 0x128   : > { %11338 = vst [vmem:[#allocation10_spill] sm:$0xff] %v9869_v22  ;;  %v8117_v7 = vpop.f32.mrf.mxu0  ;;  %8416 = vmatmul.mubr.msk.f32.gmra.mxu0 %vm316_vm1, %v9327_v32 }
 0x129   : > { %11339 = vst [vmem:[#allocation11_spill] sm:$0xff] %v9872_v5  ;;  %v8167_v15 = vpop.f32.mrf.mxu1  ;;  %v1335_v28 = vadd.f32 %v8117_v7, %v9674_v31  ;;  %8418 = vmatprep.mubr.msk.f32.mxu0 %vm316_vm1, %v9332_v30 }
 0x12a   : > { %v1215_v27 = vpop.f32.mrf.mxu0 }
 0x12b   : > { %v9881_v26 = vpop.f32.mrf.mxu1  ;;  %v9884_v1 = vadd.f32 %v1215_v27, %v9680_v57  ;;  %v9886_v6 = vadd.f32 %v8167_v15, %v1335_v28 }
 0x12c   : > { %11340 = vst [vmem:[#allocation12_spill] sm:$0xff] %v9881_v26  ;;  %v8120_v11 = vpop.f32.mrf.mxu0  ;;  %8419 = vmatmul.mubr.msk.f32.gmra.mxu0 %vm316_vm1, %v9341_v36 }
 0x12d   : > { %11341 = vst [vmem:[#allocation13_spill] sm:$0xff] %v9884_v1  ;;  %v8170_v32 = vpop.f32.mrf.mxu1  ;;  %v1337_v31 = vadd.f32 %v8120_v11, %v9686_v35  ;;  %8421 = vmatprep.mubr.msk.f32.mxu0 %vm316_vm1, %v9346_v34  ;;  %v7328_v34 = vld [vmem:[%s8885_s30 + $0xfa] sm:$0xff]  ;;  %v7331_v11 = vld [vmem:[%s8885_s30 + $0x122] sm:$0xff] }
 0x12e   : > { %v1225_v30 = vpop.f32.mrf.mxu0 }
 0x12f   : > { %v9893_v20 = vpop.f32.mrf.mxu1  ;;  %v9896_v57 = vadd.f32 %v1225_v30, %v9692_v9  ;;  %v9898_v19 = vadd.f32 %v8170_v32, %v1337_v31  ;;  %v7329_v9 = vld [vmem:[%s8885_s30 + $0x10a] sm:$0xff] }
 0x130   : > { %v8123_v59 = vpop.f32.mrf.mxu0  ;;  %8422 = vmatmul.mubr.msk.f32.gmra.mxu0 %vm316_vm1, %v9355_v40 }
 0x131   : > { %v8173_v36 = vpop.f32.mrf.mxu1  ;;  %v1339_v29 = vadd.f32 %v8123_v59, %v9698_v39  ;;  %8424 = vmatprep.mubr.msk.f32.mxu0 %vm316_vm1, %v9360_v38  ;;  %v7330_v38 = vld [vmem:[%s8885_s30 + $0x112] sm:$0xff] }
 0x132   : > { %v1235_v35 = vpop.f32.mrf.mxu0 }
 0x133   : > { %v9906_v24 = vpop.f32.mrf.mxu1  ;;  %v9910_v23 = vadd.f32 %v1235_v35, %v9704_v61  ;;  %v9912_v7 = vadd.f32 %v8173_v36, %v1339_v29  ;;  %v7333_v29 = vld [vmem:[%s8885_s30 + $0x13a] sm:$0xff] }
 0x134   : > { %v8126_v15 = vpop.f32.mrf.mxu0  ;;  %8425 = vmatmul.mubr.msk.f32.gmra.mxu0 %vm316_vm1, %v7328_v34 }
 0x135   : > { %v8176_v40 = vpop.f32.mrf.mxu1  ;;  %v1341_v39 = vadd.f32 %v8126_v15, %v9710_v44  ;;  %8427 = vmatprep.mubr.msk.f32.mxu0 %vm316_vm1, %v7329_v9  ;;  %v7332_v44 = vld [vmem:[%s8885_s30 + $0x12a] sm:$0xff] }
 0x136   : > { %v9918_v28 = vpop.f32.mrf.mxu0 }
 0x137   : > { %v9920_v27 = vpop.f32.mrf.mxu1  ;;  %v9923_v61 = vadd.f32 %v8176_v40, %v1341_v39 }
 0x138   : > { %v8129_v32 = vpop.f32.mrf.mxu0  ;;  %8428 = vmatmul.mubr.msk.f32.gmra.mxu0 %vm316_vm1, %v7330_v38  ;;  %v7335_v38 = vld [vmem:[%s8885_s30 + $0x152] sm:$0xff] }
 0x139   : > { %v8179_v31 = vpop.f32.mrf.mxu1  ;;  %v1343_v30 = vadd.f32 %v8129_v32, %v9724_v48  ;;  %8430 = vmatprep.mubr.msk.f32.mxu0 %vm316_vm1, %v7331_v11  ;;  %v7334_v48 = vld [vmem:[%s8885_s30 + $0x142] sm:$0xff] }
 0x13a   : > { %v9929_v59 = vpop.f32.mrf.mxu0 }
 0x13b   : > { %v9931_v36 = vpop.f32.mrf.mxu1  ;;  %v9934_v34 = vadd.f32 %v8179_v31, %v1343_v30 }
 0x13c   : > { %v8132_v35 = vpop.f32.mrf.mxu0  ;;  %8431 = vmatmul.mubr.msk.f32.gmra.mxu0 %vm316_vm1, %v7332_v44 }
 0x13d   : > { %v8182_v9 = vpop.f32.mrf.mxu1  ;;  %v1345_v15 = vadd.f32 %v8132_v35, %v9738_v52  ;;  %8433 = vmatprep.mubr.msk.f32.mxu0 %vm316_vm1, %v7333_v29  ;;  %v7336_v52 = vld [vmem:[%s8885_s30 + $0x15a] sm:$0xff]  ;;  %v7337_v35 = vld [vmem:[%s8885_s30 + $0x16a] sm:$0xff] }
 0x13e   : > { %v9940_v40 = vpop.f32.mrf.mxu0 }
 0x13f   : > { %v9942_v39 = vpop.f32.mrf.mxu1  ;;  %v9945_v11 = vadd.f32 %v8182_v9, %v1345_v15 }
 0x140   : > { %v8135_v32 = vpop.f32.mrf.mxu0  ;;  %8434 = vmatmul.mubr.msk.f32.gmra.mxu0 %vm316_vm1, %v7334_v48 }
 0x141   : > { %v8185_v31 = vpop.f32.mrf.mxu1  ;;  %v1347_v30 = vadd.f32 %v8135_v32, %v9752_v56  ;;  %8436 = vmatprep.mubr.msk.f32.mxu0 %vm316_vm1, %v7335_v38  ;;  %v7338_v56 = vld [vmem:[%s8885_s30 + $0x172] sm:$0xff] }
 0x142   : > { %v9951_v44 = vpop.f32.mrf.mxu0 }
 0x143   : > { %11342 = vst [vmem:[#allocation14_spill] sm:$0xff] %v9951_v44  ;;  %v9953_v29 = vpop.f32.mrf.mxu1  ;;  %v9956_v26 = vadd.f32 %v8185_v31, %v1347_v30 }
 0x144   : > { %11343 = vst [vmem:[#allocation15_spill] sm:$0xff] %v9953_v29  ;;  %v8138_v1 = vpop.f32.mrf.mxu0  ;;  %8437 = vmatmul.mubr.msk.f32.gmra.mxu0 %vm316_vm1, %v7336_v52  ;;  %v7341_v52 = vld [vmem:[%s8885_s30 + $0x19a] sm:$0xff] }
 0x145   : > { %v8188_v9 = vpop.f32.mrf.mxu1  ;;  %v1349_v15 = vadd.f32 %v8138_v1, %v9766_v60  ;;  %8439 = vmatprep.mubr.msk.f32.mxu0 %vm316_vm1, %v7337_v35 }
 0x146   : > { %v9962_v48 = vpop.f32.mrf.mxu0 }
 0x147   : > { %11344 = vst [vmem:[#allocation16_spill] sm:$0xff] %v9962_v48  ;;  %v9964_v38 = vpop.f32.mrf.mxu1  ;;  %v9966_v32 = vadd.f32 %v8188_v9, %v1349_v15 }
 0x148   : > { %11345 = vst [vmem:[#allocation17_spill] sm:$0xff] %v9964_v38  ;;  %v8141_v22 = vpop.f32.mrf.mxu0  ;;  %8440 = vmatmul.mubr.msk.f32.gmra.mxu0 %vm316_vm1, %v7338_v56 }
 0x149   : > { %v8191_v31 = vpop.f32.mrf.mxu1  ;;  %v1351_v30 = vadd.f32 %v8141_v22, %v9780_v0  ;;  %8442 = vmatprep.mubr.msk.f32.mxu0 %vm316_vm1, %v9584_v42  ;;  %v7342_v0 = vld [vmem:[%s8885_s30 + $0x1a2] sm:$0xff] }
 0x14a   : > { %v9972_v60 = vpop.f32.mrf.mxu0 }
 0x14b   : > { %11346 = vst [vmem:[#allocation18_spill] sm:$0xff] %v9972_v60  ;;  %v9974_v1 = vpop.f32.mrf.mxu1  ;;  %v9977_v35 = vadd.f32 %v8191_v31, %v1351_v30 }
 0x14c   : > { %11347 = vst [vmem:[#allocation19_spill] sm:$0xff] %v9974_v1  ;;  %v8144_v5 = vpop.f32.mrf.mxu0  ;;  %8443 = vmatmul.mubr.msk.f32.gmra.mxu0 %vm316_vm1, %v9598_v49 }
 0x14d   : > { %v8194_v9 = vpop.f32.mrf.mxu1  ;;  %v1353_v15 = vadd.f32 %v8144_v5, %v9796_v45  ;;  %8445 = vmatprep.mubr.msk.f32.mxu0 %vm316_vm1, %v7341_v52 }
 0x14e   : > { %v9984_v22 = vpop.f32.mrf.mxu0 }
 0x14f   : > { %11348 = vst [vmem:[#allocation20_spill] sm:$0xff] %v9984_v22  ;;  %v9986_v42 = vpop.f32.mrf.mxu1  ;;  %v9988_v56 = vadd.f32 %v8194_v9, %v1353_v15 }
 0x150   : > { %11349 = vst [vmem:[#allocation21_spill] sm:$0xff] %v9986_v42  ;;  %v8147_v43 = vpop.f32.mrf.mxu0  ;;  %8446 = vmatmul.mubr.msk.f32.gmra.mxu0 %vm316_vm1, %v7342_v0 }
 0x151   : > { %v8197_v31 = vpop.f32.mrf.mxu1  ;;  %v1355_v30 = vadd.f32 %v8147_v43, %v9808_v63 }
 0x152   : > { %v9992_v21 = vpop.f32.mrf.mxu0 }
 0x153   : > { %11350 = vst [vmem:[#allocation22_spill] sm:$0xff] %v9992_v21  ;;  %v9994_v49 = vpop.f32.mrf.mxu1  ;;  %v9996_v45 = vadd.f32 %v8197_v31, %v1355_v30 }
 0x154   : > { %11351 = vst [vmem:[#allocation23_spill] sm:$0xff] %v9994_v49  ;;  %v8202_v5 = vpop.f32.mrf.mxu0 }
 0x155   : > { %v8252_v52 = vpop.f32.mrf.mxu1  ;;  %v2106_v47 = vadd.f32 %v8202_v5, %v9826_v12 }
 0x156   : > { %v9999_v22 = vpop.f32.mrf.mxu0 }
 0x157   : > { %v10001_v9 = vpop.f32.mrf.mxu1  ;;  %v10003_v15 = vadd.f32 %v8252_v52, %v2106_v47 }
 0x158   : > { %v8205_v0 = vpop.f32.mrf.mxu0 }
 0x159   : > { %v10005_v42 = vpop.f32.mrf.mxu1  ;;  %v10008_v63 = vadd.f32 %v8205_v0, %v9838_v13 }
 0x15a   : > { %11352 = vst [vmem:[#allocation24_spill] sm:$0xff] %v10005_v42  ;;  %v10010_v43 = vpop.f32.mrf.mxu0 }
 0x15b   : > { %11353 = vst [vmem:[#allocation25_spill] sm:$0xff] %v10008_v63  ;;  %11354 = vst [vmem:[#allocation26_spill] sm:$0xff] %v10010_v43  ;;  %v10012_v31 = vpop.f32.mrf.mxu1 }
 0x15c   : > { %11355 = vst [vmem:[#allocation27_spill] sm:$0xff] %v10012_v31  ;;  %v8208_v30 = vpop.f32.mrf.mxu0 }
 0x15d   : > { %v8258_v49 = vpop.f32.mrf.mxu1  ;;  %v2110_v12 = vadd.f32 %v8208_v30, %v9850_v53 }
 0x15e   : > { %v10015_v5 = vpop.f32.mrf.mxu0 }
 0x15f   : > { %v10017_v21 = vpop.f32.mrf.mxu1  ;;  %v10019_v47 = vadd.f32 %v8258_v49, %v2110_v12 }
 0x160   : > { %v8211_v52 = vpop.f32.mrf.mxu0 }
 0x161   : > { %v8261_v1 = vpop.f32.mrf.mxu1  ;;  %v2112_v42 = vadd.f32 %v8211_v52, %v9862_v4  ;;  %v10040_v4 = vld [vmem:[%s11235_s3] sm:$0xff] }
 0x162   : > { %v10022_v13 = vpop.f32.mrf.mxu0  ;;  %11360 = vst [vmem:[#allocation34_spill] sm:$0xff] %v10040_v4  ;;  %8452 = vmatprep.mubr.msk.f32.mxu1 %vm3903_vm2, %v10040_v4  ;;  %8532 = vmatprep.mubr.msk.f32.mxu0 %vm3903_vm2, %v10040_v4 }
 0x163   : > { %v10024_v0 = vpop.f32.mrf.mxu1  ;;  %v10026_v63 = vadd.f32 %v8261_v1, %v2112_v42 }
 0x164   : > { %v8214_v31 = vpop.f32.mrf.mxu0 }
 0x165   : > { %v10028_v43 = vpop.f32.mrf.mxu1  ;;  %v10031_v53 = vadd.f32 %v8214_v31, %v9874_v55 }
 0x166   : > { %11356 = vst [vmem:[#allocation30_spill] sm:$0xff] %v10028_v43  ;;  %v10033_v30 = vpop.f32.mrf.mxu0 }
 0x167   : > { %11357 = vst [vmem:[#allocation31_spill] sm:$0xff] %v10031_v53  ;;  %11358 = vst [vmem:[#allocation32_spill] sm:$0xff] %v10033_v30  ;;  %v10035_v49 = vpop.f32.mrf.mxu1 }
 0x168   : > { %11359 = vst [vmem:[#allocation33_spill] sm:$0xff] %v10035_v49  ;;  %v8217_v1 = vpop.f32.mrf.mxu0 }
 0x169   : > { %v10046_v42 = vpop.f32.mrf.mxu1  ;;  %v10049_v55 = vadd.f32 %v8217_v1, %v9886_v6 }
 0x16a   : > { %11361 = vst [vmem:[#allocation35_spill] sm:$0xff] %v10046_v42  ;;  %v10051_v31 = vpop.f32.mrf.mxu0 }
 0x16b   : > { %11362 = vst [vmem:[#allocation36_spill] sm:$0xff] %v10049_v55  ;;  %11363 = vst [vmem:[#allocation37_spill] sm:$0xff] %v10051_v31  ;;  %v10053_v12 = vpop.f32.mrf.mxu1 }
 0x16c   : > { %11364 = vst [vmem:[#allocation38_spill] sm:$0xff] %v10053_v12  ;;  %v8220_v52 = vpop.f32.mrf.mxu0 }
 0x16d   : > { %v8270_v49 = vpop.f32.mrf.mxu1  ;;  %v2118_v43 = vadd.f32 %v8220_v52, %v9898_v19 }
 0x16e   : > { %v10056_v53 = vpop.f32.mrf.mxu0 }
 0x16f   : > { %v10058_v30 = vpop.f32.mrf.mxu1  ;;  %v10060_v3 = vadd.f32 %v8270_v49, %v2118_v43 }
 0x170   : > { %v8223_v4 = vpop.f32.mrf.mxu0 }
 0x171   : > { %v8273_v25 = vpop.f32.mrf.mxu1  ;;  %v2120_v42 = vadd.f32 %v8223_v4, %v9912_v7 }
 0x172   : > { %v10063_v6 = vpop.f32.mrf.mxu0 }
 0x173   : > { %v10065_v1 = vpop.f32.mrf.mxu1  ;;  %v10067_v55 = vadd.f32 %v8273_v25, %v2120_v42 }
 0x174   : > { %v8226_v12 = vpop.f32.mrf.mxu0 }
 0x175   : > { %v8276_v31 = vpop.f32.mrf.mxu1  ;;  %v2122_v19 = vadd.f32 %v8226_v12, %v9923_v61 }
 0x176   : > { %v10070_v52 = vpop.f32.mrf.mxu0 }
 0x177   : > { %v10072_v60 = vpop.f32.mrf.mxu1  ;;  %v10074_v43 = vadd.f32 %v8276_v31, %v2122_v19 }
 0x178   : > { %v8229_v49 = vpop.f32.mrf.mxu0 }
 0x179   : > { %v8279_v38 = vpop.f32.mrf.mxu1  ;;  %v2124_v7 = vadd.f32 %v8229_v49, %v9934_v34 }
 0x17a   : > { %v10077_v4 = vpop.f32.mrf.mxu0 }
 0x17b   : > { %v10079_v48 = vpop.f32.mrf.mxu1  ;;  %v10081_v25 = vadd.f32 %v8279_v38, %v2124_v7 }
 0x17c   : > { %v8232_v42 = vpop.f32.mrf.mxu0 }
 0x17d   : > { %11365 = vst [vmem:[#allocation39_spill] sm:$0xff] %v10081_v25  ;;  %v8282_v29 = vpop.f32.mrf.mxu1  ;;  %v2126_v61 = vadd.f32 %v8232_v42, %v9945_v11 }
 0x17e   : > { %v10084_v12 = vpop.f32.mrf.mxu0 }
 0x17f   : > { %11366 = vst [vmem:[#allocation40_spill] sm:$0xff] %v10084_v12  ;;  %v10086_v51 = vpop.f32.mrf.mxu1  ;;  %v10088_v31 = vadd.f32 %v8282_v29, %v2126_v61 }
 0x180   : > { %v8235_v19 = vpop.f32.mrf.mxu0 }
 0x181   : > { %11367 = vst [vmem:[#allocation41_spill] sm:$0xff] %v10088_v31  ;;  %v8285_v62 = vpop.f32.mrf.mxu1  ;;  %v2128_v34 = vadd.f32 %v8235_v19, %v9956_v26 }
 0x182   : > { %v10091_v49 = vpop.f32.mrf.mxu0 }
 0x183   : > { %11368 = vst [vmem:[#allocation42_spill] sm:$0xff] %v10091_v49  ;;  %v10093_v44 = vpop.f32.mrf.mxu1  ;;  %v10095_v38 = vadd.f32 %v8285_v62, %v2128_v34 }
 0x184   : > { %v8238_v7 = vpop.f32.mrf.mxu0 }
 0x185   : > { %11369 = vst [vmem:[#allocation43_spill] sm:$0xff] %v10095_v38  ;;  %v8288_v25 = vpop.f32.mrf.mxu1  ;;  %v2130_v11 = vadd.f32 %v8238_v7, %v9966_v32 }
 0x186   : > { %v10098_v42 = vpop.f32.mrf.mxu0 }
 0x187   : > { %11370 = vst [vmem:[#allocation44_spill] sm:$0xff] %v10098_v42  ;;  %v10100_v12 = vpop.f32.mrf.mxu1  ;;  %v10102_v29 = vadd.f32 %v8288_v25, %v2130_v11  ;;  %v1715_v25 = vadd.f32 %v9821_v8, %v9824_v33 }
 0x188   : > { %v8241_v61 = vpop.f32.mrf.mxu0 }
 0x189   : > { %11371 = vst [vmem:[#allocation45_spill] sm:$0xff] %v10102_v29  ;;  %v8291_v31 = vpop.f32.mrf.mxu1  ;;  %v2132_v26 = vadd.f32 %v8241_v61, %v9977_v35  ;;  %v2105_v29 = vadd.f32 %v9999_v22, %v1715_v25  ;;  %v1719_v22 = vadd.f32 %v9845_v16, %v9848_v17 }
 0x18a   : > { %v10105_v19 = vpop.f32.mrf.mxu0 }
 0x18b   : > { %v10107_v49 = vpop.f32.mrf.mxu1  ;;  %v10109_v62 = vadd.f32 %v8291_v31, %v2132_v26 }
 0x18c   : > { %v8244_v34 = vpop.f32.mrf.mxu0 }
 0x18d   : > { %11372 = vst [vmem:[#allocation46_spill] sm:$0xff] %v10109_v62  ;;  %v8294_v38 = vpop.f32.mrf.mxu1  ;;  %v2134_v32 = vadd.f32 %v8244_v34, %v9988_v56 }
 0x18e   : > { %v10112_v7 = vpop.f32.mrf.mxu0 }
 0x18f   : > { %11373 = vst [vmem:[#allocation47_spill] sm:$0xff] %v10112_v7  ;;  %v10114_v42 = vpop.f32.mrf.mxu1  ;;  %v10118_v11 = vadd.f32 %v8294_v38, %v2134_v32 }
 0x190   : > { %11374 = vst [vmem:[#allocation48_spill] sm:$0xff] %v10114_v42  ;;  %v8247_v35 = vpop.f32.mrf.mxu0  ;;  %v2495_v42 = vadd.f32 %v10001_v9, %v2105_v29  ;;  %v1721_v9 = vadd.f32 %v9857_v18, %v9860_v10 }
 0x191   : > { %v8297_v61 = vpop.f32.mrf.mxu1  ;;  %v2136_v31 = vadd.f32 %v8247_v35, %v9996_v45  ;;  %v2109_v35 = vadd.f32 %v10015_v5, %v1719_v22 }
 0x192   : > { %v10122_v26 = vpop.f32.mrf.mxu0  ;;  %v2111_v16 = vadd.f32 %v10022_v13, %v1721_v9 }
 0x193   : > { %v10124_v62 = vpop.f32.mrf.mxu1  ;;  %v10126_v56 = vadd.f32 %v8297_v61, %v2136_v31  ;;  %v2499_v31 = vadd.f32 %v10017_v21, %v2109_v35  ;;  %v1727_v35 = vadd.f32 %v9893_v20, %v9896_v57  ;;  %v898_v20 = vadd.f32 %v9732_v41, %v9730_v50 }
 0x194   : > { %v8302_v34 = vpop.f32.mrf.mxu0  ;;  %v2501_v22 = vadd.f32 %v10024_v0, %v2111_v16  ;;  %v1729_v16 = vadd.f32 %v9906_v24, %v9910_v23  ;;  %v908_v50 = vadd.f32 %v9746_v37, %v9744_v54  ;;  %v918_v54 = vadd.f32 %v9760_v14, %v9758_v58 }
 0x195   : > { %v10128_v7 = vpop.f32.mrf.mxu1  ;;  %v10132_v8 = vadd.f32 %v8302_v34, %v10003_v15  ;;  %v2117_v0 = vadd.f32 %v10056_v53, %v1727_v35  ;;  %v1342_v24 = vadd.f32 %v9929_v59, %v898_v20 }
 0x196   : > { %v2727_v33 = vpop.f32.mrf.mxu0  ;;  %v1344_v59 = vadd.f32 %v9940_v40, %v908_v50  ;;  %v11382_v50 = vld [vmem:[#allocation16_spill] sm:$0xff] }
 0x197   : > { %v10134_v38 = vpop.f32.mrf.mxu1  ;;  %v10138_v45 = vadd.f32 %v2727_v33, %v2495_v42  ;;  %v2507_v57 = vadd.f32 %v10058_v30, %v2117_v0 }
 0x198   : > { %v10140_v32 = vpop.f32.mrf.mxu0 }
 0x199   : > { %v10142_v25 = vpop.f32.mrf.mxu1 }
 0x19a   : > { %v10145_v61 = vpop.f32.mrf.mxu0 }
 0x19b   : > { %v10149_v15 = vpop.f32.mrf.mxu1 }
 0x19c   : > { %11375 = vst [vmem:[#allocation49_spill] sm:$0xff] %v10149_v15  ;;  %v8308_v29 = vpop.f32.mrf.mxu0 }
 0x19d   : > { %v10154_v17 = vadd.f32 %v8308_v29, %v10019_v47  ;;  %v10158_v33 = vpop.f32.mrf.mxu1 }
 0x19e   : > { %v2747_v42 = vpop.f32.mrf.mxu0 }
 0x19f   : > { %v10156_v34 = vadd.f32 %v2747_v42, %v2499_v31  ;;  %v10164_v15 = vpop.f32.mrf.mxu1 }
 0x1a0   : > { %v8311_v5 = vpop.f32.mrf.mxu0 }
 0x1a1   : > { %v10162_v18 = vadd.f32 %v8311_v5, %v10026_v63  ;;  %v10174_v9 = vpop.f32.mrf.mxu1  ;;  %v888_v63 = vadd.f32 %v9718_v2, %v9716_v46 }
 0x1a2   : > { %v2757_v10 = vpop.f32.mrf.mxu0 }
 0x1a3   : > { %v10166_v21 = vadd.f32 %v2757_v10, %v2501_v22  ;;  %v1340_v42 = vadd.f32 %v9918_v28, %v888_v63  ;;  %v10186_v5 = vpop.f32.mrf.mxu1  ;;  %v2119_v10 = vadd.f32 %v10063_v6, %v1729_v16 }
 0x1a4   : > { %v10168_v13 = vpop.f32.mrf.mxu0 }
 0x1a5   : > { %v1731_v53 = vadd.f32 %v9920_v27, %v1340_v42  ;;  %v10197_v23 = vpop.f32.mrf.mxu1  ;;  %v2509_v41 = vadd.f32 %v10065_v1, %v2119_v10  ;;  %v1733_v27 = vadd.f32 %v9931_v36, %v1342_v24  ;;  %v1735_v36 = vadd.f32 %v9942_v39, %v1344_v59  ;;  %v11376_v42 = vld [vmem:[#allocation14_spill] sm:$0xff]  ;;  %v11377_v10 = vld [vmem:[#allocation28_spill] sm:$0xff] }
 0x1a6   : > { %v10170_v47 = vpop.f32.mrf.mxu0  ;;  %v1346_v40 = vadd.f32 %v11376_v42, %v918_v54  ;;  %v11383_v59 = vld [vmem:[#allocation2_spill] sm:$0xff] }
 0x1a7   : > { %v2121_v30 = vadd.f32 %v10070_v52, %v1731_v53  ;;  %v10210_v63 = vpop.f32.mrf.mxu1  ;;  %v2123_v1 = vadd.f32 %v10077_v4, %v1733_v27  ;;  %v11380_v53 = vld [vmem:[#allocation39_spill] sm:$0xff] }
 0x1a8   : > { %v10176_v29 = vpop.f32.mrf.mxu0 }
 0x1a9   : > { %v2511_v37 = vadd.f32 %v10072_v60, %v2121_v30  ;;  %v2513_v14 = vadd.f32 %v10079_v48, %v2123_v1  ;;  %v11379_v60 = vld [vmem:[#allocation40_spill] sm:$0xff] }
 0x1aa   : > { %v10181_v31 = vpop.f32.mrf.mxu0  ;;  %v2125_v4 = vadd.f32 %v11379_v60, %v1735_v36 }
 0x1ac   : > { %v8320_v22 = vpop.f32.mrf.mxu0  ;;  %v2515_v48 = vadd.f32 %v10086_v51, %v2125_v4  ;;  %v11391_v4 = vld [vmem:[#allocation44_spill] sm:$0xff] }
 0x1ad   : > { %v10193_v46 = vadd.f32 %v8320_v22, %v10060_v3  ;;  %v10223_v22 = vpop.f32.mrf.mxu1 }
 0x1ae   : > { %v2787_v2 = vpop.f32.mrf.mxu0 }
 0x1af   : > { %v10199_v28 = vadd.f32 %v2787_v2, %v2507_v57  ;;  %v11378_v2 = vld [vmem:[#allocation29_spill] sm:$0xff]  ;;  %v10236_v30 = vpop.f32.mrf.mxu1 }
 0x1b0   : > { %v8323_v35 = vpop.f32.mrf.mxu0  ;;  %v928_v58 = vadd.f32 %v11378_v2, %v11377_v10  ;;  %v11388_v10 = vld [vmem:[#allocation18_spill] sm:$0xff] }
 0x1b1   : > { %v10206_v3 = vadd.f32 %v8323_v35, %v10067_v55  ;;  %v11381_v35 = vld [vmem:[#allocation15_spill] sm:$0xff] }
 0x1b2   : > { %v2797_v6 = vpop.f32.mrf.mxu0  ;;  %v1737_v39 = vadd.f32 %v11381_v35, %v1346_v40 }
 0x1b3   : > { %v10212_v0 = vadd.f32 %v2797_v6, %v2509_v41  ;;  %v1348_v41 = vadd.f32 %v11382_v50, %v928_v58  ;;  %v10249_v58 = vpop.f32.mrf.mxu1  ;;  %v11392_v50 = vld [vmem:[#allocation43_spill] sm:$0xff] }
 0x1b4   : > { %v8326_v16 = vpop.f32.mrf.mxu0 }
 0x1b5   : > { %v10219_v55 = vadd.f32 %v8326_v16, %v10074_v43  ;;  %v11384_v16 = vld [vmem:[#allocation3_spill] sm:$0xff] }
 0x1b6   : > { %v2807_v52 = vpop.f32.mrf.mxu0  ;;  %v938_v54 = vadd.f32 %v11384_v16, %v11383_v59  ;;  %v11393_v16 = vld [vmem:[#allocation19_spill] sm:$0xff] }
 0x1b7   : > { %v10225_v20 = vadd.f32 %v2807_v52, %v2511_v37  ;;  %v11385_v37 = vld [vmem:[#allocation42_spill] sm:$0xff]  ;;  %v11386_v52 = vld [vmem:[#allocation41_spill] sm:$0xff] }
 0x1b8   : > { %v8329_v57 = vpop.f32.mrf.mxu0  ;;  %v2127_v1 = vadd.f32 %v11385_v37, %v1737_v39  ;;  %v1350_v2 = vadd.f32 %v11388_v10, %v938_v54  ;;  %v11394_v37 = vld [vmem:[#allocation20_spill] sm:$0xff]  ;;  %v11396_v10 = vld [vmem:[#allocation7_spill] sm:$0xff] }
 0x1b9   : > { %v10232_v43 = vadd.f32 %v8329_v57, %v11380_v53  ;;  %v11387_v57 = vld [vmem:[#allocation17_spill] sm:$0xff]  ;;  %v11389_v53 = vld [vmem:[#allocation4_spill] sm:$0xff] }
 0x1ba   : > { %v2817_v24 = vpop.f32.mrf.mxu0  ;;  %v1739_v40 = vadd.f32 %v11387_v57, %v1348_v41  ;;  %v2517_v51 = vadd.f32 %v10093_v44, %v2127_v1  ;;  %v1741_v41 = vadd.f32 %v11393_v16, %v1350_v2  ;;  %v11395_v57 = vld [vmem:[#allocation6_spill] sm:$0xff] }
 0x1bb   : > { %v10238_v6 = vadd.f32 %v2817_v24, %v2513_v14  ;;  %v11390_v24 = vld [vmem:[#allocation5_spill] sm:$0xff] }
 0x1bc   : > { %v8332_v27 = vpop.f32.mrf.mxu0  ;;  %v948_v35 = vadd.f32 %v11390_v24, %v11389_v53  ;;  %v2129_v39 = vadd.f32 %v11391_v4, %v1739_v40  ;;  %v958_v53 = vadd.f32 %v11396_v10, %v11395_v57  ;;  %v2131_v1 = vadd.f32 %v10105_v19, %v1741_v41  ;;  %v11397_v40 = vld [vmem:[#allocation45_spill] sm:$0xff]  ;;  %v11402_v57 = vld [vmem:[#allocation47_spill] sm:$0xff] }
 0x1bd   : > { %v10245_v36 = vadd.f32 %v8332_v27, %v11386_v52  ;;  %v10262_v52 = vpop.f32.mrf.mxu1  ;;  %v11399_v4 = vld [vmem:[#allocation21_spill] sm:$0xff]  ;;  %v11405_v41 = vld [vmem:[#allocation23_spill] sm:$0xff] }
 0x1be   : > { %v2827_v42 = vpop.f32.mrf.mxu0  ;;  %v1352_v54 = vadd.f32 %v11394_v37, %v948_v35  ;;  %v2519_v44 = vadd.f32 %v10100_v12, %v2129_v39  ;;  %v2521_v37 = vadd.f32 %v10107_v49, %v2131_v1  ;;  %v11403_v12 = vld [vmem:[#allocation46_spill] sm:$0xff] }
 0x1bf   : > { %v10251_v14 = vadd.f32 %v2827_v42, %v2515_v48  ;;  %v10275_v16 = vpop.f32.mrf.mxu1 }
 0x1c0   : > { %v8335_v60 = vpop.f32.mrf.mxu0  ;;  %v1743_v2 = vadd.f32 %v11399_v4, %v1352_v54  ;;  %v11408_v4 = vld [vmem:[#allocation8_spill] sm:$0xff] }
 0x1c1   : > { %v10258_v27 = vadd.f32 %v8335_v60, %v11392_v50  ;;  %v11400_v50 = vld [vmem:[#allocation22_spill] sm:$0xff] }
 0x1c2   : > { %v2837_v59 = vpop.f32.mrf.mxu0  ;;  %v1354_v35 = vadd.f32 %v11400_v50, %v958_v53  ;;  %v2133_v10 = vadd.f32 %v11402_v57, %v1743_v2  ;;  %v11407_v53 = vld [vmem:[#allocation9_spill] sm:$0xff]  ;;  %v11411_v2 = vld [vmem:[#allocation11_spill] sm:$0xff] }
 0x1c3   : > { %v10264_v48 = vadd.f32 %v2837_v59, %v2517_v51  ;;  %v1717_v50 = vadd.f32 %v11408_v4, %v11407_v53  ;;  %v11416_v53 = vld [vmem:[#allocation32_spill] sm:$0xff] }
 0x1c4   : > { %v8338_v42 = vpop.f32.mrf.mxu0 }
 0x1c5   : > { %v10271_v60 = vadd.f32 %v8338_v42, %v11397_v40  ;;  %v1745_v42 = vadd.f32 %v11405_v41, %v1354_v35  ;;  %v10285_v40 = vpop.f32.mrf.mxu1  ;;  %v11414_v35 = vld [vmem:[#allocation12_spill] sm:$0xff] }
 0x1c6   : > { %v2847_v24 = vpop.f32.mrf.mxu0 }
 0x1c7   : > { %11398 = vst [vmem:[#allocation14_spill] sm:$0xff] %v10271_v60  ;;  %v10277_v51 = vadd.f32 %v2847_v24, %v2519_v44  ;;  %v11409_v24 = vld [vmem:[#allocation48_spill] sm:$0xff]  ;;  %v2135_v49 = vadd.f32 %v10122_v26, %v1745_v42  ;;  %v11418_v42 = vld [vmem:[#allocation25_spill] sm:$0xff] }
 0x1c8   : > { %v8341_v59 = vpop.f32.mrf.mxu0 }
 0x1c9   : > { %11401 = vst [vmem:[#allocation28_spill] sm:$0xff] %v10277_v51  ;;  %v10282_v39 = vadd.f32 %v8341_v59, %v11403_v12  ;;  %v2523_v51 = vadd.f32 %v11409_v24, %v2133_v10  ;;  %v11412_v59 = vld [vmem:[#allocation10_spill] sm:$0xff]  ;;  %v11413_v12 = vld [vmem:[#allocation13_spill] sm:$0xff] }
 0x1ca   : > { %v2857_v19 = vpop.f32.mrf.mxu0  ;;  %v1723_v57 = vadd.f32 %v11412_v59, %v11411_v2  ;;  %v1725_v41 = vadd.f32 %v11414_v35, %v11413_v12  ;;  %v11417_v10 = vld [vmem:[#allocation37_spill] sm:$0xff]  ;;  %v11420_v59 = vld [vmem:[#allocation27_spill] sm:$0xff]  ;;  %v11422_v35 = vld [vmem:[#allocation30_spill] sm:$0xff] }
 0x1cb   : > { %11404 = vst [vmem:[#allocation29_spill] sm:$0xff] %v10282_v39  ;;  %v10287_v54 = vadd.f32 %v2857_v19, %v2521_v37  ;;  %v11415_v39 = vld [vmem:[#allocation26_spill] sm:$0xff] }
 0x1cc   : > { %v8344_v44 = vpop.f32.mrf.mxu0  ;;  %v2107_v37 = vadd.f32 %v11415_v39, %v1717_v50  ;;  %v2113_v4 = vadd.f32 %v11416_v53, %v1723_v57  ;;  %v2115_v24 = vadd.f32 %v11417_v10, %v1725_v41  ;;  %v11421_v50 = vld [vmem:[#allocation31_spill] sm:$0xff]  ;;  %v3277_v57 = vadd.f32 %v10128_v7, %v10132_v8  ;;  %v11423_v10 = vld [vmem:[#allocation33_spill] sm:$0xff] }
 0x1cd   : > { %11406 = vst [vmem:[#allocation40_spill] sm:$0xff] %v10287_v54  ;;  %v10294_v1 = vadd.f32 %v8344_v44, %v10118_v11  ;;  %v8376_v54 = vpop.f32.mrf.mxu1  ;;  %v11419_v11 = vld [vmem:[#allocation24_spill] sm:$0xff]  ;;  %v3276_v7 = vadd.f32 %v10134_v38, %v10138_v45  ;;  %v3281_v38 = vadd.f32 %v10158_v33, %v10154_v17  ;;  %v3280_v45 = vadd.f32 %v10164_v15, %v10156_v34 }
 0x1ce   : > { %v2867_v19 = vpop.f32.mrf.mxu0  ;;  %v2498_v44 = vadd.f32 %v11419_v11, %v11418_v42  ;;  %v2497_v12 = vadd.f32 %v11420_v59, %v2107_v37  ;;  %v2503_v42 = vadd.f32 %v11423_v10, %v2113_v4  ;;  %v11427_v10 = vld [vmem:[#allocation49_spill] sm:$0xff] }
 0x1cf   : > { %11410 = vst [vmem:[#allocation39_spill] sm:$0xff] %v10294_v1  ;;  %v10301_v60 = vadd.f32 %v2867_v19, %v2523_v51  ;;  %v2525_v1 = vadd.f32 %v10124_v62, %v2135_v49  ;;  %v2504_v51 = vadd.f32 %v11422_v35, %v11421_v50  ;;  %v3197_v19 = vpop.f32.mrf.mxu1  ;;  %v11424_v62 = vld [vmem:[#allocation36_spill] sm:$0xff]  ;;  %v11425_v49 = vld [vmem:[#allocation35_spill] sm:$0xff]  ;;  %v10327_v50 = vld [vmem:[%s11234_s2] ss:$0 sm:$0xff] }
 0x1d0   : > { %v8347_v26 = vpop.f32.mrf.mxu0  ;;  %v2889_v41 = vadd.f32 %v10140_v32, %v2498_v44  ;;  %v2888_v37 = vadd.f32 %v10145_v61, %v2497_v12 }
 0x1d1   : > { %v10309_v2 = vadd.f32 %v8347_v26, %v10126_v56  ;;  %v2506_v56 = vadd.f32 %v11425_v49, %v11424_v62  ;;  %v11426_v26 = vld [vmem:[#allocation38_spill] sm:$0xff]  ;;  %v2895_v8 = vadd.f32 %v10168_v13, %v2504_v51  ;;  %v8379_v12 = vpop.f32.mrf.mxu1  ;;  %v3283_v13 = vadd.f32 %v10174_v9, %v10162_v18 }
 0x1d2   : > { %v2877_v39 = vpop.f32.mrf.mxu0  ;;  %v2505_v11 = vadd.f32 %v11426_v26, %v2115_v24  ;;  %v3279_v61 = vadd.f32 %v10142_v25, %v2889_v41  ;;  %v3278_v62 = vadd.f32 %v11427_v10, %v2888_v37  ;;  %v10359_v18 = vadd.f32 %v10249_v58, %v10193_v46 }
 0x1d3   : > { %v10317_v53 = vadd.f32 %v2877_v39, %v2525_v1  ;;  %v2894_v1 = vadd.f32 %v10170_v47, %v2503_v42  ;;  %v2897_v4 = vadd.f32 %v10176_v29, %v2506_v56  ;;  %v3282_v29 = vadd.f32 %v10186_v5, %v10166_v21  ;;  %v3207_v9 = vpop.f32.mrf.mxu1 }
 0x1d4   : > { %v8402_v59 = vpop.f32.mrf.mxu0  ;;  %v2896_v24 = vadd.f32 %v10181_v31, %v2505_v11  ;;  %v3285_v25 = vadd.f32 %v10197_v23, %v2895_v8  ;;  %v10363_v21 = vadd.f32 %v10262_v52, %v10199_v28  ;;  %v10378_v28 = vadd.f32 %v3197_v19, %v10225_v20 }
 0x1d5   : > { %v3667_v32 = vadd.f32 %v8402_v59, %v3277_v57  ;;  %v10349_v57 = vadd.f32 %v10210_v63, %v2894_v1  ;;  %v10352_v17 = vadd.f32 %v10223_v22, %v2897_v4  ;;  %v10368_v63 = vadd.f32 %v10275_v16, %v10206_v3 }
 0x1d6   : > { %v3507_v44 = vpop.f32.mrf.mxu0  ;;  %v10355_v15 = vadd.f32 %v10236_v30, %v2896_v24  ;;  %v10372_v22 = vadd.f32 %v10285_v40, %v10212_v0  ;;  %v10375_v30 = vadd.f32 %v8376_v54, %v10219_v55  ;;  %v10382_v49 = vadd.f32 %v8379_v12, %v10232_v43  ;;  %v8382_v55 = vpop.f32.mrf.mxu1 }
 0x1d7   : > { %v3706_v39 = vadd.f32 %v10327_v50, %v3667_v32  ;;  %v3666_v35 = vadd.f32 %v3507_v44, %v3276_v7  ;;  %v10385_v3 = vadd.f32 %v3207_v9, %v10238_v6 }
 0x1d8   : > { %v8405_v47 = vpop.f32.mrf.mxu0  ;;  %v3217_v12 = vpop.f32.mrf.mxu1 }
 0x1d9   : > { %v3705_v31 = vadd.f32 %v10327_v50, %v3666_v35  ;;  %v3669_v51 = vadd.f32 %v8405_v47, %v3279_v61  ;;  %v3738_v34 = vmax.f32 %v3706_v39, 0.0 }
 0x1da   : > { %v3517_v33 = vpop.f32.mrf.mxu0 }
 0x1db   : > { %v3708_v5 = vadd.f32 %v10327_v50, %v3669_v51  ;;  %v3668_v23 = vadd.f32 %v3517_v33, %v3278_v62  ;;  %v3737_v46 = vmax.f32 %v3705_v31, 0.0  ;;  %v3774_v16 = vmul.f32 0.75, %v3738_v34 }
 0x1dc   : > { %v8408_v58 = vpop.f32.mrf.mxu0  ;;  %v3780_v40 = vmul.f32 0.25, %v3738_v34 }
 0x1dd   : > { %v3740_v52 = vmax.f32 %v3708_v5, 0.0  ;;  %v3707_v41 = vadd.f32 %v10327_v50, %v3668_v23  ;;  %v3671_v42 = vadd.f32 %v8408_v58, %v3281_v38  ;;  %v3773_v37 = vmul.f32 0.75, %v3737_v46  ;;  %v10395_v5 = vld [vmem:[%s11235_s3 + $0x8] sm:$0xff] }
 0x1de   : > { %v3527_v0 = vpop.f32.mrf.mxu0  ;;  %v3779_v7 = vmul.f32 0.25, %v3737_v46 }
 0x1df   : > { %v3739_v54 = vmax.f32 %v3707_v41, 0.0  ;;  %v3710_v56 = vadd.f32 %v10327_v50, %v3671_v42  ;;  %v3670_v26 = vadd.f32 %v3527_v0, %v3280_v45  ;;  %v3770_v20 = vmul.f32 0.0, %v3740_v52 }
 0x1e0   : > { %v8411_v19 = vpop.f32.mrf.mxu0  ;;  %v3776_v11 = vmul.f32 0.25, %v3740_v52  ;;  %v3782_v59 = vmul.f32 0.75, %v3740_v52 }
 0x1e1   : > { %v3742_v8 = vmax.f32 %v3710_v56, 0.0  ;;  %v3709_v43 = vadd.f32 %v10327_v50, %v3670_v26  ;;  %v3673_v32 = vadd.f32 %v8411_v19, %v3283_v13  ;;  %v3772_v6 = vadd.f32 %v3770_v20, %v3738_v34 }
 0x1e2   : > { %v3537_v1 = vpop.f32.mrf.mxu0  ;;  %v3769_v4 = vmul.f32 0.0, %v3739_v54  ;;  %v3778_v24 = vadd.f32 %v3776_v11, %v3774_v16  ;;  %v3775_v44 = vmul.f32 0.25, %v3739_v54  ;;  %v10389_v61 = vadd.f32 %v3782_v59, %v3780_v40 }
 0x1e3   : > { %v3786_v39 = vmul.f32 0.25, %v3742_v8  ;;  %v3790_v35 = vmul.f32 0.75, %v3742_v8  ;;  %v3741_v10 = vmax.f32 %v3709_v43, 0.0  ;;  %v3712_v62 = vadd.f32 %v10327_v50, %v3673_v32  ;;  %8448 = vmatprep.subr.mxu1 %v3772_v6 }
 0x1e4   : > { %v3672_v38 = vadd.f32 %v3537_v1, %v3282_v29  ;;  %v8414_v45 = vpop.f32.mrf.mxu0  ;;  %8449 = vmatpush3.msra.mxu1 %v3772_v6  ;;  %v3771_v47 = vadd.f32 %v3769_v4, %v3737_v46  ;;  %v3777_v31 = vadd.f32 %v3775_v44, %v3773_v37  ;;  %v3781_v13 = vmul.f32 0.75, %v3739_v54  ;;  %v10401_v29 = vld [vmem:[%s11235_s3 + $0x10] sm:$0xff] }
 0x1e5   : > { %v3785_v51 = vmul.f32 0.25, %v3741_v10  ;;  %v3789_v34 = vmul.f32 0.75, %v3741_v10  ;;  %v3744_v33 = vmax.f32 %v3712_v62, 0.0  ;;  %v3675_v9 = vadd.f32 %v8414_v45, %v3285_v25  ;;  %v8385_v25 = vpop.f32.mrf.mxu1  ;;  %v11428_v45 = vld [vmem:[#allocation34_spill] sm:$0xff] }
 0x1e6   : > { %v3711_v23 = vadd.f32 %v10327_v50, %v3672_v38  ;;  %8450 = vmatprep.subr.mxu1 %v3771_v47  ;;  %v3547_v58 = vpop.f32.mrf.mxu0  ;;  %v10403_v46 = vadd.f32 %v3781_v13, %v3779_v7  ;;  %v10405_v52 = vadd.f32 %v3786_v39, %v3782_v59  ;;  %v10407_v41 = vadd.f32 %v3790_v35, %v3776_v11 }
 0x1e7   : > { %v3794_v42 = vmul.f32 0.25, %v3744_v33  ;;  %v3798_v0 = vmul.f32 0.75, %v3744_v33  ;;  %v3714_v16 = vadd.f32 %v10327_v50, %v3675_v9  ;;  %v3674_v40 = vadd.f32 %v3547_v58, %v10349_v57  ;;  %8451 = vmatpush3.msra.mxu1 %v3771_v47 }
 0x1e8   : > { %v10412_v54 = vadd.f32 %v8382_v55, %v10245_v36  ;;  %v3743_v56 = vmax.f32 %v3711_v23, 0.0  ;;  %8453 = vmatmul.mubr.msk.f32.vlgmr.msra.gmra.mxu1 %vm3903_vm2, %v10395_v5  ;;  %8458 = vmatprep.subr.mxu1 %v3778_v24  ;;  %v8417_v26 = vpop.f32.mrf.mxu0  ;;  %v10416_v20 = vadd.f32 %v3785_v51, %v3781_v13  ;;  %v10418_v19 = vadd.f32 %v3789_v34, %v3775_v44  ;;  %v10427_v36 = vld [vmem:[%s11235_s3 + $0x18] sm:$0xff] }
 0x1e9   : > { %v3746_v11 = vmax.f32 %v3714_v16, 0.0  ;;  %v3713_v37 = vadd.f32 %v10327_v50, %v3674_v40  ;;  %v3677_v59 = vadd.f32 %v8417_v26, %v10352_v17  ;;  %8459 = vmatpush3.msra.mxu1 %v3778_v24  ;;  %8455 = vmatprep.mubr.msk.f32.mxu1 %vm3903_vm2, %v10401_v29  ;;  %v10429_v57 = vadd.f32 %v3794_v42, %v3790_v35  ;;  %v3227_v17 = vpop.f32.mrf.mxu1 }
 0x1ea   : > { %v10432_v55 = vadd.f32 %v3217_v12, %v10251_v14  ;;  %v3793_v7 = vmul.f32 0.25, %v3743_v56  ;;  %v3797_v8 = vmul.f32 0.75, %v3743_v56  ;;  %8460 = vmatprep.subr.mxu1 %v3777_v31  ;;  %v3557_v43 = vpop.f32.mrf.mxu0  ;;  %v10434_v32 = vadd.f32 %v3798_v0, %v3786_v39 }
 0x1eb   : > { %v3802_v6 = vmul.f32 0.25, %v3746_v11  ;;  %v3806_v1 = vmul.f32 0.75, %v3746_v11  ;;  %v3745_v4 = vmax.f32 %v3713_v37, 0.0  ;;  %v3716_v24 = vadd.f32 %v10327_v50, %v3677_v59  ;;  %8461 = vmatpush3.msra.mxu1 %v3777_v31 }
 0x1ec   : > { %v3676_v44 = vadd.f32 %v3557_v43, %v10355_v15  ;;  %8456 = vmatmul.mubr.msk.f32.gmra.mxu1 %vm3903_vm2, %v10427_v36  ;;  %8468 = vmatprep.subr.mxu1 %v10389_v61  ;;  %v8420_v14 = vpop.f32.mrf.mxu0  ;;  %v10441_v12 = vadd.f32 %v3793_v7, %v3789_v34  ;;  %v10443_v35 = vadd.f32 %v3797_v8, %v3785_v51  ;;  %v8388_v34 = vpop.f32.mrf.mxu1 }
 0x1ed   : > { %v3801_v39 = vmul.f32 0.25, %v3745_v4  ;;  %v3805_v10 = vmul.f32 0.75, %v3745_v4  ;;  %v3748_v62 = vmax.f32 %v3716_v24, 0.0  ;;  %v3679_v38 = vadd.f32 %v8420_v14, %v10359_v18  ;;  %8462 = vmatprep.mubr.msk.f32.mxu1 %vm3903_vm2, %v11428_v45 }
 0x1ee   : > { %v10449_v15 = vadd.f32 %v8385_v25, %v10258_v27  ;;  %v3715_v47 = vadd.f32 %v10327_v50, %v3676_v44  ;;  %v3567_v31 = vpop.f32.mrf.mxu0  ;;  %v3808_v13 = vadd.f32 %v3806_v1, %v3794_v42  ;;  %v10452_v33 = vadd.f32 %v3802_v6, %v3798_v0 }
 0x1ef   : > { %v3810_v51 = vmul.f32 0.25, %v3748_v62  ;;  %v3814_v9 = vmul.f32 0.75, %v3748_v62  ;;  %v3718_v23 = vadd.f32 %v10327_v50, %v3679_v38  ;;  %v3678_v58 = vadd.f32 %v3567_v31, %v10363_v21 }
 0x1f0   : > { %v10457_v18 = vadd.f32 %v3227_v17, %v10264_v48  ;;  %v3747_v16 = vmax.f32 %v3715_v47, 0.0  ;;  %8463 = vmatmul.mubr.msk.f32.vlgmr.msra.gmra.mxu1 %vm3903_vm2, %v10395_v5  ;;  %8528 = vmatprep.subr.mxu0 %v3808_v13  ;;  %v8423_v27 = vpop.f32.mrf.mxu0  ;;  %v3807_v25 = vadd.f32 %v3805_v10, %v3793_v7  ;;  %v10461_v42 = vadd.f32 %v3801_v39, %v3797_v8  ;;  %v11429_v48 = vld [vmem:[#allocation14_spill] sm:$0xff]  ;;  %v3237_v8 = vpop.f32.mrf.mxu1 }
 0x1f1   : > { %v3750_v0 = vmax.f32 %v3718_v23, 0.0  ;;  %v3717_v40 = vadd.f32 %v10327_v50, %v3678_v58  ;;  %8469 = vmatpush3.msra.mxu1 %v10389_v61  ;;  %v3681_v56 = vadd.f32 %v8423_v27, %v10368_v63  ;;  %8529 = vmatpush3.msra.mxu0 %v3808_v13  ;;  %v3816_v21 = vadd.f32 %v3814_v9, %v3802_v6 }
 0x1f2   : > { %v10467_v26 = vadd.f32 %v8388_v34, %v11429_v48  ;;  %v3809_v11 = vmul.f32 0.25, %v3747_v16  ;;  %v3813_v37 = vmul.f32 0.75, %v3747_v16  ;;  %8470 = vmatprep.subr.mxu1 %v10403_v46  ;;  %8530 = vmatprep.subr.mxu0 %v3807_v25  ;;  %v3577_v59 = vpop.f32.mrf.mxu0  ;;  %v10470_v7 = vadd.f32 %v3810_v51, %v3806_v1  ;;  %v8391_v47 = vpop.f32.mrf.mxu1 }
 0x1f3   : > { %v3818_v43 = vmul.f32 0.25, %v3750_v0  ;;  %v3822_v17 = vmul.f32 0.75, %v3750_v0  ;;  %v3749_v4 = vmax.f32 %v3717_v40, 0.0  ;;  %v3720_v61 = vadd.f32 %v10327_v50, %v3681_v56  ;;  %8471 = vmatpush3.msra.mxu1 %v10403_v46  ;;  %8465 = vmatprep.mubr.msk.f32.mxu1 %vm3903_vm2, %v10401_v29  ;;  %v11431_v56 = vld [vmem:[#allocation29_spill] sm:$0xff] }
 0x1f4   : > { %v3680_v63 = vadd.f32 %v3577_v59, %v10372_v22  ;;  %8478 = vmatprep.subr.mxu1 %v10405_v52  ;;  %8531 = vmatpush3.msra.mxu0 %v3807_v25  ;;  %v8426_v6 = vpop.f32.mrf.mxu0  ;;  %v3815_v24 = vadd.f32 %v3813_v37, %v3801_v39  ;;  %v10478_v1 = vadd.f32 %v3809_v11, %v3805_v10 }
 0x1f5   : > { %v3817_v44 = vmul.f32 0.25, %v3749_v4  ;;  %v3821_v14 = vmul.f32 0.75, %v3749_v4  ;;  %v3752_v62 = vmax.f32 %v3720_v61, 0.0  ;;  %8466 = vmatmul.mubr.msk.f32.gmra.mxu1 %vm3903_vm2, %v10427_v36  ;;  %8533 = vmatmul.mubr.msk.f32.vlgmr.msra.gmra.mxu0 %vm3903_vm2, %v10395_v5  ;;  %v3683_v46 = vadd.f32 %v8426_v6, %v10375_v30  ;;  %v11430_v30 = vld [vmem:[#allocation28_spill] sm:$0xff] }
 0x1f6   : > { %v3719_v22 = vadd.f32 %v10327_v50, %v3680_v63  ;;  %8548 = vmatprep.subr.mxu0 %v3816_v21  ;;  %v3587_v38 = vpop.f32.mrf.mxu0  ;;  %8472 = vmatprep.mubr.msk.f32.mxu1 %vm3903_vm2, %v11428_v45  ;;  %v3824_v39 = vadd.f32 %v3822_v17, %v3810_v51  ;;  %v10488_v10 = vadd.f32 %v3818_v43, %v3814_v9 }
 0x1f7   : > { %v3826_v31 = vmul.f32 0.25, %v3752_v62  ;;  %v3830_v13 = vmul.f32 0.75, %v3752_v62  ;;  %v3722_v34 = vadd.f32 %v10327_v50, %v3683_v46  ;;  %8549 = vmatpush3.msra.mxu0 %v3816_v21  ;;  %v3682_v23 = vadd.f32 %v3587_v38, %v10378_v28  ;;  %8535 = vmatprep.mubr.msk.f32.mxu0 %vm3903_vm2, %v10401_v29 }
 0x1f8   : > { %v10495_v58 = vadd.f32 %v3237_v8, %v11430_v30  ;;  %v3751_v16 = vmax.f32 %v3719_v22, 0.0  ;;  %8550 = vmatprep.subr.mxu0 %v3815_v24  ;;  %v8429_v27 = vpop.f32.mrf.mxu0  ;;  %v3823_v51 = vadd.f32 %v3821_v14, %v3809_v11  ;;  %v10497_v9 = vadd.f32 %v3817_v44, %v3813_v37  ;;  %v3247_v8 = vpop.f32.mrf.mxu1  ;;  %v11432_v30 = vld [vmem:[#allocation40_spill] sm:$0xff] }
 0x1f9   : > { %v3754_v25 = vmax.f32 %v3722_v34, 0.0  ;;  %v3721_v0 = vadd.f32 %v10327_v50, %v3682_v23  ;;  %8551 = vmatpush3.msra.mxu0 %v3815_v24  ;;  %8473 = vmatmul.mubr.msk.f32.vlgmr.msra.gmra.mxu1 %vm3903_vm2, %v10395_v5  ;;  %v3685_v28 = vadd.f32 %v8429_v27, %v10382_v49  ;;  %v10503_v40 = vadd.f32 %v3830_v13, %v3818_v43 }
 0x1fa   : > { %v10506_v21 = vadd.f32 %v8391_v47, %v11431_v56  ;;  %v3825_v48 = vmul.f32 0.25, %v3751_v16  ;;  %v3829_v59 = vmul.f32 0.75, %v3751_v16  ;;  %8479 = vmatpush3.msra.mxu1 %v10405_v52  ;;  %8536 = vmatmul.mubr.msk.f32.gmra.mxu0 %vm3903_vm2, %v10427_v36  ;;  %v3597_v11 = vpop.f32.mrf.mxu0  ;;  %v10511_v37 = vadd.f32 %v3826_v31, %v3822_v17  ;;  %v8394_v38 = vpop.f32.mrf.mxu1  ;;  %v11433_v56 = vld [vmem:[#allocation39_spill] sm:$0xff] }
 0x1fb   : > { %v3834_v4 = vmul.f32 0.25, %v3754_v25  ;;  %v3838_v61 = vmul.f32 0.75, %v3754_v25  ;;  %v3753_v63 = vmax.f32 %v3721_v0, 0.0  ;;  %8568 = vmatprep.subr.mxu0 %v3824_v39  ;;  %v3724_v49 = vadd.f32 %v10327_v50, %v3685_v28  ;;  %8480 = vmatprep.subr.mxu1 %v10416_v20 }
 0x1fc   : > { %8481 = vmatpush3.msra.mxu1 %v10416_v20  ;;  %v3684_v43 = vadd.f32 %v3597_v11, %v10385_v3  ;;  %8475 = vmatprep.mubr.msk.f32.mxu1 %vm3903_vm2, %v10401_v29  ;;  %v8432_v52 = vpop.f32.mrf.mxu0  ;;  %v10519_v6 = vadd.f32 %v3829_v59, %v3817_v44  ;;  %v10521_v17 = vadd.f32 %v3825_v48, %v3821_v14 }
 0x1fd   : > { %v3833_v24 = vmul.f32 0.25, %v3753_v63  ;;  %v3837_v62 = vmul.f32 0.75, %v3753_v63  ;;  %v3756_v46 = vmax.f32 %v3724_v49, 0.0  ;;  %8488 = vmatprep.subr.mxu1 %v10407_v41  ;;  %8552 = vmatprep.mubr.msk.f32.mxu0 %vm3903_vm2, %v11428_v45  ;;  %v3687_v20 = vadd.f32 %v8432_v52, %v10412_v54 }
 0x1fe   : > { %v3723_v3 = vadd.f32 %v10327_v50, %v3684_v43  ;;  %8476 = vmatmul.mubr.msk.f32.gmra.mxu1 %vm3903_vm2, %v10427_v36  ;;  %8553 = vmatmul.mubr.msk.f32.vlgmr.msra.gmra.mxu0 %vm3903_vm2, %v10395_v5  ;;  %v3607_v44 = vpop.f32.mrf.mxu0  ;;  %v10532_v14 = vadd.f32 %v3838_v61, %v3826_v31  ;;  %v10534_v22 = vadd.f32 %v3834_v4, %v3830_v13 }
 0x1ff   : > { %v3842_v47 = vmul.f32 0.25, %v3756_v46  ;;  %v3846_v34 = vmul.f32 0.75, %v3756_v46  ;;  %8569 = vmatpush3.msra.mxu0 %v3824_v39  ;;  %v3726_v23 = vadd.f32 %v10327_v50, %v3687_v20  ;;  %v3686_v54 = vadd.f32 %v3607_v44, %v10432_v55  ;;  %8482 = vmatprep.mubr.msk.f32.mxu1 %vm3903_vm2, %v11428_v45 }
 0x200   : > { %v10541_v16 = vadd.f32 %v3247_v8, %v11432_v30  ;;  %v3755_v27 = vmax.f32 %v3723_v3, 0.0  ;;  %8570 = vmatprep.subr.mxu0 %v3823_v51  ;;  %8555 = vmatprep.mubr.msk.f32.mxu0 %vm3903_vm2, %v10401_v29  ;;  %v8435_v31 = vpop.f32.mrf.mxu0  ;;  %v10545_v13 = vadd.f32 %v3837_v62, %v3825_v48  ;;  %v10547_v25 = vadd.f32 %v3833_v24, %v3829_v59 }
 0x201   : > { %v3758_v39 = vmax.f32 %v3726_v23, 0.0  ;;  %8571 = vmatpush3.msra.mxu0 %v3823_v51  ;;  %v3725_v55 = vadd.f32 %v10327_v50, %v3686_v54  ;;  %v3689_v0 = vadd.f32 %v8435_v31, %v10449_v15  ;;  %v10551_v28 = vadd.f32 %v3846_v34, %v3834_v4  ;;  %v3257_v51 = vpop.f32.mrf.mxu1 }
 0x202   : > { %v10554_v11 = vadd.f32 %v8394_v38, %v11433_v56  ;;  %v3841_v8 = vmul.f32 0.25, %v3755_v27  ;;  %v3845_v63 = vmul.f32 0.75, %v3755_v27  ;;  %8588 = vmatprep.subr.mxu0 %v10503_v40  ;;  %8483 = vmatmul.mubr.msk.f32.vlgmr.msra.gmra.mxu1 %vm3903_vm2, %v10395_v5  ;;  %v3617_v48 = vpop.f32.mrf.mxu0  ;;  %v10559_v59 = vadd.f32 %v3842_v47, %v3838_v61 }
 0x203   : > { %v3850_v49 = vmul.f32 0.25, %v3758_v39  ;;  %v3854_v43 = vmul.f32 0.75, %v3758_v39  ;;  %v3757_v52 = vmax.f32 %v3725_v55, 0.0  ;;  %8489 = vmatpush3.msra.mxu1 %v10407_v41  ;;  %8556 = vmatmul.mubr.msk.f32.gmra.mxu0 %vm3903_vm2, %v10427_v36  ;;  %v3728_v15 = vadd.f32 %v10327_v50, %v3689_v0  ;;  %v8397_v54 = vpop.f32.mrf.mxu1 }
 0x204   : > { %8490 = vmatprep.subr.mxu1 %v10418_v19  ;;  %v3688_v4 = vadd.f32 %v3617_v48, %v10457_v18  ;;  %8485 = vmatprep.mubr.msk.f32.mxu1 %vm3903_vm2, %v10401_v29  ;;  %v8438_v61 = vpop.f32.mrf.mxu0  ;;  %v10569_v46 = vadd.f32 %v3845_v63, %v3833_v24  ;;  %v10571_v20 = vadd.f32 %v3841_v8, %v3837_v62 }
 0x205   : > { %v3849_v3 = vmul.f32 0.25, %v3757_v52  ;;  %v3853_v44 = vmul.f32 0.75, %v3757_v52  ;;  %v3760_v41 = vmax.f32 %v3728_v15, 0.0  ;;  %8491 = vmatpush3.msra.mxu1 %v10418_v19  ;;  %8572 = vmatprep.mubr.msk.f32.mxu0 %vm3903_vm2, %v11428_v45  ;;  %v3691_v38 = vadd.f32 %v8438_v61, %v10467_v26 }
 0x206   : > { %v3727_v18 = vadd.f32 %v10327_v50, %v3688_v4  ;;  %8498 = vmatprep.subr.mxu1 %v10429_v57  ;;  %8486 = vmatmul.mubr.msk.f32.gmra.mxu1 %vm3903_vm2, %v10427_v36  ;;  %v3627_v24 = vpop.f32.mrf.mxu0  ;;  %v10581_v62 = vadd.f32 %v3854_v43, %v3842_v47  ;;  %v10583_v23 = vadd.f32 %v3850_v49, %v3846_v34 }
 0x207   : > { %v3858_v30 = vmul.f32 0.25, %v3760_v41  ;;  %v3862_v19 = vmul.f32 0.75, %v3760_v41  ;;  %8573 = vmatmul.mubr.msk.f32.vlgmr.msra.gmra.mxu0 %vm3903_vm2, %v10395_v5  ;;  %v3730_v26 = vadd.f32 %v10327_v50, %v3691_v38  ;;  %v3690_v27 = vadd.f32 %v3627_v24, %v10495_v58  ;;  %8492 = vmatprep.mubr.msk.f32.mxu1 %vm3903_vm2, %v11428_v45 }
 0x208   : > { %v3304_v31 = vadd.f32 %v3257_v51, %v10301_v60  ;;  %v3759_v39 = vmax.f32 %v3727_v18, 0.0  ;;  %8589 = vmatpush3.msra.mxu0 %v10503_v40  ;;  %8575 = vmatprep.mubr.msk.f32.mxu0 %vm3903_vm2, %v10401_v29  ;;  %v8441_v47 = vpop.f32.mrf.mxu0  ;;  %v10595_v34 = vadd.f32 %v3853_v44, %v3841_v8  ;;  %v10597_v55 = vadd.f32 %v3849_v3, %v3845_v63  ;;  %v3267_v18 = vpop.f32.mrf.mxu1 }
 0x209   : > { %v3762_v0 = vmax.f32 %v3730_v26, 0.0  ;;  %8590 = vmatprep.subr.mxu0 %v10519_v6  ;;  %v3729_v58 = vadd.f32 %v10327_v50, %v3690_v27  ;;  %v3693_v45 = vadd.f32 %v8441_v47, %v10506_v21  ;;  %v10602_v56 = vadd.f32 %v3862_v19, %v3850_v49 }
 0x20a   : > { %v3307_v60 = vadd.f32 %v8397_v54, %v10309_v2  ;;  %v3857_v40 = vmul.f32 0.25, %v3759_v39  ;;  %v3861_v48 = vmul.f32 0.75, %v3759_v39  ;;  %8591 = vmatpush3.msra.mxu0 %v10519_v6  ;;  %8493 = vmatmul.mubr.msk.f32.vlgmr.msra.gmra.mxu1 %vm3903_vm2, %v10395_v5  ;;  %v3637_v8 = vpop.f32.mrf.mxu0  ;;  %v10608_v63 = vadd.f32 %v3858_v30, %v3854_v43 }
 0x20b   : > { %v3866_v51 = vmul.f32 0.25, %v3762_v0  ;;  %v3870_v52 = vmul.f32 0.75, %v3762_v0  ;;  %v3761_v15 = vmax.f32 %v3729_v58, 0.0  ;;  %8608 = vmatprep.subr.mxu0 %v10532_v14  ;;  %8499 = vmatpush3.msra.mxu1 %v10429_v57  ;;  %v3732_v21 = vadd.f32 %v10327_v50, %v3693_v45 }
 0x20c   : > { %8576 = vmatmul.mubr.msk.f32.gmra.mxu0 %vm3903_vm2, %v10427_v36  ;;  %8500 = vmatprep.subr.mxu1 %v10441_v12  ;;  %v3692_v2 = vadd.f32 %v3637_v8, %v10541_v16  ;;  %v8444_v6 = vpop.f32.mrf.mxu0  ;;  %v10617_v49 = vadd.f32 %v3861_v48, %v3849_v3  ;;  %v10619_v43 = vadd.f32 %v3857_v40, %v3853_v44  ;;  %v10630_v16 = vld [vmem:[%s11235_s3] sm:$0xff] }
 0x20d   : > { %v3865_v4 = vmul.f32 0.25, %v3761_v15  ;;  %v3869_v61 = vmul.f32 0.75, %v3761_v15  ;;  %v3764_v41 = vmax.f32 %v3732_v21, 0.0  ;;  %8501 = vmatpush3.msra.mxu1 %v10441_v12  ;;  %8495 = vmatprep.mubr.msk.f32.mxu1 %vm3903_vm2, %v10401_v29  ;;  %v3695_v57 = vadd.f32 %v8444_v6, %v10554_v11 }
 0x20e   : > { %v3731_v38 = vadd.f32 %v10327_v50, %v3692_v2  ;;  %8508 = vmatprep.subr.mxu1 %v10434_v32  ;;  %8592 = vmatprep.mubr.msk.f32.mxu0 %vm3903_vm2, %v10630_v16  ;;  %v3647_v3 = vpop.f32.mrf.mxu0  ;;  %v10634_v44 = vadd.f32 %v3870_v52, %v3858_v30  ;;  %v10636_v12 = vadd.f32 %v3866_v51, %v3862_v19 }
 0x20f   : > { %v3874_v24 = vmul.f32 0.25, %v3764_v41  ;;  %v3878_v11 = vmul.f32 0.75, %v3764_v41  ;;  %8496 = vmatmul.mubr.msk.f32.gmra.mxu1 %vm3903_vm2, %v10427_v36  ;;  %v3734_v54 = vadd.f32 %v10327_v50, %v3695_v57  ;;  %v3694_v26 = vadd.f32 %v3647_v3, %v3304_v31 }
 0x210   : > { %v3763_v27 = vmax.f32 %v3731_v38, 0.0  ;;  %8593 = vmatmul.mubr.msk.f32.vlgmr.msra.gmra.mxu0 %vm3903_vm2, %v10395_v5  ;;  %8502 = vmatprep.mubr.msk.f32.mxu1 %vm3903_vm2, %v10630_v16  ;;  %v8447_v30 = vpop.f32.mrf.mxu0  ;;  %v10645_v39 = vadd.f32 %v3869_v61, %v3857_v40  ;;  %v10647_v19 = vadd.f32 %v3865_v4, %v3861_v48  ;;  %v3306_v45 = vadd.f32 %v3267_v18, %v10317_v53 }
 0x211   : > { %8609 = vmatpush3.msra.mxu0 %v10532_v14  ;;  %v3766_v47 = vmax.f32 %v3734_v54, 0.0  ;;  %v3733_v0 = vadd.f32 %v10327_v50, %v3694_v26  ;;  %8595 = vmatprep.mubr.msk.f32.mxu0 %vm3903_vm2, %v10401_v29  ;;  %v3697_v31 = vadd.f32 %v8447_v30, %v3307_v60  ;;  %v10653_v58 = vadd.f32 %v3878_v11, %v3866_v51 }
 0x212   : > { %v3873_v8 = vmul.f32 0.25, %v3763_v27  ;;  %v3877_v15 = vmul.f32 0.75, %v3763_v27  ;;  %8610 = vmatprep.subr.mxu0 %v10545_v13  ;;  %v3657_v40 = vpop.f32.mrf.mxu0  ;;  %v10657_v48 = vadd.f32 %v3874_v24, %v3870_v52 }
 0x213   : > { %v3882_v21 = vmul.f32 0.25, %v3766_v47  ;;  %v3886_v14 = vmul.f32 0.75, %v3766_v47  ;;  %8611 = vmatpush3.msra.mxu0 %v10545_v13  ;;  %v3765_v2 = vmax.f32 %v3733_v0, 0.0  ;;  %8503 = vmatmul.mubr.msk.f32.vlgmr.msra.gmra.mxu1 %vm3903_vm2, %v10395_v5  ;;  %v3736_v60 = vadd.f32 %v10327_v50, %v3697_v31 }
 0x214   : > { %8628 = vmatprep.subr.mxu0 %v10551_v28  ;;  %8509 = vmatpush3.msra.mxu1 %v10434_v32  ;;  %v3696_v53 = vadd.f32 %v3657_v40, %v3306_v45  ;;  %v10665_v51 = vadd.f32 %v3877_v15, %v3865_v4  ;;  %v10667_v6 = vadd.f32 %v3873_v8, %v3869_v61 }
 0x215   : > { %v3881_v52 = vmul.f32 0.25, %v3765_v2  ;;  %v3885_v41 = vmul.f32 0.75, %v3765_v2  ;;  %8596 = vmatmul.mubr.msk.f32.gmra.mxu0 %vm3903_vm2, %v10427_v36  ;;  %v3768_v13 = vmax.f32 %v3736_v60, 0.0  ;;  %8510 = vmatprep.subr.mxu1 %v10443_v35  ;;  %v10672_v57 = vadd.f32 %v3886_v14, %v3874_v24 }
 0x216   : > { %8511 = vmatpush3.msra.mxu1 %v10443_v35  ;;  %v3735_v38 = vadd.f32 %v10327_v50, %v3696_v53  ;;  %8505 = vmatprep.mubr.msk.f32.mxu1 %vm3903_vm2, %v10401_v29  ;;  %v10678_v32 = vadd.f32 %v3882_v21, %v3878_v11 }
 0x217   : > { %v10680_v4 = vmul.f32 0.25, %v3768_v13  ;;  %v10682_v61 = vmul.f32 0.75, %v3768_v13  ;;  %8518 = vmatprep.subr.mxu1 %v10452_v33  ;;  %8612 = vmatprep.mubr.msk.f32.mxu0 %vm3903_vm2, %v10630_v16  ;;  %v10687_v3 = vadd.f32 %v3885_v41, %v3873_v8  ;;  %v10689_v18 = vadd.f32 %v3881_v52, %v3877_v15 }
 0x218   : > { %v3767_v35 = vmax.f32 %v3735_v38, 0.0  ;;  %8506 = vmatmul.mubr.msk.f32.gmra.mxu1 %vm3903_vm2, %v10427_v36 }
 0x219   : > { %8613 = vmatmul.mubr.msk.f32.vlgmr.msra.gmra.mxu0 %vm3903_vm2, %v10395_v5  ;;  %8512 = vmatprep.mubr.msk.f32.mxu1 %vm3903_vm2, %v10630_v16  ;;  %v10698_v50 = vadd.f32 %v10682_v61, %v3882_v21  ;;  %v10701_v24 = vadd.f32 %v10680_v4, %v3886_v14 }
 0x21a   : > { %v10703_v11 = vmul.f32 0.25, %v3767_v35  ;;  %v10705_v54 = vmul.f32 0.75, %v3767_v35  ;;  %8629 = vmatpush3.msra.mxu0 %v10551_v28  ;;  %8615 = vmatprep.mubr.msk.f32.mxu0 %vm3903_vm2, %v10401_v29 }
 0x21b   : > { %8630 = vmatprep.subr.mxu0 %v10569_v46 }
 0x21c   : > { %8631 = vmatpush3.msra.mxu0 %v10569_v46  ;;  %8513 = vmatmul.mubr.msk.f32.vlgmr.msra.gmra.mxu1 %vm3903_vm2, %v10395_v5  ;;  %v10715_v26 = vadd.f32 %v10705_v54, %v3881_v52  ;;  %v10718_v27 = vadd.f32 %v10703_v11, %v3885_v41 }
 0x21d   : > { %8648 = vmatprep.subr.mxu0 %v10581_v62  ;;  %8519 = vmatpush3.msra.mxu1 %v10452_v33  ;;  %v3898_v33 = vadd.f32 %v10682_v61, %v10680_v4 }
 0x21e   : > { %8616 = vmatmul.mubr.msk.f32.gmra.mxu0 %vm3903_vm2, %v10427_v36  ;;  %8520 = vmatprep.subr.mxu1 %v10461_v42 }
 0x21f   : > { %8521 = vmatpush3.msra.mxu1 %v10461_v42  ;;  %8515 = vmatprep.mubr.msk.f32.mxu1 %vm3903_vm2, %v10401_v29  ;;  %v3897_v42 = vadd.f32 %v10705_v54, %v10703_v11 }
 0x220   : > { %8538 = vmatprep.subr.mxu1 %v10470_v7  ;;  %8632 = vmatprep.mubr.msk.f32.mxu0 %vm3903_vm2, %v10630_v16 }
 0x221   : > { %8516 = vmatmul.mubr.msk.f32.gmra.mxu1 %vm3903_vm2, %v10427_v36 }
 0x222   : > { %8633 = vmatmul.mubr.msk.f32.vlgmr.msra.gmra.mxu0 %vm3903_vm2, %v10395_v5  ;;  %8522 = vmatprep.mubr.msk.f32.mxu1 %vm3903_vm2, %v10630_v16 }
 0x223   : > { %8649 = vmatpush3.msra.mxu0 %v10581_v62  ;;  %8635 = vmatprep.mubr.msk.f32.mxu0 %vm3903_vm2, %v10401_v29 }
 0x224   : > { %8650 = vmatprep.subr.mxu0 %v10595_v34 }
 0x225   : > { %8651 = vmatpush3.msra.mxu0 %v10595_v34  ;;  %8523 = vmatmul.mubr.msk.f32.vlgmr.msra.gmra.mxu1 %vm3903_vm2, %v10395_v5 }
 0x226   : > { %8668 = vmatprep.subr.mxu0 %v10602_v56  ;;  %8539 = vmatpush3.msra.mxu1 %v10470_v7 }
 0x227   : > { %8636 = vmatmul.mubr.msk.f32.gmra.mxu0 %vm3903_vm2, %v10427_v36  ;;  %8540 = vmatprep.subr.mxu1 %v10478_v1 }
 0x228   : > { %8541 = vmatpush3.msra.mxu1 %v10478_v1  ;;  %8525 = vmatprep.mubr.msk.f32.mxu1 %vm3903_vm2, %v10401_v29 }
 0x229   : > { %8558 = vmatprep.subr.mxu1 %v10488_v10  ;;  %8652 = vmatprep.mubr.msk.f32.mxu0 %vm3903_vm2, %v10630_v16 }
 0x22a   : > { %8526 = vmatmul.mubr.msk.f32.gmra.mxu1 %vm3903_vm2, %v10427_v36 }
 0x22b   : > { %8653 = vmatmul.mubr.msk.f32.vlgmr.msra.gmra.mxu0 %vm3903_vm2, %v10395_v5  ;;  %8542 = vmatprep.mubr.msk.f32.mxu1 %vm3903_vm2, %v10630_v16 }
 0x22c   : > { %8669 = vmatpush3.msra.mxu0 %v10602_v56  ;;  %8655 = vmatprep.mubr.msk.f32.mxu0 %vm3903_vm2, %v10401_v29 }
 0x22d   : > { %8670 = vmatprep.subr.mxu0 %v10617_v49 }
 0x22e   : > { %8671 = vmatpush3.msra.mxu0 %v10617_v49  ;;  %8543 = vmatmul.mubr.msk.f32.vlgmr.msra.gmra.mxu1 %vm3903_vm2, %v10395_v5 }
 0x22f   : > { %8688 = vmatprep.subr.mxu0 %v10634_v44  ;;  %8559 = vmatpush3.msra.mxu1 %v10488_v10 }
 0x230   : > { %8656 = vmatmul.mubr.msk.f32.gmra.mxu0 %vm3903_vm2, %v10427_v36  ;;  %8560 = vmatprep.subr.mxu1 %v10497_v9 }
 0x231   : > { %8561 = vmatpush3.msra.mxu1 %v10497_v9  ;;  %8545 = vmatprep.mubr.msk.f32.mxu1 %vm3903_vm2, %v10401_v29 }
 0x232   : > { %8578 = vmatprep.subr.mxu1 %v10511_v37  ;;  %8672 = vmatprep.mubr.msk.f32.mxu0 %vm3903_vm2, %v10630_v16 }
 0x233   : > { %8546 = vmatmul.mubr.msk.f32.gmra.mxu1 %vm3903_vm2, %v10427_v36 }
 0x234   : > { %8673 = vmatmul.mubr.msk.f32.vlgmr.msra.gmra.mxu0 %vm3903_vm2, %v10395_v5  ;;  %8562 = vmatprep.mubr.msk.f32.mxu1 %vm3903_vm2, %v10630_v16 }
 0x235   : > { %8689 = vmatpush3.msra.mxu0 %v10634_v44  ;;  %8675 = vmatprep.mubr.msk.f32.mxu0 %vm3903_vm2, %v10401_v29 }
 0x236   : > { %8690 = vmatprep.subr.mxu0 %v10645_v39 }
 0x237   : > { %8691 = vmatpush3.msra.mxu0 %v10645_v39  ;;  %8563 = vmatmul.mubr.msk.f32.vlgmr.msra.gmra.mxu1 %vm3903_vm2, %v10395_v5 }
 0x238   : > { %8708 = vmatprep.subr.mxu0 %v10653_v58  ;;  %8579 = vmatpush3.msra.mxu1 %v10511_v37 }
 0x239   : > { %8676 = vmatmul.mubr.msk.f32.gmra.mxu0 %vm3903_vm2, %v10427_v36  ;;  %8580 = vmatprep.subr.mxu1 %v10521_v17 }
 0x23a   : > { %8581 = vmatpush3.msra.mxu1 %v10521_v17  ;;  %8565 = vmatprep.mubr.msk.f32.mxu1 %vm3903_vm2, %v10401_v29 }
 0x23b   : > { %8598 = vmatprep.subr.mxu1 %v10534_v22  ;;  %8692 = vmatprep.mubr.msk.f32.mxu0 %vm3903_vm2, %v10630_v16 }
 0x23c   : > { %8566 = vmatmul.mubr.msk.f32.gmra.mxu1 %vm3903_vm2, %v10427_v36 }
 0x23d   : > { %8693 = vmatmul.mubr.msk.f32.vlgmr.msra.gmra.mxu0 %vm3903_vm2, %v10395_v5  ;;  %8582 = vmatprep.mubr.msk.f32.mxu1 %vm3903_vm2, %v10630_v16 }
 0x23e   : > { %8709 = vmatpush3.msra.mxu0 %v10653_v58  ;;  %8695 = vmatprep.mubr.msk.f32.mxu0 %vm3903_vm2, %v10401_v29 }
 0x23f   : > { %8710 = vmatprep.subr.mxu0 %v10665_v51 }
 0x240   : > { %8711 = vmatpush3.msra.mxu0 %v10665_v51  ;;  %8583 = vmatmul.mubr.msk.f32.vlgmr.msra.gmra.mxu1 %vm3903_vm2, %v10395_v5 }
 0x241   : > { %8728 = vmatprep.subr.mxu0 %v10672_v57  ;;  %8599 = vmatpush3.msra.mxu1 %v10534_v22 }
 0x242   : > { %8696 = vmatmul.mubr.msk.f32.gmra.mxu0 %vm3903_vm2, %v10427_v36  ;;  %8600 = vmatprep.subr.mxu1 %v10547_v25 }
 0x243   : > { %8601 = vmatpush3.msra.mxu1 %v10547_v25  ;;  %8585 = vmatprep.mubr.msk.f32.mxu1 %vm3903_vm2, %v10401_v29 }
 0x244   : > { %8618 = vmatprep.subr.mxu1 %v10559_v59  ;;  %8712 = vmatprep.mubr.msk.f32.mxu0 %vm3903_vm2, %v10630_v16 }
 0x245   : > { %8586 = vmatmul.mubr.msk.f32.gmra.mxu1 %vm3903_vm2, %v10427_v36 }
 0x246   : > { %8713 = vmatmul.mubr.msk.f32.vlgmr.msra.gmra.mxu0 %vm3903_vm2, %v10395_v5  ;;  %8602 = vmatprep.mubr.msk.f32.mxu1 %vm3903_vm2, %v10630_v16 }
 0x247   : > { %8729 = vmatpush3.msra.mxu0 %v10672_v57  ;;  %8715 = vmatprep.mubr.msk.f32.mxu0 %vm3903_vm2, %v10401_v29 }
 0x248   : > { %8730 = vmatprep.subr.mxu0 %v10687_v3 }
 0x249   : > { %8731 = vmatpush3.msra.mxu0 %v10687_v3  ;;  %8603 = vmatmul.mubr.msk.f32.vlgmr.msra.gmra.mxu1 %vm3903_vm2, %v10395_v5 }
 0x24a   : > { %8748 = vmatprep.subr.mxu0 %v10698_v50  ;;  %8619 = vmatpush3.msra.mxu1 %v10559_v59 }
 0x24b   : > { %8716 = vmatmul.mubr.msk.f32.gmra.mxu0 %vm3903_vm2, %v10427_v36  ;;  %8620 = vmatprep.subr.mxu1 %v10571_v20 }
 0x24c   : > { %8621 = vmatpush3.msra.mxu1 %v10571_v20  ;;  %8605 = vmatprep.mubr.msk.f32.mxu1 %vm3903_vm2, %v10401_v29 }
 0x24d   : > { %8638 = vmatprep.subr.mxu1 %v10583_v23  ;;  %8732 = vmatprep.mubr.msk.f32.mxu0 %vm3903_vm2, %v10630_v16 }
 0x24e   : > { %8606 = vmatmul.mubr.msk.f32.gmra.mxu1 %vm3903_vm2, %v10427_v36 }
 0x24f   : > { %8733 = vmatmul.mubr.msk.f32.vlgmr.msra.gmra.mxu0 %vm3903_vm2, %v10395_v5  ;;  %8622 = vmatprep.mubr.msk.f32.mxu1 %vm3903_vm2, %v10630_v16 }
 0x250   : > { %8749 = vmatpush3.msra.mxu0 %v10698_v50  ;;  %8735 = vmatprep.mubr.msk.f32.mxu0 %vm3903_vm2, %v10401_v29 }
 0x251   : > { %8750 = vmatprep.subr.mxu0 %v10715_v26 }
 0x252   : > { %8751 = vmatpush3.msra.mxu0 %v10715_v26  ;;  %8623 = vmatmul.mubr.msk.f32.vlgmr.msra.gmra.mxu1 %vm3903_vm2, %v10395_v5 }
 0x253   : > { %8639 = vmatpush3.msra.mxu1 %v10583_v23  ;;  %8625 = vmatprep.mubr.msk.f32.mxu1 %vm3903_vm2, %v10401_v29 }
 0x254   : > { %8640 = vmatprep.subr.mxu1 %v10597_v55  ;;  %8736 = vmatmul.mubr.msk.f32.gmra.mxu0 %vm3903_vm2, %v10427_v36 }
 0x255   : > { %8641 = vmatpush3.msra.mxu1 %v10597_v55  ;;  %8752 = vmatprep.mubr.msk.f32.mxu0 %vm3903_vm2, %v10630_v16 }
 0x256   : > { %8658 = vmatprep.subr.mxu1 %v10608_v63  ;;  %8626 = vmatmul.mubr.msk.f32.gmra.mxu1 %vm3903_vm2, %v10427_v36 }
 0x257   : > { %8642 = vmatprep.mubr.msk.f32.mxu1 %vm3903_vm2, %v10630_v16 }
 0x258   : > { %8753 = vmatmul.mubr.msk.f32.vlgmr.msra.gmra.mxu0 %vm3903_vm2, %v10395_v5 }
 0x259   : > { %8755 = vmatprep.mubr.msk.f32.mxu0 %vm3903_vm2, %v10401_v29 }
 0x25a   : > { %8643 = vmatmul.mubr.msk.f32.vlgmr.msra.gmra.mxu1 %vm3903_vm2, %v10395_v5 }
 0x25b   : > { %8659 = vmatpush3.msra.mxu1 %v10608_v63  ;;  %8645 = vmatprep.mubr.msk.f32.mxu1 %vm3903_vm2, %v10401_v29 }
 0x25c   : > { %8660 = vmatprep.subr.mxu1 %v10619_v43  ;;  %8756 = vmatmul.mubr.msk.f32.gmra.mxu0 %vm3903_vm2, %v10427_v36 }
 0x25d   : > { %8661 = vmatpush3.msra.mxu1 %v10619_v43 }
 0x25e   : > { %8678 = vmatprep.subr.mxu1 %v10636_v12  ;;  %8646 = vmatmul.mubr.msk.f32.gmra.mxu1 %vm3903_vm2, %v10427_v36 }
 0x25f   : > { %8662 = vmatprep.mubr.msk.f32.mxu1 %vm3903_vm2, %v10630_v16 }
 0x262   : > { %8663 = vmatmul.mubr.msk.f32.vlgmr.msra.gmra.mxu1 %vm3903_vm2, %v10395_v5 }
 0x263   : > { %8679 = vmatpush3.msra.mxu1 %v10636_v12  ;;  %8665 = vmatprep.mubr.msk.f32.mxu1 %vm3903_vm2, %v10401_v29 }
 0x264   : > { %8680 = vmatprep.subr.mxu1 %v10647_v19 }
 0x265   : > { %8681 = vmatpush3.msra.mxu1 %v10647_v19 }
 0x266   : > { %8698 = vmatprep.subr.mxu1 %v10657_v48  ;;  %8666 = vmatmul.mubr.msk.f32.gmra.mxu1 %vm3903_vm2, %v10427_v36 }
 0x267   : > { %8682 = vmatprep.mubr.msk.f32.mxu1 %vm3903_vm2, %v10630_v16 }
 0x26a   : > { %8683 = vmatmul.mubr.msk.f32.vlgmr.msra.gmra.mxu1 %vm3903_vm2, %v10395_v5 }
 0x26b   : > { %8699 = vmatpush3.msra.mxu1 %v10657_v48  ;;  %8685 = vmatprep.mubr.msk.f32.mxu1 %vm3903_vm2, %v10401_v29 }
 0x26c   : > { %8700 = vmatprep.subr.mxu1 %v10667_v6 }
 0x26d   : > { %8701 = vmatpush3.msra.mxu1 %v10667_v6 }
 0x26e   : > { %8718 = vmatprep.subr.mxu1 %v10678_v32  ;;  %8686 = vmatmul.mubr.msk.f32.gmra.mxu1 %vm3903_vm2, %v10427_v36 }
 0x26f   : > { %8702 = vmatprep.mubr.msk.f32.mxu1 %vm3903_vm2, %v10630_v16 }
 0x272   : > { %8703 = vmatmul.mubr.msk.f32.vlgmr.msra.gmra.mxu1 %vm3903_vm2, %v10395_v5 }
 0x273   : > { %8719 = vmatpush3.msra.mxu1 %v10678_v32  ;;  %8705 = vmatprep.mubr.msk.f32.mxu1 %vm3903_vm2, %v10401_v29 }
 0x274   : > { %8720 = vmatprep.subr.mxu1 %v10689_v18 }
 0x275   : > { %8721 = vmatpush3.msra.mxu1 %v10689_v18 }
 0x276   : > { %8738 = vmatprep.subr.mxu1 %v10701_v24  ;;  %8706 = vmatmul.mubr.msk.f32.gmra.mxu1 %vm3903_vm2, %v10427_v36 }
 0x277   : > { %8722 = vmatprep.mubr.msk.f32.mxu1 %vm3903_vm2, %v10630_v16 }
 0x27a   : > { %8723 = vmatmul.mubr.msk.f32.vlgmr.msra.gmra.mxu1 %vm3903_vm2, %v10395_v5 }
 0x27b   : > { %8739 = vmatpush3.msra.mxu1 %v10701_v24  ;;  %8725 = vmatprep.mubr.msk.f32.mxu1 %vm3903_vm2, %v10401_v29 }
 0x27c   : > { %8740 = vmatprep.subr.mxu1 %v10718_v27 }
 0x27d   : > { %8741 = vmatpush3.msra.mxu1 %v10718_v27 }
 0x27e   : > { %8758 = vmatprep.subr.mxu1 %v3898_v33  ;;  %8726 = vmatmul.mubr.msk.f32.gmra.mxu1 %vm3903_vm2, %v10427_v36 }
 0x27f   : > { %8742 = vmatprep.mubr.msk.f32.mxu1 %vm3903_vm2, %v10630_v16 }
 0x282   : > { %8743 = vmatmul.mubr.msk.f32.vlgmr.msra.gmra.mxu1 %vm3903_vm2, %v10395_v5 }
 0x283   : > { %8759 = vmatpush3.msra.mxu1 %v3898_v33  ;;  %8745 = vmatprep.mubr.msk.f32.mxu1 %vm3903_vm2, %v10401_v29 }
 0x284   : > { %8760 = vmatprep.subr.mxu1 %v3897_v42 }
 0x285   : > { %8761 = vmatpush3.msra.mxu1 %v3897_v42 }
 0x286   : > { %8746 = vmatmul.mubr.msk.f32.gmra.mxu1 %vm3903_vm2, %v10427_v36 }
 0x287   : > { %8762 = vmatprep.mubr.msk.f32.mxu1 %vm3903_vm2, %v10630_v16 }
 0x28a   : > { %8763 = vmatmul.mubr.msk.f32.vlgmr.msra.gmra.mxu1 %vm3903_vm2, %v10395_v5 }
 0x28b   : > { %8765 = vmatprep.mubr.msk.f32.mxu1 %vm3903_vm2, %v10401_v29 }
 0x28e   : > { %8766 = vmatmul.mubr.msk.f32.gmra.mxu1 %vm3903_vm2, %v10427_v36 }
 0x2a8   : > { %v8454_v5 = vpop.f32.mrf.mxu1 }
 0x2a9   : > { %6638 = vst.msk [vmem:[%s10965_s8 + $0x8] sm:$0xff] %vm6636_vm3, %v8454_v5 }
 0x2aa   : > { %v3982_v29 = vpop.f32.mrf.mxu1 }
 0x2ab   : > { %6637 = vst.msk [vmem:[%s10965_s8] sm:$0xff] %vm6636_vm3, %v3982_v29 }
 0x2ac   : > { %v8457_v36 = vpop.f32.mrf.mxu1 }
 0x2ad   : > { %6640 = vst.msk [vmem:[%s10965_s8 + $0x18] sm:$0xff] %vm6636_vm3, %v8457_v36 }
 0x2ae   : > { %v3992_v7 = vpop.f32.mrf.mxu1 }
 0x2af   : > { %6639 = vst.msk [vmem:[%s10965_s8 + $0x10] sm:$0xff] %vm6636_vm3, %v3992_v7 }
 0x2b0   : > { %v8464_v1 = vpop.f32.mrf.mxu1 }
 0x2b1   : > { %6642 = vst.msk [vmem:[%s10965_s8 + $0x28] sm:$0xff] %vm6636_vm3, %v8464_v1 }
 0x2b2   : > { %v4067_v10 = vpop.f32.mrf.mxu1 }
 0x2b3   : > { %6641 = vst.msk [vmem:[%s10965_s8 + $0x20] sm:$0xff] %vm6636_vm3, %v4067_v10 }
 0x2b5   : > { %v8467_v9 = vpop.f32.mrf.mxu1  ;;  %v8534_v37 = vpop.f32.mrf.mxu0 }
 0x2b6   : > { %6644 = vst.msk [vmem:[%s10965_s8 + $0x38] sm:$0xff] %vm6636_vm3, %v8467_v9  ;;  %6670 = vst.msk [vmem:[%s10965_s8 + $0x108] sm:$0xff] %vm6636_vm3, %v8534_v37 }
 0x2b7   : > { %v4077_v17 = vpop.f32.mrf.mxu1  ;;  %v4662_v22 = vpop.f32.mrf.mxu0 }
 0x2b8   : > { %6643 = vst.msk [vmem:[%s10965_s8 + $0x30] sm:$0xff] %vm6636_vm3, %v4077_v17  ;;  %6669 = vst.msk [vmem:[%s10965_s8 + $0x100] sm:$0xff] %vm6636_vm3, %v4662_v22 }
 0x2b9   : > { %v8474_v25 = vpop.f32.mrf.mxu1 }
 0x2ba   : > { %6646 = vst.msk [vmem:[%s10965_s8 + $0x48] sm:$0xff] %vm6636_vm3, %v8474_v25  ;;  %v8537_v28 = vpop.f32.mrf.mxu0 }
 0x2bb   : > { %v4152_v59 = vpop.f32.mrf.mxu1  ;;  %6672 = vst.msk [vmem:[%s10965_s8 + $0x118] sm:$0xff] %vm6636_vm3, %v8537_v28 }
 0x2bc   : > { %6645 = vst.msk [vmem:[%s10965_s8 + $0x40] sm:$0xff] %vm6636_vm3, %v4152_v59  ;;  %v4672_v46 = vpop.f32.mrf.mxu0 }
 0x2bd   : > { %6671 = vst.msk [vmem:[%s10965_s8 + $0x110] sm:$0xff] %vm6636_vm3, %v4672_v46 }
 0x2be   : > { %v8477_v20 = vpop.f32.mrf.mxu1  ;;  %v8554_v62 = vpop.f32.mrf.mxu0 }
 0x2bf   : > { %6648 = vst.msk [vmem:[%s10965_s8 + $0x58] sm:$0xff] %vm6636_vm3, %v8477_v20  ;;  %6678 = vst.msk [vmem:[%s10965_s8 + $0x148] sm:$0xff] %vm6636_vm3, %v8554_v62 }
 0x2c0   : > { %v4162_v23 = vpop.f32.mrf.mxu1  ;;  %v4832_v34 = vpop.f32.mrf.mxu0 }
 0x2c1   : > { %6647 = vst.msk [vmem:[%s10965_s8 + $0x50] sm:$0xff] %vm6636_vm3, %v4162_v23  ;;  %6677 = vst.msk [vmem:[%s10965_s8 + $0x140] sm:$0xff] %vm6636_vm3, %v4832_v34 }
 0x2c2   : > { %v8484_v55 = vpop.f32.mrf.mxu1 }
 0x2c3   : > { %6650 = vst.msk [vmem:[%s10965_s8 + $0x68] sm:$0xff] %vm6636_vm3, %v8484_v55  ;;  %v8557_v56 = vpop.f32.mrf.mxu0 }
 0x2c4   : > { %v4237_v63 = vpop.f32.mrf.mxu1  ;;  %6680 = vst.msk [vmem:[%s10965_s8 + $0x158] sm:$0xff] %vm6636_vm3, %v8557_v56 }
 0x2c5   : > { %6649 = vst.msk [vmem:[%s10965_s8 + $0x60] sm:$0xff] %vm6636_vm3, %v4237_v63  ;;  %v4842_v49 = vpop.f32.mrf.mxu0 }
 0x2c6   : > { %v8487_v43 = vpop.f32.mrf.mxu1  ;;  %6679 = vst.msk [vmem:[%s10965_s8 + $0x150] sm:$0xff] %vm6636_vm3, %v4842_v49 }
 0x2c7   : > { %6652 = vst.msk [vmem:[%s10965_s8 + $0x78] sm:$0xff] %vm6636_vm3, %v8487_v43  ;;  %v8574_v16 = vpop.f32.mrf.mxu0 }
 0x2c8   : > { %v4247_v44 = vpop.f32.mrf.mxu1  ;;  %6686 = vst.msk [vmem:[%s10965_s8 + $0x188] sm:$0xff] %vm6636_vm3, %v8574_v16 }
 0x2c9   : > { %6651 = vst.msk [vmem:[%s10965_s8 + $0x70] sm:$0xff] %vm6636_vm3, %v4247_v44  ;;  %v5002_v12 = vpop.f32.mrf.mxu0 }
 0x2ca   : > { %v8494_v30 = vpop.f32.mrf.mxu1  ;;  %6685 = vst.msk [vmem:[%s10965_s8 + $0x180] sm:$0xff] %vm6636_vm3, %v5002_v12 }
 0x2cb   : > { %6654 = vst.msk [vmem:[%s10965_s8 + $0x88] sm:$0xff] %vm6636_vm3, %v8494_v30 }
 0x2cc   : > { %v4322_v39 = vpop.f32.mrf.mxu1  ;;  %v8577_v19 = vpop.f32.mrf.mxu0 }
 0x2cd   : > { %6653 = vst.msk [vmem:[%s10965_s8 + $0x80] sm:$0xff] %vm6636_vm3, %v4322_v39  ;;  %6688 = vst.msk [vmem:[%s10965_s8 + $0x198] sm:$0xff] %vm6636_vm3, %v8577_v19 }
 0x2ce   : > { %v5012_v47 = vpop.f32.mrf.mxu0 }
 0x2cf   : > { %v8497_v0 = vpop.f32.mrf.mxu1  ;;  %6687 = vst.msk [vmem:[%s10965_s8 + $0x190] sm:$0xff] %vm6636_vm3, %v5012_v47 }
 0x2d0   : > { %6656 = vst.msk [vmem:[%s10965_s8 + $0x98] sm:$0xff] %vm6636_vm3, %v8497_v0  ;;  %v8594_v31 = vpop.f32.mrf.mxu0 }
 0x2d1   : > { %v4332_v58 = vpop.f32.mrf.mxu1  ;;  %6694 = vst.msk [vmem:[%s10965_s8 + $0x1c8] sm:$0xff] %vm6636_vm3, %v8594_v31 }
 0x2d2   : > { %6655 = vst.msk [vmem:[%s10965_s8 + $0x90] sm:$0xff] %vm6636_vm3, %v4332_v58  ;;  %v5172_v45 = vpop.f32.mrf.mxu0 }
 0x2d3   : > { %v8504_v8 = vpop.f32.mrf.mxu1  ;;  %6693 = vst.msk [vmem:[%s10965_s8 + $0x1c0] sm:$0xff] %vm6636_vm3, %v5172_v45 }
 0x2d4   : > { %6658 = vst.msk [vmem:[%s10965_s8 + $0xa8] sm:$0xff] %vm6636_vm3, %v8504_v8 }
 0x2d5   : > { %v4407_v15 = vpop.f32.mrf.mxu1  ;;  %v8597_v40 = vpop.f32.mrf.mxu0 }
 0x2d6   : > { %6657 = vst.msk [vmem:[%s10965_s8 + $0xa0] sm:$0xff] %vm6636_vm3, %v4407_v15  ;;  %6696 = vst.msk [vmem:[%s10965_s8 + $0x1d8] sm:$0xff] %vm6636_vm3, %v8597_v40 }
 0x2d7   : > { %v5182_v48 = vpop.f32.mrf.mxu0 }
 0x2d8   : > { %v8507_v21 = vpop.f32.mrf.mxu1  ;;  %6695 = vst.msk [vmem:[%s10965_s8 + $0x1d0] sm:$0xff] %vm6636_vm3, %v5182_v48 }
 0x2d9   : > { %6660 = vst.msk [vmem:[%s10965_s8 + $0xb8] sm:$0xff] %vm6636_vm3, %v8507_v21  ;;  %v8614_v14 = vpop.f32.mrf.mxu0 }
 0x2da   : > { %v4417_v2 = vpop.f32.mrf.mxu1  ;;  %6702 = vst.msk [vmem:[%s10965_s8 + $0x208] sm:$0xff] %vm6636_vm3, %v8614_v14 }
 0x2db   : > { %6659 = vst.msk [vmem:[%s10965_s8 + $0xb0] sm:$0xff] %vm6636_vm3, %v4417_v2  ;;  %v5342_v60 = vpop.f32.mrf.mxu0 }
 0x2dc   : > { %v8514_v53 = vpop.f32.mrf.mxu1  ;;  %6701 = vst.msk [vmem:[%s10965_s8 + $0x200] sm:$0xff] %vm6636_vm3, %v5342_v60 }
 0x2dd   : > { %6662 = vst.msk [vmem:[%s10965_s8 + $0xc8] sm:$0xff] %vm6636_vm3, %v8514_v53 }
 0x2de   : > { %v4492_v51 = vpop.f32.mrf.mxu1  ;;  %v8617_v6 = vpop.f32.mrf.mxu0 }
 0x2df   : > { %6661 = vst.msk [vmem:[%s10965_s8 + $0xc0] sm:$0xff] %vm6636_vm3, %v4492_v51  ;;  %6704 = vst.msk [vmem:[%s10965_s8 + $0x218] sm:$0xff] %vm6636_vm3, %v8617_v6 }
 0x2e0   : > { %v5352_v52 = vpop.f32.mrf.mxu0 }
 0x2e1   : > { %v8517_v41 = vpop.f32.mrf.mxu1  ;;  %6703 = vst.msk [vmem:[%s10965_s8 + $0x210] sm:$0xff] %vm6636_vm3, %v5352_v52 }
 0x2e2   : > { %6664 = vst.msk [vmem:[%s10965_s8 + $0xd8] sm:$0xff] %vm6636_vm3, %v8517_v41  ;;  %v8634_v13 = vpop.f32.mrf.mxu0 }
 0x2e3   : > { %v4502_v57 = vpop.f32.mrf.mxu1  ;;  %6710 = vst.msk [vmem:[%s10965_s8 + $0x248] sm:$0xff] %vm6636_vm3, %v8634_v13 }
 0x2e4   : > { %6663 = vst.msk [vmem:[%s10965_s8 + $0xd0] sm:$0xff] %vm6636_vm3, %v4502_v57  ;;  %v5512_v38 = vpop.f32.mrf.mxu0 }
 0x2e5   : > { %v8524_v32 = vpop.f32.mrf.mxu1  ;;  %6709 = vst.msk [vmem:[%s10965_s8 + $0x240] sm:$0xff] %vm6636_vm3, %v5512_v38 }
 0x2e6   : > { %6666 = vst.msk [vmem:[%s10965_s8 + $0xe8] sm:$0xff] %vm6636_vm3, %v8524_v32 }
 0x2e7   : > { %v4577_v4 = vpop.f32.mrf.mxu1  ;;  %v8637_v61 = vpop.f32.mrf.mxu0 }
 0x2e8   : > { %6665 = vst.msk [vmem:[%s10965_s8 + $0xe0] sm:$0xff] %vm6636_vm3, %v4577_v4  ;;  %6712 = vst.msk [vmem:[%s10965_s8 + $0x258] sm:$0xff] %vm6636_vm3, %v8637_v61 }
 0x2e9   : > { %v5522_v3 = vpop.f32.mrf.mxu0 }
 0x2ea   : > { %v8527_v18 = vpop.f32.mrf.mxu1  ;;  %6711 = vst.msk [vmem:[%s10965_s8 + $0x250] sm:$0xff] %vm6636_vm3, %v5522_v3 }
 0x2eb   : > { %6668 = vst.msk [vmem:[%s10965_s8 + $0xf8] sm:$0xff] %vm6636_vm3, %v8527_v18  ;;  %v8654_v35 = vpop.f32.mrf.mxu0 }
 0x2ec   : > { %v4587_v50 = vpop.f32.mrf.mxu1  ;;  %6718 = vst.msk [vmem:[%s10965_s8 + $0x288] sm:$0xff] %vm6636_vm3, %v8654_v35 }
 0x2ed   : > { %6667 = vst.msk [vmem:[%s10965_s8 + $0xf0] sm:$0xff] %vm6636_vm3, %v4587_v50  ;;  %v5682_v24 = vpop.f32.mrf.mxu0 }
 0x2ee   : > { %v8544_v11 = vpop.f32.mrf.mxu1  ;;  %6717 = vst.msk [vmem:[%s10965_s8 + $0x280] sm:$0xff] %vm6636_vm3, %v5682_v24 }
 0x2ef   : > { %6674 = vst.msk [vmem:[%s10965_s8 + $0x128] sm:$0xff] %vm6636_vm3, %v8544_v11 }
 0x2f0   : > { %v4747_v54 = vpop.f32.mrf.mxu1  ;;  %v8657_v26 = vpop.f32.mrf.mxu0 }
 0x2f1   : > { %6673 = vst.msk [vmem:[%s10965_s8 + $0x120] sm:$0xff] %vm6636_vm3, %v4747_v54  ;;  %6720 = vst.msk [vmem:[%s10965_s8 + $0x298] sm:$0xff] %vm6636_vm3, %v8657_v26 }
 0x2f2   : > { %v5692_v27 = vpop.f32.mrf.mxu0 }
 0x2f3   : > { %v8547_v33 = vpop.f32.mrf.mxu1  ;;  %6719 = vst.msk [vmem:[%s10965_s8 + $0x290] sm:$0xff] %vm6636_vm3, %v5692_v27 }
 0x2f4   : > { %6676 = vst.msk [vmem:[%s10965_s8 + $0x138] sm:$0xff] %vm6636_vm3, %v8547_v33  ;;  %v8674_v42 = vpop.f32.mrf.mxu0 }
 0x2f5   : > { %v4757_v5 = vpop.f32.mrf.mxu1  ;;  %6726 = vst.msk [vmem:[%s10965_s8 + $0x2c8] sm:$0xff] %vm6636_vm3, %v8674_v42 }
 0x2f6   : > { %6675 = vst.msk [vmem:[%s10965_s8 + $0x130] sm:$0xff] %vm6636_vm3, %v4757_v5  ;;  %v5852_v29 = vpop.f32.mrf.mxu0 }
 0x2f7   : > { %v8564_v36 = vpop.f32.mrf.mxu1  ;;  %6725 = vst.msk [vmem:[%s10965_s8 + $0x2c0] sm:$0xff] %vm6636_vm3, %v5852_v29 }
 0x2f8   : > { %6682 = vst.msk [vmem:[%s10965_s8 + $0x168] sm:$0xff] %vm6636_vm3, %v8564_v36 }
 0x2f9   : > { %v4917_v7 = vpop.f32.mrf.mxu1  ;;  %v8677_v1 = vpop.f32.mrf.mxu0 }
 0x2fa   : > { %6681 = vst.msk [vmem:[%s10965_s8 + $0x160] sm:$0xff] %vm6636_vm3, %v4917_v7  ;;  %6728 = vst.msk [vmem:[%s10965_s8 + $0x2d8] sm:$0xff] %vm6636_vm3, %v8677_v1 }
 0x2fb   : > { %v5862_v10 = vpop.f32.mrf.mxu0 }
 0x2fc   : > { %v8567_v9 = vpop.f32.mrf.mxu1  ;;  %6727 = vst.msk [vmem:[%s10965_s8 + $0x2d0] sm:$0xff] %vm6636_vm3, %v5862_v10 }
 0x2fd   : > { %6684 = vst.msk [vmem:[%s10965_s8 + $0x178] sm:$0xff] %vm6636_vm3, %v8567_v9  ;;  %v8694_v37 = vpop.f32.mrf.mxu0 }
 0x2fe   : > { %v4927_v17 = vpop.f32.mrf.mxu1  ;;  %6734 = vst.msk [vmem:[%s10965_s8 + $0x308] sm:$0xff] %vm6636_vm3, %v8694_v37 }
 0x2ff   : > { %6683 = vst.msk [vmem:[%s10965_s8 + $0x170] sm:$0xff] %vm6636_vm3, %v4927_v17  ;;  %v6022_v22 = vpop.f32.mrf.mxu0 }
 0x300   : > { %v8584_v25 = vpop.f32.mrf.mxu1  ;;  %6733 = vst.msk [vmem:[%s10965_s8 + $0x300] sm:$0xff] %vm6636_vm3, %v6022_v22 }
 0x301   : > { %6690 = vst.msk [vmem:[%s10965_s8 + $0x1a8] sm:$0xff] %vm6636_vm3, %v8584_v25 }
 0x302   : > { %v5087_v28 = vpop.f32.mrf.mxu1  ;;  %v8697_v59 = vpop.f32.mrf.mxu0 }
 0x303   : > { %6689 = vst.msk [vmem:[%s10965_s8 + $0x1a0] sm:$0xff] %vm6636_vm3, %v5087_v28  ;;  %6736 = vst.msk [vmem:[%s10965_s8 + $0x318] sm:$0xff] %vm6636_vm3, %v8697_v59 }
 0x304   : > { %v6032_v46 = vpop.f32.mrf.mxu0 }
 0x305   : > { %v8587_v20 = vpop.f32.mrf.mxu1  ;;  %6735 = vst.msk [vmem:[%s10965_s8 + $0x310] sm:$0xff] %vm6636_vm3, %v6032_v46 }
 0x306   : > { %6692 = vst.msk [vmem:[%s10965_s8 + $0x1b8] sm:$0xff] %vm6636_vm3, %v8587_v20  ;;  %v8714_v62 = vpop.f32.mrf.mxu0 }
 0x307   : > { %v5097_v23 = vpop.f32.mrf.mxu1  ;;  %6742 = vst.msk [vmem:[%s10965_s8 + $0x348] sm:$0xff] %vm6636_vm3, %v8714_v62 }
 0x308   : > { %6691 = vst.msk [vmem:[%s10965_s8 + $0x1b0] sm:$0xff] %vm6636_vm3, %v5097_v23  ;;  %v6192_v34 = vpop.f32.mrf.mxu0 }
 0x309   : > { %v8604_v55 = vpop.f32.mrf.mxu1  ;;  %6741 = vst.msk [vmem:[%s10965_s8 + $0x340] sm:$0xff] %vm6636_vm3, %v6192_v34 }
 0x30a   : > { %6698 = vst.msk [vmem:[%s10965_s8 + $0x1e8] sm:$0xff] %vm6636_vm3, %v8604_v55 }
 0x30b   : > { %v5257_v56 = vpop.f32.mrf.mxu1  ;;  %v8717_v63 = vpop.f32.mrf.mxu0 }
 0x30c   : > { %6697 = vst.msk [vmem:[%s10965_s8 + $0x1e0] sm:$0xff] %vm6636_vm3, %v5257_v56  ;;  %6744 = vst.msk [vmem:[%s10965_s8 + $0x358] sm:$0xff] %vm6636_vm3, %v8717_v63 }
 0x30d   : > { %v6202_v49 = vpop.f32.mrf.mxu0 }
 0x30e   : > { %v8607_v43 = vpop.f32.mrf.mxu1  ;;  %6743 = vst.msk [vmem:[%s10965_s8 + $0x350] sm:$0xff] %vm6636_vm3, %v6202_v49 }
 0x30f   : > { %6700 = vst.msk [vmem:[%s10965_s8 + $0x1f8] sm:$0xff] %vm6636_vm3, %v8607_v43  ;;  %v8734_v16 = vpop.f32.mrf.mxu0 }
 0x310   : > { %v5267_v44 = vpop.f32.mrf.mxu1  ;;  %6750 = vst.msk [vmem:[%s10965_s8 + $0x388] sm:$0xff] %vm6636_vm3, %v8734_v16 }
 0x311   : > { %6699 = vst.msk [vmem:[%s10965_s8 + $0x1f0] sm:$0xff] %vm6636_vm3, %v5267_v44  ;;  %v6362_v12 = vpop.f32.mrf.mxu0 }
 0x312   : > { %v8624_v30 = vpop.f32.mrf.mxu1  ;;  %6749 = vst.msk [vmem:[%s10965_s8 + $0x380] sm:$0xff] %vm6636_vm3, %v6362_v12 }
 0x313   : > { %6706 = vst.msk [vmem:[%s10965_s8 + $0x228] sm:$0xff] %vm6636_vm3, %v8624_v30 }
 0x314   : > { %v5427_v39 = vpop.f32.mrf.mxu1  ;;  %v8737_v19 = vpop.f32.mrf.mxu0 }
 0x315   : > { %6705 = vst.msk [vmem:[%s10965_s8 + $0x220] sm:$0xff] %vm6636_vm3, %v5427_v39  ;;  %6752 = vst.msk [vmem:[%s10965_s8 + $0x398] sm:$0xff] %vm6636_vm3, %v8737_v19 }
 0x316   : > { %v8627_v47 = vpop.f32.mrf.mxu1  ;;  %v6372_v0 = vpop.f32.mrf.mxu0 }
 0x317   : > { %6708 = vst.msk [vmem:[%s10965_s8 + $0x238] sm:$0xff] %vm6636_vm3, %v8627_v47  ;;  %6751 = vst.msk [vmem:[%s10965_s8 + $0x390] sm:$0xff] %vm6636_vm3, %v6372_v0 }
 0x318   : > { %v5437_v31 = vpop.f32.mrf.mxu1  ;;  %v8754_v58 = vpop.f32.mrf.mxu0 }
 0x319   : > { %6707 = vst.msk [vmem:[%s10965_s8 + $0x230] sm:$0xff] %vm6636_vm3, %v5437_v31  ;;  %6758 = vst.msk [vmem:[%s10965_s8 + $0x3c8] sm:$0xff] %vm6636_vm3, %v8754_v58 }
 0x31a   : > { %v8644_v45 = vpop.f32.mrf.mxu1  ;;  %v6532_v8 = vpop.f32.mrf.mxu0 }
 0x31b   : > { %6714 = vst.msk [vmem:[%s10965_s8 + $0x268] sm:$0xff] %vm6636_vm3, %v8644_v45  ;;  %6757 = vst.msk [vmem:[%s10965_s8 + $0x3c0] sm:$0xff] %vm6636_vm3, %v6532_v8 }
 0x31c   : > { %v5597_v15 = vpop.f32.mrf.mxu1  ;;  %v8757_v40 = vpop.f32.mrf.mxu0 }
 0x31d   : > { %6713 = vst.msk [vmem:[%s10965_s8 + $0x260] sm:$0xff] %vm6636_vm3, %v5597_v15  ;;  %6760 = vst.msk [vmem:[%s10965_s8 + $0x3d8] sm:$0xff] %vm6636_vm3, %v8757_v40 }
 0x31e   : > { %v8647_v48 = vpop.f32.mrf.mxu1  ;;  %v6542_v21 = vpop.f32.mrf.mxu0 }
 0x31f   : > { %6716 = vst.msk [vmem:[%s10965_s8 + $0x278] sm:$0xff] %vm6636_vm3, %v8647_v48  ;;  %6759 = vst.msk [vmem:[%s10965_s8 + $0x3d0] sm:$0xff] %vm6636_vm3, %v6542_v21 }
 0x320   : > { %v5607_v14 = vpop.f32.mrf.mxu1 }
 0x321   : > { %6715 = vst.msk [vmem:[%s10965_s8 + $0x270] sm:$0xff] %vm6636_vm3, %v5607_v14 }
 0x322   : > { %v8664_v2 = vpop.f32.mrf.mxu1 }
 0x323   : > { %6722 = vst.msk [vmem:[%s10965_s8 + $0x2a8] sm:$0xff] %vm6636_vm3, %v8664_v2 }
 0x324   : > { %v5767_v60 = vpop.f32.mrf.mxu1 }
 0x325   : > { %6721 = vst.msk [vmem:[%s10965_s8 + $0x2a0] sm:$0xff] %vm6636_vm3, %v5767_v60 }
 0x326   : > { %v8667_v53 = vpop.f32.mrf.mxu1 }
 0x327   : > { %6724 = vst.msk [vmem:[%s10965_s8 + $0x2b8] sm:$0xff] %vm6636_vm3, %v8667_v53 }
 0x328   : > { %v5777_v51 = vpop.f32.mrf.mxu1 }
 0x329   : > { %6723 = vst.msk [vmem:[%s10965_s8 + $0x2b0] sm:$0xff] %vm6636_vm3, %v5777_v51 }
 0x32a   : > { %v8684_v6 = vpop.f32.mrf.mxu1 }
 0x32b   : > { %6730 = vst.msk [vmem:[%s10965_s8 + $0x2e8] sm:$0xff] %vm6636_vm3, %v8684_v6 }
 0x32c   : > { %v5937_v52 = vpop.f32.mrf.mxu1 }
 0x32d   : > { %6729 = vst.msk [vmem:[%s10965_s8 + $0x2e0] sm:$0xff] %vm6636_vm3, %v5937_v52 }
 0x32e   : > { %v8687_v41 = vpop.f32.mrf.mxu1 }
 0x32f   : > { %6732 = vst.msk [vmem:[%s10965_s8 + $0x2f8] sm:$0xff] %vm6636_vm3, %v8687_v41 }
 0x330   : > { %v5947_v13 = vpop.f32.mrf.mxu1 }
 0x331   : > { %6731 = vst.msk [vmem:[%s10965_s8 + $0x2f0] sm:$0xff] %vm6636_vm3, %v5947_v13 }
 0x332   : > { %v8704_v57 = vpop.f32.mrf.mxu1 }
 0x333   : > { %6738 = vst.msk [vmem:[%s10965_s8 + $0x328] sm:$0xff] %vm6636_vm3, %v8704_v57 }
 0x334   : > { %v6107_v38 = vpop.f32.mrf.mxu1 }
 0x335   : > { %6737 = vst.msk [vmem:[%s10965_s8 + $0x320] sm:$0xff] %vm6636_vm3, %v6107_v38 }
 0x336   : > { %v8707_v32 = vpop.f32.mrf.mxu1 }
 0x337   : > { %6740 = vst.msk [vmem:[%s10965_s8 + $0x338] sm:$0xff] %vm6636_vm3, %v8707_v32 }
 0x338   : > { %v6117_v4 = vpop.f32.mrf.mxu1 }
 0x339   : > { %6739 = vst.msk [vmem:[%s10965_s8 + $0x330] sm:$0xff] %vm6636_vm3, %v6117_v4 }
 0x33a   : > { %v8724_v61 = vpop.f32.mrf.mxu1 }
 0x33b   : > { %6746 = vst.msk [vmem:[%s10965_s8 + $0x368] sm:$0xff] %vm6636_vm3, %v8724_v61 }
 0x33c   : > { %v6277_v3 = vpop.f32.mrf.mxu1 }
 0x33d   : > { %6745 = vst.msk [vmem:[%s10965_s8 + $0x360] sm:$0xff] %vm6636_vm3, %v6277_v3 }
 0x33e   : > { %v8727_v18 = vpop.f32.mrf.mxu1 }
 0x33f   : > { %6748 = vst.msk [vmem:[%s10965_s8 + $0x378] sm:$0xff] %vm6636_vm3, %v8727_v18 }
 0x340   : > { %v6287_v35 = vpop.f32.mrf.mxu1 }
 0x341   : > { %6747 = vst.msk [vmem:[%s10965_s8 + $0x370] sm:$0xff] %vm6636_vm3, %v6287_v35 }
 0x342   : > { %v8744_v50 = vpop.f32.mrf.mxu1 }
 0x343   : > { %6754 = vst.msk [vmem:[%s10965_s8 + $0x3a8] sm:$0xff] %vm6636_vm3, %v8744_v50 }
 0x344   : > { %v6447_v24 = vpop.f32.mrf.mxu1 }
 0x345   : > { %6753 = vst.msk [vmem:[%s10965_s8 + $0x3a0] sm:$0xff] %vm6636_vm3, %v6447_v24 }
 0x346   : > { %v8747_v11 = vpop.f32.mrf.mxu1 }
 0x347   : > { %6756 = vst.msk [vmem:[%s10965_s8 + $0x3b8] sm:$0xff] %vm6636_vm3, %v8747_v11 }
 0x348   : > { %v6457_v54 = vpop.f32.mrf.mxu1 }
 0x349   : > { %6755 = vst.msk [vmem:[%s10965_s8 + $0x3b0] sm:$0xff] %vm6636_vm3, %v6457_v54 }
 0x34a   : > { %v8764_v26 = vpop.f32.mrf.mxu1 }
 0x34b   : > { %6762 = vst.msk [vmem:[%s10965_s8 + $0x3e8] sm:$0xff] %vm6636_vm3, %v8764_v26 }
 0x34c   : > { %v6617_v27 = vpop.f32.mrf.mxu1 }
 0x34d   : > { %6761 = vst.msk [vmem:[%s10965_s8 + $0x3e0] sm:$0xff] %vm6636_vm3, %v6617_v27 }
 0x34e   : > { %v8767_v33 = vpop.f32.mrf.mxu1 }
 0x34f   : > { %6764 = vst.msk [vmem:[%s10965_s8 + $0x3f8] sm:$0xff] %vm6636_vm3, %v8767_v33 }
 0x350   : > { %v6627_v42 = vpop.f32.mrf.mxu1 }
 0x351   : > { %6763 = vst.msk [vmem:[%s10965_s8 + $0x3f0] sm:$0xff] %vm6636_vm3, %v6627_v42 }
 0x352 PF: > { %s14_s17 = sadd.s32 1, %s8816_s17   ;;  %s11434_s15 = smov %s8812_s16 }
 0x353   : > { %p11_p5 = scmp.ge.s32.totalorder %s14_s17, 4   ;;  %s11435_s16 = smov %s11437_s18 }
 0x355   :  { %13 = sbr.rel (!%p11_p5) target bundleno = 2 (0x2), region = 82 }

</bundles_post_ra>
